<compile_context>
chip_gen: v7x
topology: tpu7x:2x2x1
jax: 0.10.0
libtpu: 0.0.40
codegen_flags: <defaults>
</compile_context>

<pallas_src>
import math
from functools import partial

import jax
import jax.numpy as jnp
from jax import lax
from jax.experimental import pallas as pl
from jax.experimental.pallas import tpu as pltpu

NEG_SLOPE = 0.01          # nn.LeakyReLU default
MASK_VAL = 1e8            # softmax_with_mask constant (reference subtracts 1e8)
L1_EPS = 1e-12            # F.normalize eps
LANE = 128


def _leaky(x):
    return jnp.where(x > 0, x, NEG_SLOPE * x)


def _flatten_last2(a):
    """(B, N, N) -> (B, N*N) row-major, using only minor-dim-safe slices + lane concat."""
    return jnp.concatenate([a[:, i, :] for i in range(a.shape[1])], axis=-1)


# ---------------------------------------------------------------------------
# Fused kernel: EdgeUpdate -> NodeUpdate (x num_layers) -> fc1/fc2, batch-stacked.
# ---------------------------------------------------------------------------
def _fused_kernel(cfg, x_ref, w_ref, adj_ref, logits_ref):
    B, N = cfg["B"], cfg["N"]
    num_layers, res_alpha = cfg["num_layers"], cfg["res_alpha"]

    def get(ent):                     # static slice of the packed bf16 weight slab (free)
        off, r, c = ent
        return w_ref[off:off + r, :c]

    x0 = x_ref[...]                                   # (B, N, D) f32
    D = x0.shape[-1]

    eye = (lax.broadcasted_iota(jnp.int32, (N, N), 0) ==
           lax.broadcasted_iota(jnp.int32, (N, N), 1))
    penalty = jnp.where(eye, jnp.float32(MASK_VAL), jnp.float32(0.0))   # (N, N)
    offdiag = jnp.where(eye, jnp.float32(0.0), jnp.float32(1.0))        # (N, N)

    def pair_slab(p):                 # (B, N, d) -> (B*N*N, d), exp(-|x_i - x_j|)
        d = jnp.exp(-jnp.abs(p[:, :, None, :] - p[:, None, :, :]))      # (B, N, N, d)
        return d.reshape(B * N * N, p.shape[-1])

    node_feat = x0                                    # (B, N, Din); Din grows (node_concat)
    pair_pieces = [pair_slab(x0)]                     # x0 pairwise hoisted out of the loop
    adj_flats = []

    for l, lw in enumerate(cfg["layers"]):
        # ---------------- EdgeUpdateNetwork (adj_type='sim', softmax) ----------------
        e_in = pair_pieces[0] if len(pair_pieces) == 1 else jnp.concatenate(pair_pieces, -1)
        h = e_in                                                        # (B*N*N, Din) f32
        for ent in lw["edge_ws"]:                                       # 1x1 convs == matmuls
            h = _leaky(jnp.dot(h.astype(jnp.bfloat16), get(ent),
                               preferred_element_type=jnp.float32))
        wo = get(lw["edge_wo"]).astype(jnp.float32)                     # (1, H) conv_out w
        bo = get(lw["edge_bo"]).astype(jnp.float32)                     # (1, 1) conv_out b
        hf = h.reshape(B, N, N, h.shape[-1])
        s = jnp.sum(hf * wo[None, None, :, :], axis=-1) + bo            # (B, N, N)
        # softmax_with_mask: subtract 1e8 on the diagonal, softmax over keys (last axis)
        s = s - penalty[None, :, :]
        m = jnp.max(s, axis=-1, keepdims=True)
        e = jnp.exp(s - m)
        adj = e / jnp.sum(e, axis=-1, keepdims=True)                    # (B, N, N) f32
        adj_flats.append(_flatten_last2(adj))

        # ---------------- NodeUpdateNetwork (single conv, node_n_layer=1) ------------
        a = adj * offdiag[None, :, :]                                   # zero diagonal
        a = a / jnp.maximum(jnp.sum(jnp.abs(a), axis=-1, keepdims=True), L1_EPS)
        aggr = jnp.einsum("bij,bjd->bid", a.astype(jnp.bfloat16),
                          node_feat.astype(jnp.bfloat16),
                          preferred_element_type=jnp.float32)           # (B, N, Din)
        din = node_feat.shape[-1]
        nin = jnp.concatenate([node_feat, aggr], axis=-1).reshape(B * N, 2 * din)
        node_new = _leaky(jnp.dot(nin.astype(jnp.bfloat16), get(lw["node_w"]),
                                  preferred_element_type=jnp.float32))  # (B*N, H)
        node_new = node_new.reshape(B, N, node_new.shape[-1])
        node_feat = jnp.concatenate([node_feat, node_new], axis=-1)     # node_concat=True
        if l + 1 < num_layers:
            pair_pieces.append(pair_slab(node_new))

    # -------------------------------- head --------------------------------
    feat = node_feat.reshape(B * N, node_feat.shape[-1])                # (B*N, gnn_inp)
    fc1_b = get(cfg["fc1_b"]).astype(jnp.float32)
    h1 = _leaky(jnp.dot(feat.astype(jnp.bfloat16), get(cfg["fc1_w"]),
                        preferred_element_type=jnp.float32) + fc1_b)    # fc1 + LeakyReLU
    if res_alpha != 0.0:   # trace-time constant: dead FMA skipped when res_alpha == 0
        h1 = res_alpha * x0.reshape(B * N, D) + h1
    fc2_b = get(cfg["fc2_b"]).astype(jnp.float32)
    logits = jnp.dot(h1.astype(jnp.bfloat16), get(cfg["fc2_w"]),
                     preferred_element_type=jnp.float32) + fc2_b        # (B*N, C)

    adj_ref[...] = jnp.concatenate(adj_flats, axis=-1)                  # one full-lane store
    logits_ref[...] = logits.reshape(B, N, logits.shape[-1])


# ---------------------------------------------------------------------------
# Weight packing: one lane-padded bf16 slab, 8-aligned row offsets (static).
# ---------------------------------------------------------------------------
def _pack_params(params, res_alpha, B, N):
    blocks, off = [], 0

    def add(a):
        nonlocal off
        a = jnp.asarray(a, jnp.float32)
        r, c = a.shape
        assert c <= LANE
        r_pad = ((r + 7) // 8) * 8
        blocks.append(jnp.pad(a, ((0, r_pad - r), (0, LANE - c))))
        ent = (off, r, c)
        off += r_pad
        return ent

    layers_cfg = []
    for lp in params["layers"]:
        layers_cfg.append({
            "edge_ws": [add(w) for w in lp["edge_ws"]],
            "edge_wo": add(lp["edge_wo"]),
            "edge_bo": add(lp["edge_bo"]),
            "node_w": add(lp["node_w"]),
        })
    cfg = {
        "B": B, "N": N,
        "num_layers": len(params["layers"]),
        "res_alpha": float(res_alpha),
        "layers": layers_cfg,
        "fc1_w": add(params["fc1_w"]), "fc1_b": add(params["fc1_b"]),
        "fc2_w": add(params["fc2_w"]), "fc2_b": add(params["fc2_b"]),
    }
    slab = jnp.concatenate(blocks, axis=0).astype(jnp.bfloat16)
    return slab, cfg


# ---------------------------------------------------------------------------
# Wrapper: single pallas_call (single grid step, batch stacked into matmul rows).
# ---------------------------------------------------------------------------
def task_aware_relation_forward(all_emb, params, res_alpha=0.0):
    B, N, D = all_emb.shape
    num_layers = len(params["layers"])
    C = params["fc2_w"].shape[1]

    slab, cfg = _pack_params(params, res_alpha, B, N)
    kernel = partial(_fused_kernel, cfg)

    adj_flat, logits = pl.pallas_call(
        kernel,
        out_shape=(jax.ShapeDtypeStruct((B, num_layers * N * N), jnp.float32),
                   jax.ShapeDtypeStruct((B, N, C), jnp.float32)),
        grid=(1,),
        in_specs=[pl.BlockSpec((B, N, D), lambda i: (0, 0, 0)),
                  pl.BlockSpec(slab.shape, lambda i: (0, 0))],
        out_specs=(pl.BlockSpec((B, num_layers * N * N), lambda i: (0, 0)),
                   pl.BlockSpec((B, N, C), lambda i: (0, 0, 0))),
        compiler_params=pltpu.CompilerParams(dimension_semantics=("arbitrary",)),
    )(all_emb.astype(jnp.float32), slab)

    adj4 = adj_flat.reshape(B, num_layers, N, N)
    edge_feat_list = [adj4[:, l:l + 1, :, :] for l in range(num_layers)]   # (B,1,N,N) each
    s_logits = logits[:, :-1, :]
    q_logits = logits[:, -1, :]
    return s_logits, q_logits, edge_feat_list

# TODO(synk): top_k>0 masking, batch_norm/dropout branches and the return_adj
# 'poly' init_adj path are disabled in this config and not ported.


# ---------------------------------------------------------------------------
# Parameter init (deterministic, PyTorch-default-like U(-1/sqrt(fan_in), ...))
# ---------------------------------------------------------------------------
def _uniform(key, shape, fan_in):
    bound = 1.0 / math.sqrt(fan_in)
    return jax.random.uniform(key, shape, jnp.float32, -bound, bound)


def init_params(key, inp_dim, hidden_dim, num_layers, edge_n_layer, num_class):
    keys = iter(jax.random.split(key, 256))
    edge_dims = [hidden_dim] * edge_n_layer
    if edge_n_layer > 1:
        edge_dims[0] = 2 * hidden_dim
    if edge_n_layer > 3:
        edge_dims[1] = 2 * hidden_dim
    node_n_layer = max(1, min(edge_n_layer // 2, 2))
    assert node_n_layer == 1, "kernel implements the single-conv node network"

    params = {"layers": []}
    gnn_inp = inp_dim
    for _ in range(num_layers):
        ws, cin = [], gnn_inp
        for cout in edge_dims:
            ws.append(_uniform(next(keys), (cin, cout), cin))
            cin = cout
        wo = _uniform(next(keys), (1, cin), cin)       # conv_out weight (row vector)
        bo = _uniform(next(keys), (1, 1), cin)         # conv_out bias
        node_w = _uniform(next(keys), (2 * gnn_inp, hidden_dim), 2 * gnn_inp)
        params["layers"].append(dict(edge_ws=ws, edge_wo=wo, edge_bo=bo, node_w=node_w))
        gnn_inp = gnn_inp + hidden_dim                 # node_concat=True
    params["fc1_w"] = _uniform(next(keys), (gnn_inp, inp_dim), gnn_inp)
    params["fc1_b"] = _uniform(next(keys), (1, inp_dim), gnn_inp)
    params["fc2_w"] = _uniform(next(keys), (inp_dim, num_class), inp_dim)
    params["fc2_b"] = _uniform(next(keys), (1, num_class), inp_dim)
    return params


if __name__ == "__main__":
    B, N, D, H = 2, 8, 32, 32          # 2 tasks, 7 support + 1 query node each
    num_layers, edge_n_layer, num_class = 2, 3, 2

    key = jax.random.PRNGKey(0)
    kp, kx = jax.random.split(key)
    params = init_params(kp, D, H, num_layers, edge_n_layer, num_class)
    all_emb = jax.random.normal(kx, (B, N, D), dtype=jnp.float32)

    fwd = jax.jit(partial(task_aware_relation_forward, res_alpha=0.0))
    s_logits, q_logits, edge_feat_list = fwd(all_emb, params)
    jax.block_until_ready((s_logits, q_logits, edge_feat_list))

    assert s_logits.shape == (B, N - 1, num_class)
    assert q_logits.shape == (B, num_class)
    assert len(edge_feat_list) == num_layers
    assert all(a.shape == (B, 1, N, N) for a in edge_feat_list)
    for a in edge_feat_list:       # adjacency rows are softmax outputs -> must sum to ~1
        assert bool(jnp.allclose(jnp.sum(a, axis=-1), 1.0, atol=1e-3))
    assert bool(jnp.all(jnp.isfinite(s_logits))) and bool(jnp.all(jnp.isfinite(q_logits)))
    print("KERNEL_OK")
</pallas_src>

<mosaic_0001>
module attributes {stable_mosaic.version = 11 : i64} {
  func.func @_fused_kernel(%arg0: i32, %arg1: memref<2x8x32xf32, #tpu.memory_space<vmem>>, %arg2: memref<656x128xbf16, #tpu.memory_space<vmem>>, %arg3: memref<2x128xf32, #tpu.memory_space<vmem>>, %arg4: memref<2x8x2xf32, #tpu.memory_space<vmem>>) attributes {dimension_semantics = [#tpu.dimension_semantics<arbitrary>], iteration_bounds = array<i64: 1>, scalar_prefetch = 0 : i64, scratch_operands = 0 : i64, tpu.core_type = #tpu.core_type<tc>, window_params = [{pipeline_mode = #tpu.pipeline_mode<synchronous>, transform_indices = @transform_0, window_bounds = array<i64: 2, 8, 32>}, {pipeline_mode = #tpu.pipeline_mode<synchronous>, transform_indices = @transform_1, window_bounds = array<i64: 656, 128>}, {pipeline_mode = #tpu.pipeline_mode<synchronous>, transform_indices = @transform_2, window_bounds = array<i64: 2, 128>}, {pipeline_mode = #tpu.pipeline_mode<synchronous>, transform_indices = @transform_3, window_bounds = array<i64: 2, 8, 2>}]} {
    %c0 = arith.constant 0 : index
    %c0_0 = arith.constant 0 : index
    %c0_1 = arith.constant 0 : index
    %0 = vector.load %arg1[%c0, %c0_0, %c0_1] : memref<2x8x32xf32, #tpu.memory_space<vmem>>, vector<2x8x32xf32>
    %1 = tpu.iota {dimensions = array<i32: 0>} : vector<8x8xi32>
    %2 = tpu.iota {dimensions = array<i32: 1>} : vector<8x8xi32>
    %3 = arith.cmpi eq, %1, %2 : vector<8x8xi32>
    %cst = arith.constant 1.000000e+08 : f32
    %cst_2 = arith.constant 0.000000e+00 : f32
    %4 = vector.broadcast %cst : f32 to vector<8x8xf32>
    %5 = vector.broadcast %cst_2 : f32 to vector<8x8xf32>
    %6 = arith.select %3, %4, %5 : vector<8x8xi1>, vector<8x8xf32>
    %cst_3 = arith.constant 0.000000e+00 : f32
    %cst_4 = arith.constant 1.000000e+00 : f32
    %7 = vector.broadcast %cst_3 : f32 to vector<8x8xf32>
    %8 = vector.broadcast %cst_4 : f32 to vector<8x8xf32>
    %9 = arith.select %3, %7, %8 : vector<8x8xi1>, vector<8x8xf32>
    %10 = vector.shape_cast %0 : vector<2x8x32xf32> to vector<2x8x1x32xf32>
    %11 = vector.shape_cast %0 : vector<2x8x32xf32> to vector<2x1x8x32xf32>
    %12 = vector.broadcast %10 : vector<2x8x1x32xf32> to vector<2x8x8x32xf32>
    %13 = vector.broadcast %11 : vector<2x1x8x32xf32> to vector<2x8x8x32xf32>
    %14 = arith.subf %12, %13 : vector<2x8x8x32xf32>
    %15 = math.absf %14 : vector<2x8x8x32xf32>
    %cst_5 = arith.constant 0.000000e+00 : f32
    %16 = vector.broadcast %cst_5 : f32 to vector<2x8x8x32xf32>
    %17 = arith.subf %16, %15 : vector<2x8x8x32xf32>
    %18 = math.exp %17 : vector<2x8x8x32xf32>
    %19 = vector.shape_cast %18 : vector<2x8x8x32xf32> to vector<128x32xf32>
    %20 = arith.truncf %19 : vector<128x32xf32> to vector<128x32xbf16>
    %c0_6 = arith.constant 0 : index
    %c0_7 = arith.constant 0 : index
    %21 = vector.load %arg2[%c0_6, %c0_7] : memref<656x128xbf16, #tpu.memory_space<vmem>>, vector<32x64xbf16>
    %cst_8 = arith.constant dense<0.000000e+00> : vector<128x64xf32>
    %22 = tpu.matmul %20, %21, %cst_8 {dimension_numbers = #tpu.dot_dimension_numbers<[1], [0], [0], [1], [0, 0, 1, 1], [], []>} : vector<128x32xbf16>, vector<32x64xbf16>, vector<128x64xf32> -> vector<128x64xf32>
    %cst_9 = arith.constant 0.000000e+00 : f32
    %23 = vector.broadcast %cst_9 : f32 to vector<128x64xf32>
    %24 = arith.cmpf ogt, %22, %23 : vector<128x64xf32>
    %cst_10 = arith.constant 0.00999999977 : f32
    %25 = vector.broadcast %cst_10 : f32 to vector<128x64xf32>
    %26 = arith.mulf %25, %22 : vector<128x64xf32>
    %27 = arith.select %24, %22, %26 : vector<128x64xi1>, vector<128x64xf32>
    %28 = arith.truncf %27 : vector<128x64xf32> to vector<128x64xbf16>
    %c32 = arith.constant 32 : index
    %c0_11 = arith.constant 0 : index
    %29 = vector.load %arg2[%c32, %c0_11] : memref<656x128xbf16, #tpu.memory_space<vmem>>, vector<64x32xbf16>
    %cst_12 = arith.constant dense<0.000000e+00> : vector<128x32xf32>
    %30 = tpu.matmul %28, %29, %cst_12 {dimension_numbers = #tpu.dot_dimension_numbers<[1], [0], [0], [1], [0, 0, 1, 1], [], []>} : vector<128x64xbf16>, vector<64x32xbf16>, vector<128x32xf32> -> vector<128x32xf32>
    %cst_13 = arith.constant 0.000000e+00 : f32
    %31 = vector.broadcast %cst_13 : f32 to vector<128x32xf32>
    %32 = arith.cmpf ogt, %30, %31 : vector<128x32xf32>
    %cst_14 = arith.constant 0.00999999977 : f32
    %33 = vector.broadcast %cst_14 : f32 to vector<128x32xf32>
    %34 = arith.mulf %33, %30 : vector<128x32xf32>
    %35 = arith.select %32, %30, %34 : vector<128x32xi1>, vector<128x32xf32>
    %36 = arith.truncf %35 : vector<128x32xf32> to vector<128x32xbf16>
    %c96 = arith.constant 96 : index
    %c0_15 = arith.constant 0 : index
    %37 = vector.load %arg2[%c96, %c0_15] : memref<656x128xbf16, #tpu.memory_space<vmem>>, vector<32x32xbf16>
    %cst_16 = arith.constant dense<0.000000e+00> : vector<128x32xf32>
    %38 = tpu.matmul %36, %37, %cst_16 {dimension_numbers = #tpu.dot_dimension_numbers<[1], [0], [0], [1], [0, 0, 1, 1], [], []>} : vector<128x32xbf16>, vector<32x32xbf16>, vector<128x32xf32> -> vector<128x32xf32>
    %cst_17 = arith.constant 0.000000e+00 : f32
    %39 = vector.broadcast %cst_17 : f32 to vector<128x32xf32>
    %40 = arith.cmpf ogt, %38, %39 : vector<128x32xf32>
    %cst_18 = arith.constant 0.00999999977 : f32
    %41 = vector.broadcast %cst_18 : f32 to vector<128x32xf32>
    %42 = arith.mulf %41, %38 : vector<128x32xf32>
    %43 = arith.select %40, %38, %42 : vector<128x32xi1>, vector<128x32xf32>
    %c128 = arith.constant 128 : index
    %c0_19 = arith.constant 0 : index
    %44 = vector.load %arg2[%c128, %c0_19] : memref<656x128xbf16, #tpu.memory_space<vmem>>, vector<1x32xbf16>
    %45 = arith.extf %44 : vector<1x32xbf16> to vector<1x32xf32>
    %c136 = arith.constant 136 : index
    %c0_20 = arith.constant 0 : index
    %46 = vector.load %arg2[%c136, %c0_20] : memref<656x128xbf16, #tpu.memory_space<vmem>>, vector<1x1xbf16>
    %47 = arith.extf %46 : vector<1x1xbf16> to vector<1x1xf32>
    %48 = vector.shape_cast %43 : vector<128x32xf32> to vector<2x8x8x32xf32>
    %49 = vector.shape_cast %45 : vector<1x32xf32> to vector<1x1x1x32xf32>
    %50 = vector.broadcast %49 : vector<1x1x1x32xf32> to vector<2x8x8x32xf32>
    %51 = arith.mulf %48, %50 : vector<2x8x8x32xf32>
    %cst_21 = arith.constant dense<0.000000e+00> : vector<2x8x8xf32>
    %52 = vector.multi_reduction <add>, %51, %cst_21 [3] : vector<2x8x8x32xf32> to vector<2x8x8xf32>
    %53 = vector.shape_cast %47 : vector<1x1xf32> to vector<1x1x1xf32>
    %54 = vector.broadcast %53 : vector<1x1x1xf32> to vector<2x8x8xf32>
    %55 = arith.addf %52, %54 : vector<2x8x8xf32>
    %56 = vector.shape_cast %6 : vector<8x8xf32> to vector<1x8x8xf32>
    %57 = vector.broadcast %56 : vector<1x8x8xf32> to vector<2x8x8xf32>
    %58 = arith.subf %55, %57 : vector<2x8x8xf32>
    %cst_22 = arith.constant dense<0xFF800000> : vector<2x8xf32>
    %59 = vector.multi_reduction <maximumf>, %58, %cst_22 [2] : vector<2x8x8xf32> to vector<2x8xf32>
    %60 = vector.shape_cast %59 : vector<2x8xf32> to vector<2x8x1xf32>
    %61 = vector.broadcast %60 : vector<2x8x1xf32> to vector<2x8x8xf32>
    %62 = arith.subf %58, %61 : vector<2x8x8xf32>
    %63 = math.exp %62 : vector<2x8x8xf32>
    %cst_23 = arith.constant dense<0.000000e+00> : vector<2x8xf32>
    %64 = vector.multi_reduction <add>, %63, %cst_23 [2] : vector<2x8x8xf32> to vector<2x8xf32>
    %65 = vector.shape_cast %64 : vector<2x8xf32> to vector<2x8x1xf32>
    %66 = vector.broadcast %65 : vector<2x8x1xf32> to vector<2x8x8xf32>
    %67 = arith.divf %63, %66 : vector<2x8x8xf32>
    %68 = vector.extract_strided_slice %67 {offsets = [0, 0, 0], sizes = [2, 1, 8], strides = [1, 1, 1]} : vector<2x8x8xf32> to vector<2x1x8xf32>
    %69 = vector.shape_cast %68 : vector<2x1x8xf32> to vector<2x8xf32>
    %70 = vector.extract_strided_slice %67 {offsets = [0, 1, 0], sizes = [2, 1, 8], strides = [1, 1, 1]} : vector<2x8x8xf32> to vector<2x1x8xf32>
    %71 = vector.shape_cast %70 : vector<2x1x8xf32> to vector<2x8xf32>
    %72 = vector.extract_strided_slice %67 {offsets = [0, 2, 0], sizes = [2, 1, 8], strides = [1, 1, 1]} : vector<2x8x8xf32> to vector<2x1x8xf32>
    %73 = vector.shape_cast %72 : vector<2x1x8xf32> to vector<2x8xf32>
    %74 = vector.extract_strided_slice %67 {offsets = [0, 3, 0], sizes = [2, 1, 8], strides = [1, 1, 1]} : vector<2x8x8xf32> to vector<2x1x8xf32>
    %75 = vector.shape_cast %74 : vector<2x1x8xf32> to vector<2x8xf32>
    %76 = vector.extract_strided_slice %67 {offsets = [0, 4, 0], sizes = [2, 1, 8], strides = [1, 1, 1]} : vector<2x8x8xf32> to vector<2x1x8xf32>
    %77 = vector.shape_cast %76 : vector<2x1x8xf32> to vector<2x8xf32>
    %78 = vector.extract_strided_slice %67 {offsets = [0, 5, 0], sizes = [2, 1, 8], strides = [1, 1, 1]} : vector<2x8x8xf32> to vector<2x1x8xf32>
    %79 = vector.shape_cast %78 : vector<2x1x8xf32> to vector<2x8xf32>
    %80 = vector.extract_strided_slice %67 {offsets = [0, 6, 0], sizes = [2, 1, 8], strides = [1, 1, 1]} : vector<2x8x8xf32> to vector<2x1x8xf32>
    %81 = vector.shape_cast %80 : vector<2x1x8xf32> to vector<2x8xf32>
    %82 = vector.extract_strided_slice %67 {offsets = [0, 7, 0], sizes = [2, 1, 8], strides = [1, 1, 1]} : vector<2x8x8xf32> to vector<2x1x8xf32>
    %83 = vector.shape_cast %82 : vector<2x1x8xf32> to vector<2x8xf32>
    %84 = tpu.concatenate %69, %71, %73, %75, %77, %79, %81, %83 in 1 : vector<2x8xf32>, vector<2x8xf32>, vector<2x8xf32>, vector<2x8xf32>, vector<2x8xf32>, vector<2x8xf32>, vector<2x8xf32>, vector<2x8xf32> -> vector<2x64xf32>
    %85 = vector.shape_cast %9 : vector<8x8xf32> to vector<1x8x8xf32>
    %86 = vector.broadcast %85 : vector<1x8x8xf32> to vector<2x8x8xf32>
    %87 = arith.mulf %67, %86 : vector<2x8x8xf32>
    %88 = math.absf %87 : vector<2x8x8xf32>
    %cst_24 = arith.constant dense<0.000000e+00> : vector<2x8xf32>
    %89 = vector.multi_reduction <add>, %88, %cst_24 [2] : vector<2x8x8xf32> to vector<2x8xf32>
    %90 = vector.shape_cast %89 : vector<2x8xf32> to vector<2x8x1xf32>
    %cst_25 = arith.constant 9.99999996E-13 : f32
    %91 = vector.broadcast %cst_25 : f32 to vector<2x8x1xf32>
    %92 = arith.maximumf %90, %91 : vector<2x8x1xf32>
    %93 = vector.broadcast %92 : vector<2x8x1xf32> to vector<2x8x8xf32>
    %94 = arith.divf %87, %93 : vector<2x8x8xf32>
    %95 = arith.truncf %94 : vector<2x8x8xf32> to vector<2x8x8xbf16>
    %96 = arith.truncf %0 : vector<2x8x32xf32> to vector<2x8x32xbf16>
    "tpu.trace_start"() <{level = 10 : i32, message = "bij,bjd->bid"}> : () -> ()
    %cst_26 = arith.constant dense<0.000000e+00> : vector<2x8x32xf32>
    %97 = tpu.matmul %95, %96, %cst_26 {dimension_numbers = #tpu.dot_dimension_numbers<[2], [1], [1], [2], [0, 0, 0, 1, 1, 2], [0], [0]>} : vector<2x8x8xbf16>, vector<2x8x32xbf16>, vector<2x8x32xf32> -> vector<2x8x32xf32>
    "tpu.trace_stop"() : () -> ()
    %98 = tpu.concatenate %0, %97 in 2 : vector<2x8x32xf32>, vector<2x8x32xf32> -> vector<2x8x64xf32>
    %99 = vector.shape_cast %98 : vector<2x8x64xf32> to vector<16x64xf32>
    %100 = arith.truncf %99 : vector<16x64xf32> to vector<16x64xbf16>
    %c144 = arith.constant 144 : index
    %c0_27 = arith.constant 0 : index
    %101 = vector.load %arg2[%c144, %c0_27] : memref<656x128xbf16, #tpu.memory_space<vmem>>, vector<64x32xbf16>
    %cst_28 = arith.constant dense<0.000000e+00> : vector<16x32xf32>
    %102 = tpu.matmul %100, %101, %cst_28 {dimension_numbers = #tpu.dot_dimension_numbers<[1], [0], [0], [1], [0, 0, 1, 1], [], []>} : vector<16x64xbf16>, vector<64x32xbf16>, vector<16x32xf32> -> vector<16x32xf32>
    %cst_29 = arith.constant 0.000000e+00 : f32
    %103 = vector.broadcast %cst_29 : f32 to vector<16x32xf32>
    %104 = arith.cmpf ogt, %102, %103 : vector<16x32xf32>
    %cst_30 = arith.constant 0.00999999977 : f32
    %105 = vector.broadcast %cst_30 : f32 to vector<16x32xf32>
    %106 = arith.mulf %105, %102 : vector<16x32xf32>
    %107 = arith.select %104, %102, %106 : vector<16x32xi1>, vector<16x32xf32>
    %108 = vector.shape_cast %107 : vector<16x32xf32> to vector<2x8x32xf32>
    %109 = tpu.concatenate %0, %108 in 2 : vector<2x8x32xf32>, vector<2x8x32xf32> -> vector<2x8x64xf32>
    %110 = vector.shape_cast %108 : vector<2x8x32xf32> to vector<2x8x1x32xf32>
    %111 = vector.shape_cast %108 : vector<2x8x32xf32> to vector<2x1x8x32xf32>
    %112 = vector.broadcast %110 : vector<2x8x1x32xf32> to vector<2x8x8x32xf32>
    %113 = vector.broadcast %111 : vector<2x1x8x32xf32> to vector<2x8x8x32xf32>
    %114 = arith.subf %112, %113 : vector<2x8x8x32xf32>
    %115 = math.absf %114 : vector<2x8x8x32xf32>
    %cst_31 = arith.constant 0.000000e+00 : f32
    %116 = vector.broadcast %cst_31 : f32 to vector<2x8x8x32xf32>
    %117 = arith.subf %116, %115 : vector<2x8x8x32xf32>
    %118 = math.exp %117 : vector<2x8x8x32xf32>
    %119 = vector.shape_cast %118 : vector<2x8x8x32xf32> to vector<128x32xf32>
    %120 = tpu.concatenate %19, %119 in 1 : vector<128x32xf32>, vector<128x32xf32> -> vector<128x64xf32>
    %121 = arith.truncf %120 : vector<128x64xf32> to vector<128x64xbf16>
    %c208 = arith.constant 208 : index
    %c0_32 = arith.constant 0 : index
    %122 = vector.load %arg2[%c208, %c0_32] : memref<656x128xbf16, #tpu.memory_space<vmem>>, vector<64x64xbf16>
    %cst_33 = arith.constant dense<0.000000e+00> : vector<128x64xf32>
    %123 = tpu.matmul %121, %122, %cst_33 {dimension_numbers = #tpu.dot_dimension_numbers<[1], [0], [0], [1], [0, 0, 1, 1], [], []>} : vector<128x64xbf16>, vector<64x64xbf16>, vector<128x64xf32> -> vector<128x64xf32>
    %cst_34 = arith.constant 0.000000e+00 : f32
    %124 = vector.broadcast %cst_34 : f32 to vector<128x64xf32>
    %125 = arith.cmpf ogt, %123, %124 : vector<128x64xf32>
    %cst_35 = arith.constant 0.00999999977 : f32
    %126 = vector.broadcast %cst_35 : f32 to vector<128x64xf32>
    %127 = arith.mulf %126, %123 : vector<128x64xf32>
    %128 = arith.select %125, %123, %127 : vector<128x64xi1>, vector<128x64xf32>
    %129 = arith.truncf %128 : vector<128x64xf32> to vector<128x64xbf16>
    %c272 = arith.constant 272 : index
    %c0_36 = arith.constant 0 : index
    %130 = vector.load %arg2[%c272, %c0_36] : memref<656x128xbf16, #tpu.memory_space<vmem>>, vector<64x32xbf16>
    %cst_37 = arith.constant dense<0.000000e+00> : vector<128x32xf32>
    %131 = tpu.matmul %129, %130, %cst_37 {dimension_numbers = #tpu.dot_dimension_numbers<[1], [0], [0], [1], [0, 0, 1, 1], [], []>} : vector<128x64xbf16>, vector<64x32xbf16>, vector<128x32xf32> -> vector<128x32xf32>
    %cst_38 = arith.constant 0.000000e+00 : f32
    %132 = vector.broadcast %cst_38 : f32 to vector<128x32xf32>
    %133 = arith.cmpf ogt, %131, %132 : vector<128x32xf32>
    %cst_39 = arith.constant 0.00999999977 : f32
    %134 = vector.broadcast %cst_39 : f32 to vector<128x32xf32>
    %135 = arith.mulf %134, %131 : vector<128x32xf32>
    %136 = arith.select %133, %131, %135 : vector<128x32xi1>, vector<128x32xf32>
    %137 = arith.truncf %136 : vector<128x32xf32> to vector<128x32xbf16>
    %c336 = arith.constant 336 : index
    %c0_40 = arith.constant 0 : index
    %138 = vector.load %arg2[%c336, %c0_40] : memref<656x128xbf16, #tpu.memory_space<vmem>>, vector<32x32xbf16>
    %cst_41 = arith.constant dense<0.000000e+00> : vector<128x32xf32>
    %139 = tpu.matmul %137, %138, %cst_41 {dimension_numbers = #tpu.dot_dimension_numbers<[1], [0], [0], [1], [0, 0, 1, 1], [], []>} : vector<128x32xbf16>, vector<32x32xbf16>, vector<128x32xf32> -> vector<128x32xf32>
    %cst_42 = arith.constant 0.000000e+00 : f32
    %140 = vector.broadcast %cst_42 : f32 to vector<128x32xf32>
    %141 = arith.cmpf ogt, %139, %140 : vector<128x32xf32>
    %cst_43 = arith.constant 0.00999999977 : f32
    %142 = vector.broadcast %cst_43 : f32 to vector<128x32xf32>
    %143 = arith.mulf %142, %139 : vector<128x32xf32>
    %144 = arith.select %141, %139, %143 : vector<128x32xi1>, vector<128x32xf32>
    %c368 = arith.constant 368 : index
    %c0_44 = arith.constant 0 : index
    %145 = vector.load %arg2[%c368, %c0_44] : memref<656x128xbf16, #tpu.memory_space<vmem>>, vector<1x32xbf16>
    %146 = arith.extf %145 : vector<1x32xbf16> to vector<1x32xf32>
    %c376 = arith.constant 376 : index
    %c0_45 = arith.constant 0 : index
    %147 = vector.load %arg2[%c376, %c0_45] : memref<656x128xbf16, #tpu.memory_space<vmem>>, vector<1x1xbf16>
    %148 = arith.extf %147 : vector<1x1xbf16> to vector<1x1xf32>
    %149 = vector.shape_cast %144 : vector<128x32xf32> to vector<2x8x8x32xf32>
    %150 = vector.shape_cast %146 : vector<1x32xf32> to vector<1x1x1x32xf32>
    %151 = vector.broadcast %150 : vector<1x1x1x32xf32> to vector<2x8x8x32xf32>
    %152 = arith.mulf %149, %151 : vector<2x8x8x32xf32>
    %cst_46 = arith.constant dense<0.000000e+00> : vector<2x8x8xf32>
    %153 = vector.multi_reduction <add>, %152, %cst_46 [3] : vector<2x8x8x32xf32> to vector<2x8x8xf32>
    %154 = vector.shape_cast %148 : vector<1x1xf32> to vector<1x1x1xf32>
    %155 = vector.broadcast %154 : vector<1x1x1xf32> to vector<2x8x8xf32>
    %156 = arith.addf %153, %155 : vector<2x8x8xf32>
    %157 = vector.shape_cast %6 : vector<8x8xf32> to vector<1x8x8xf32>
    %158 = vector.broadcast %157 : vector<1x8x8xf32> to vector<2x8x8xf32>
    %159 = arith.subf %156, %158 : vector<2x8x8xf32>
    %cst_47 = arith.constant dense<0xFF800000> : vector<2x8xf32>
    %160 = vector.multi_reduction <maximumf>, %159, %cst_47 [2] : vector<2x8x8xf32> to vector<2x8xf32>
    %161 = vector.shape_cast %160 : vector<2x8xf32> to vector<2x8x1xf32>
    %162 = vector.broadcast %161 : vector<2x8x1xf32> to vector<2x8x8xf32>
    %163 = arith.subf %159, %162 : vector<2x8x8xf32>
    %164 = math.exp %163 : vector<2x8x8xf32>
    %cst_48 = arith.constant dense<0.000000e+00> : vector<2x8xf32>
    %165 = vector.multi_reduction <add>, %164, %cst_48 [2] : vector<2x8x8xf32> to vector<2x8xf32>
    %166 = vector.shape_cast %165 : vector<2x8xf32> to vector<2x8x1xf32>
    %167 = vector.broadcast %166 : vector<2x8x1xf32> to vector<2x8x8xf32>
    %168 = arith.divf %164, %167 : vector<2x8x8xf32>
    %169 = vector.extract_strided_slice %168 {offsets = [0, 0, 0], sizes = [2, 1, 8], strides = [1, 1, 1]} : vector<2x8x8xf32> to vector<2x1x8xf32>
    %170 = vector.shape_cast %169 : vector<2x1x8xf32> to vector<2x8xf32>
    %171 = vector.extract_strided_slice %168 {offsets = [0, 1, 0], sizes = [2, 1, 8], strides = [1, 1, 1]} : vector<2x8x8xf32> to vector<2x1x8xf32>
    %172 = vector.shape_cast %171 : vector<2x1x8xf32> to vector<2x8xf32>
    %173 = vector.extract_strided_slice %168 {offsets = [0, 2, 0], sizes = [2, 1, 8], strides = [1, 1, 1]} : vector<2x8x8xf32> to vector<2x1x8xf32>
    %174 = vector.shape_cast %173 : vector<2x1x8xf32> to vector<2x8xf32>
    %175 = vector.extract_strided_slice %168 {offsets = [0, 3, 0], sizes = [2, 1, 8], strides = [1, 1, 1]} : vector<2x8x8xf32> to vector<2x1x8xf32>
    %176 = vector.shape_cast %175 : vector<2x1x8xf32> to vector<2x8xf32>
    %177 = vector.extract_strided_slice %168 {offsets = [0, 4, 0], sizes = [2, 1, 8], strides = [1, 1, 1]} : vector<2x8x8xf32> to vector<2x1x8xf32>
    %178 = vector.shape_cast %177 : vector<2x1x8xf32> to vector<2x8xf32>
    %179 = vector.extract_strided_slice %168 {offsets = [0, 5, 0], sizes = [2, 1, 8], strides = [1, 1, 1]} : vector<2x8x8xf32> to vector<2x1x8xf32>
    %180 = vector.shape_cast %179 : vector<2x1x8xf32> to vector<2x8xf32>
    %181 = vector.extract_strided_slice %168 {offsets = [0, 6, 0], sizes = [2, 1, 8], strides = [1, 1, 1]} : vector<2x8x8xf32> to vector<2x1x8xf32>
    %182 = vector.shape_cast %181 : vector<2x1x8xf32> to vector<2x8xf32>
    %183 = vector.extract_strided_slice %168 {offsets = [0, 7, 0], sizes = [2, 1, 8], strides = [1, 1, 1]} : vector<2x8x8xf32> to vector<2x1x8xf32>
    %184 = vector.shape_cast %183 : vector<2x1x8xf32> to vector<2x8xf32>
    %185 = tpu.concatenate %170, %172, %174, %176, %178, %180, %182, %184 in 1 : vector<2x8xf32>, vector<2x8xf32>, vector<2x8xf32>, vector<2x8xf32>, vector<2x8xf32>, vector<2x8xf32>, vector<2x8xf32>, vector<2x8xf32> -> vector<2x64xf32>
    %186 = vector.shape_cast %9 : vector<8x8xf32> to vector<1x8x8xf32>
    %187 = vector.broadcast %186 : vector<1x8x8xf32> to vector<2x8x8xf32>
    %188 = arith.mulf %168, %187 : vector<2x8x8xf32>
    %189 = math.absf %188 : vector<2x8x8xf32>
    %cst_49 = arith.constant dense<0.000000e+00> : vector<2x8xf32>
    %190 = vector.multi_reduction <add>, %189, %cst_49 [2] : vector<2x8x8xf32> to vector<2x8xf32>
    %191 = vector.shape_cast %190 : vector<2x8xf32> to vector<2x8x1xf32>
    %cst_50 = arith.constant 9.99999996E-13 : f32
    %192 = vector.broadcast %cst_50 : f32 to vector<2x8x1xf32>
    %193 = arith.maximumf %191, %192 : vector<2x8x1xf32>
    %194 = vector.broadcast %193 : vector<2x8x1xf32> to vector<2x8x8xf32>
    %195 = arith.divf %188, %194 : vector<2x8x8xf32>
    %196 = arith.truncf %195 : vector<2x8x8xf32> to vector<2x8x8xbf16>
    %197 = arith.truncf %109 : vector<2x8x64xf32> to vector<2x8x64xbf16>
    "tpu.trace_start"() <{level = 10 : i32, message = "bij,bjd->bid"}> : () -> ()
    %cst_51 = arith.constant dense<0.000000e+00> : vector<2x8x64xf32>
    %198 = tpu.matmul %196, %197, %cst_51 {dimension_numbers = #tpu.dot_dimension_numbers<[2], [1], [1], [2], [0, 0, 0, 1, 1, 2], [0], [0]>} : vector<2x8x8xbf16>, vector<2x8x64xbf16>, vector<2x8x64xf32> -> vector<2x8x64xf32>
    "tpu.trace_stop"() : () -> ()
    %199 = tpu.concatenate %109, %198 in 2 : vector<2x8x64xf32>, vector<2x8x64xf32> -> vector<2x8x128xf32>
    %200 = vector.shape_cast %199 : vector<2x8x128xf32> to vector<16x128xf32>
    %201 = arith.truncf %200 : vector<16x128xf32> to vector<16x128xbf16>
    %c384 = arith.constant 384 : index
    %c0_52 = arith.constant 0 : index
    %202 = vector.load %arg2[%c384, %c0_52] : memref<656x128xbf16, #tpu.memory_space<vmem>>, vector<128x32xbf16>
    %cst_53 = arith.constant dense<0.000000e+00> : vector<16x32xf32>
    %203 = tpu.matmul %201, %202, %cst_53 {dimension_numbers = #tpu.dot_dimension_numbers<[1], [0], [0], [1], [0, 0, 1, 1], [], []>} : vector<16x128xbf16>, vector<128x32xbf16>, vector<16x32xf32> -> vector<16x32xf32>
    %cst_54 = arith.constant 0.000000e+00 : f32
    %204 = vector.broadcast %cst_54 : f32 to vector<16x32xf32>
    %205 = arith.cmpf ogt, %203, %204 : vector<16x32xf32>
    %cst_55 = arith.constant 0.00999999977 : f32
    %206 = vector.broadcast %cst_55 : f32 to vector<16x32xf32>
    %207 = arith.mulf %206, %203 : vector<16x32xf32>
    %208 = arith.select %205, %203, %207 : vector<16x32xi1>, vector<16x32xf32>
    %209 = vector.shape_cast %208 : vector<16x32xf32> to vector<2x8x32xf32>
    %210 = tpu.concatenate %109, %209 in 2 : vector<2x8x64xf32>, vector<2x8x32xf32> -> vector<2x8x96xf32>
    %211 = vector.shape_cast %210 : vector<2x8x96xf32> to vector<16x96xf32>
    %c608 = arith.constant 608 : index
    %c0_56 = arith.constant 0 : index
    %212 = vector.load %arg2[%c608, %c0_56] : memref<656x128xbf16, #tpu.memory_space<vmem>>, vector<1x32xbf16>
    %213 = arith.extf %212 : vector<1x32xbf16> to vector<1x32xf32>
    %214 = arith.truncf %211 : vector<16x96xf32> to vector<16x96xbf16>
    %c512 = arith.constant 512 : index
    %c0_57 = arith.constant 0 : index
    %215 = vector.load %arg2[%c512, %c0_57] : memref<656x128xbf16, #tpu.memory_space<vmem>>, vector<96x32xbf16>
    %cst_58 = arith.constant dense<0.000000e+00> : vector<16x32xf32>
    %216 = tpu.matmul %214, %215, %cst_58 {dimension_numbers = #tpu.dot_dimension_numbers<[1], [0], [0], [1], [0, 0, 1, 1], [], []>} : vector<16x96xbf16>, vector<96x32xbf16>, vector<16x32xf32> -> vector<16x32xf32>
    %217 = vector.broadcast %213 : vector<1x32xf32> to vector<16x32xf32>
    %218 = arith.addf %216, %217 : vector<16x32xf32>
    %cst_59 = arith.constant 0.000000e+00 : f32
    %219 = vector.broadcast %cst_59 : f32 to vector<16x32xf32>
    %220 = arith.cmpf ogt, %218, %219 : vector<16x32xf32>
    %cst_60 = arith.constant 0.00999999977 : f32
    %221 = vector.broadcast %cst_60 : f32 to vector<16x32xf32>
    %222 = arith.mulf %221, %218 : vector<16x32xf32>
    %223 = arith.select %220, %218, %222 : vector<16x32xi1>, vector<16x32xf32>
    %c648 = arith.constant 648 : index
    %c0_61 = arith.constant 0 : index
    %224 = vector.load %arg2[%c648, %c0_61] : memref<656x128xbf16, #tpu.memory_space<vmem>>, vector<1x2xbf16>
    %225 = arith.extf %224 : vector<1x2xbf16> to vector<1x2xf32>
    %226 = arith.truncf %223 : vector<16x32xf32> to vector<16x32xbf16>
    %c616 = arith.constant 616 : index
    %c0_62 = arith.constant 0 : index
    %227 = vector.load %arg2[%c616, %c0_62] : memref<656x128xbf16, #tpu.memory_space<vmem>>, vector<32x2xbf16>
    %cst_63 = arith.constant dense<0.000000e+00> : vector<16x2xf32>
    %228 = tpu.matmul %226, %227, %cst_63 {dimension_numbers = #tpu.dot_dimension_numbers<[1], [0], [0], [1], [0, 0, 1, 1], [], []>} : vector<16x32xbf16>, vector<32x2xbf16>, vector<16x2xf32> -> vector<16x2xf32>
    %229 = vector.broadcast %225 : vector<1x2xf32> to vector<16x2xf32>
    %230 = arith.addf %228, %229 : vector<16x2xf32>
    %231 = tpu.concatenate %84, %185 in 1 : vector<2x64xf32>, vector<2x64xf32> -> vector<2x128xf32>
    %c0_64 = arith.constant 0 : index
    %c0_65 = arith.constant 0 : index
    %232 = vector.load %arg3[%c0_64, %c0_65] : memref<2x128xf32, #tpu.memory_space<vmem>>, vector<2x128xf32>
    tpu.vector_store %arg3[%c0_64, %c0_65], %231 {strides = array<i32>} : memref<2x128xf32, #tpu.memory_space<vmem>>, vector<2x128xf32>,
    %233 = vector.shape_cast %230 : vector<16x2xf32> to vector<2x8x2xf32>
    %c0_66 = arith.constant 0 : index
    %c0_67 = arith.constant 0 : index
    %c0_68 = arith.constant 0 : index
    %234 = vector.load %arg4[%c0_66, %c0_67, %c0_68] : memref<2x8x2xf32, #tpu.memory_space<vmem>>, vector<2x8x2xf32>
    tpu.vector_store %arg4[%c0_66, %c0_67, %c0_68], %233 {strides = array<i32>} : memref<2x8x2xf32, #tpu.memory_space<vmem>>, vector<2x8x2xf32>,
    return
  }
  func.func @transform_0(%arg0: i32) -> (i32, i32, i32) {
    %c0_i32 = arith.constant 0 : i32
    %c0_i32_0 = arith.constant 0 : i32
    %c0_i32_1 = arith.constant 0 : i32
    %c0_i32_2 = arith.constant 0 : i32
    return %c0_i32, %c0_i32_0, %c0_i32_1 : i32, i32, i32
  }
  func.func @transform_1(%arg0: i32) -> (i32, i32) {
    %c0_i32 = arith.constant 0 : i32
    %c0_i32_0 = arith.constant 0 : i32
    %c0_i32_1 = arith.constant 0 : i32
    return %c0_i32, %c0_i32_0 : i32, i32
  }
  func.func @transform_2(%arg0: i32) -> (i32, i32) {
    %c0_i32 = arith.constant 0 : i32
    %c0_i32_0 = arith.constant 0 : i32
    %c0_i32_1 = arith.constant 0 : i32
    return %c0_i32, %c0_i32_0 : i32, i32
  }
  func.func @transform_3(%arg0: i32) -> (i32, i32, i32) {
    %c0_i32 = arith.constant 0 : i32
    %c0_i32_0 = arith.constant 0 : i32
    %c0_i32_1 = arith.constant 0 : i32
    %c0_i32_2 = arith.constant 0 : i32
    return %c0_i32, %c0_i32_0, %c0_i32_1 : i32, i32, i32
  }
}

</mosaic_0001>

<bundles_post_ra>
// kernel: task_aware_relation_forward.1
= control target key start
LH: loop header
LB: loop body
LE: loop exit
PB: predicated region body
PF: predicated region fallthrough
CT: control target
= control target key end

     0   :  { %v16_v0 = vlaneseq  ;;  %v5918_v2 = vmov 1966171168   ;;  %vm307_vm0 = vcmask 261120   ;;  %vm517_vm5 = vcmask 523264   ;;  %s5923_s22 = smov 32   ;;  %s5924_s13 = smov 64   ;;  %s7644_s1 = inlined_call_operand.vmem [shape: bf16[656,128], index: 1, kind: input, shape index: {}]   ;;  %s7645_s0 = inlined_call_operand.vmem [shape: f32[2,8,32], index: 0, kind: input, shape index: {}]   ;;  %s7646_s2 = inlined_call_operand.vmem [shape: f32[2,128], index: 2, kind: output, shape index: {0}]   ;;  %s7647_s3 = inlined_call_operand.vmem [shape: f32[2,8,2], index: 3, kind: output, shape index: {1}]  }
   0x1   :  { %v5618_v1 = vld [vmem:[%s7644_s1] sm:$0xff]   ;;  %v27_v3 = vunpack.c.l.s4 %v5918_v2  ;;  %v5619_v4 = vld [vmem:[%s7644_s1 + $0x8] sm:$0xff]   ;;  %v5622_v11 = vld [vmem:[%s7644_s1 + $0x10] sm:$0xff]  }
   0x2   :  { %v5952_v5 = vshrl.u32 %v16_v0, 7  ;;  %5338 = vmatprep.subr.bf16.mxu0 %v5618_v1  ;;  %v5957_v6 = vld [vmem:[%s7645_s0] sm:$0xff]  ;;  %v5962_v7 = vld [vmem:[%s7645_s0 + $0x8] sm:$0xff]  ;;  %v5623_v14 = vld [vmem:[%s7644_s1 + $0x18] sm:$0xff]   ;;  %5358 = vmatprep.subr.bf16.mxu1 %v5622_v11 }
   0x3   :  { %v28_v8 = vunpack.c.0.s8 %v27_v3  ;;  %5339 = vmatpush3.bf16.msra.mxu0 %v5618_v1  ;;  %v25_v9 = vcombine.high %v5957_v6, %v5957_v6  ;;  %v74_v10 = vcombine.high %v5962_v7, %v5962_v7  ;;  %5359 = vmatpush3.bf16.msra.mxu1 %v5622_v11 }
   0x4   :  { %7701 = vst [vmem:[#allocation2_spill] sm:$0xff] %v5952_v5  ;;  %5340 = vmatprep.subr.bf16.mxu0 %v5619_v4  ;;  %v5975_v13 = vsub.s32 0, %v5952_v5  ;;  %5360 = vmatprep.subr.bf16.mxu1 %v5623_v14 }
   0x5   :  { %v5972_v12 = vsub.s32 %v28_v8, %v5952_v5 }
   0x7   :  { %v32_v15 = vrot.slane %v5957_v6, %v5972_v12  ;;  %v39_v16 = vrot.slane %v25_v9, %v5972_v12  ;;  %v81_v17 = vrot.slane %v5962_v7, %v5972_v12  ;;  %v5986_v18 = vrot.slane %v74_v10, %v5972_v12  ;;  %5341 = vmatpush3.bf16.msra.mxu0 %v5619_v4 }
   0x8   :  { %5361 = vmatpush3.bf16.msra.mxu1 %v5623_v14 }
   0x9   :  { %v40_v19 = vcombine.high %v32_v15, %v32_v15  ;;  %v48_v20 = vrot.slane %v32_v15, %v5972_v12  ;;  %v41_v21 = vcombine.high %v39_v16, %v39_v16  ;;  %v55_v22 = vrot.slane %v39_v16, %v5972_v12 }
   0xa   :  { %v89_v23 = vcombine.high %v81_v17, %v81_v17  ;;  %v5991_v24 = vrot.slane %v81_v17, %v5972_v12  ;;  %v90_v25 = vcombine.high %v5986_v18, %v5986_v18  ;;  %v5997_v26 = vrot.slane %v5986_v18, %v5972_v12 }
   0xb   :  { %v62_v27 = vrot.slane %v40_v19, %v5972_v12  ;;  %v70_v28 = vcombine.high %v48_v20, %v48_v20  ;;  %v126_v29 = vrot.slane %v48_v20, %v5975_v13  ;;  %v69_v30 = vrot.slane %v41_v21, %v5972_v12 }
   0xc   :  { %v142_v31 = vrot.slane %v55_v22, %v5975_v13  ;;  %v71_v32 = vcombine.high %v55_v22, %v55_v22  ;;  %v111_v33 = vrot.slane %v89_v23, %v5972_v12  ;;  %v158_v34 = vrot.slane %v5991_v24, %v5975_v13 }
   0xd   :  { %v72_v35 = vcombine.high %v62_v27, %v62_v27  ;;  %v130_v36 = vrot.slane %v62_v27, %v5975_v13  ;;  %v203_v37 = vsub.f32 %v126_v29, %v5957_v6  ;;  %v134_v38 = vrot.slane %v70_v28, %v5975_v13 }
   0xe   :  { %v146_v39 = vrot.slane %v69_v30, %v5975_v13  ;;  %v207_v40 = vsub.f32 %v142_v31, %v5957_v6  ;;  %v73_v41 = vcombine.high %v69_v30, %v69_v30  ;;  %v150_v42 = vrot.slane %v71_v32, %v5975_v13 }
   0xf   :  { %v204_v43 = vsub.f32 %v130_v36, %v5957_v6  ;;  %v219_v44 = vand.u32 2147483647, %v203_v37  ;;  %v138_v45 = vrot.slane %v72_v35, %v5975_v13  ;;  %v205_v46 = vsub.f32 %v134_v38, %v5957_v6 }
  0x10   :  { %v208_v47 = vsub.f32 %v146_v39, %v5957_v6  ;;  %v223_v48 = vand.u32 2147483647, %v207_v40  ;;  %v154_v49 = vrot.slane %v73_v41, %v5975_v13  ;;  %v209_v50 = vsub.f32 %v150_v42, %v5957_v6 }
  0x11   :  { %v220_v51 = vand.u32 2147483647, %v204_v43  ;;  %v235_v52 = vsub.f32 0.0, %v219_v44  ;;  %v206_v53 = vsub.f32 %v138_v45, %v5957_v6  ;;  %v221_v54 = vand.u32 2147483647, %v205_v46 }
  0x12   :  { %v224_v55 = vand.u32 2147483647, %v208_v47  ;;  %v239_v56 = vsub.f32 0.0, %v223_v48  ;;  %v210_v57 = vsub.f32 %v154_v49, %v5957_v6  ;;  %v225_v58 = vand.u32 2147483647, %v209_v50 }
  0x13   :  { %v236_v59 = vsub.f32 0.0, %v220_v51  ;;  %v251_v60 = vmul.f32 1.442695, %v235_v52  ;;  %v222_v61 = vand.u32 2147483647, %v206_v53  ;;  %v237_v62 = vsub.f32 0.0, %v221_v54 }
  0x14   :  { %v240_v63 = vsub.f32 0.0, %v224_v55  ;;  %v259_v1 = vmul.f32 1.442695, %v239_v56  ;;  %v226_v2 = vand.u32 2147483647, %v210_v57  ;;  %v241_v3 = vsub.f32 0.0, %v225_v58 }
  0x15   :  { %5658 = vpow2.f32 %v251_v60  ;;  %v253_v4 = vmul.f32 1.442695, %v236_v59  ;;  %v238_v8 = vsub.f32 0.0, %v222_v61  ;;  %v255_v9 = vmul.f32 1.442695, %v237_v62 }
  0x16   :  { %5660 = vpow2.f32 %v259_v1  ;;  %v261_v10 = vmul.f32 1.442695, %v240_v63  ;;  %v242_v11 = vsub.f32 0.0, %v226_v2  ;;  %v263_v14 = vmul.f32 1.442695, %v241_v3 }
  0x17   :  { %5662 = vpow2.f32 %v253_v4  ;;  %v257_v15 = vmul.f32 1.442695, %v238_v8  ;;  %v162_v6 = vrot.slane %v111_v33, %v5975_v13  ;;  %v211_v16 = vsub.f32 %v158_v34, %v5962_v7 }
  0x18   :  { %5664 = vpow2.f32 %v255_v9  ;;  %v265_v17 = vmul.f32 1.442695, %v242_v11  ;;  %v119_v18 = vcombine.high %v5991_v24, %v5991_v24  ;;  %v121_v19 = vcombine.high %v111_v33, %v111_v33 }
  0x19   :  { %5666 = vpow2.f32 %v257_v15  ;;  %v212_v20 = vsub.f32 %v162_v6, %v5962_v7  ;;  %v227_v21 = vand.u32 2147483647, %v211_v16  ;;  %v118_v22 = vrot.slane %v90_v25, %v5972_v12 }
  0x1a   :  { %5668 = vpow2.f32 %v261_v10  ;;  %v166_v23 = vrot.slane %v119_v18, %v5975_v13  ;;  %v170_v27 = vrot.slane %v121_v19, %v5975_v13  ;;  %v174_v28 = vrot.slane %v5997_v26, %v5975_v13 }
  0x1b   :  { %5670 = vpow2.f32 %v263_v14  ;;  %v228_v29 = vand.u32 2147483647, %v212_v20  ;;  %v243_v30 = vsub.f32 0.0, %v227_v21  ;;  %v178_v24 = vrot.slane %v118_v22, %v5975_v13 }
  0x1c   :  { %5672 = vpow2.f32 %v265_v17  ;;  %v213_v31 = vsub.f32 %v166_v23, %v5962_v7  ;;  %v214_v32 = vsub.f32 %v170_v27, %v5962_v7  ;;  %v215_v25 = vsub.f32 %v174_v28, %v5962_v7  ;;  %v5624_v27 = vld [vmem:[%s7644_s1 + $0x20] sm:$0xff]   ;;  %v5625_v28 = vld [vmem:[%s7644_s1 + $0x28] sm:$0xff]  }
  0x1d   :  { %v244_v33 = vsub.f32 0.0, %v228_v29  ;;  %v267_v34 = vmul.f32 1.442695, %v243_v30  ;;  %v216_v35 = vsub.f32 %v178_v24, %v5962_v7  ;;  %v120_v36 = vcombine.high %v5997_v26, %v5997_v26  ;;  %5362 = vmatprep.subr.bf16.mxu1 %v5624_v27  ;;  %v5626_v29 = vld [vmem:[%s7644_s1 + $0x30] sm:$0xff]   ;;  %v5627_v30 = vld [vmem:[%s7644_s1 + $0x38] sm:$0xff]  }
  0x1e   :  { %v229_v37 = vand.u32 2147483647, %v213_v31  ;;  %v230_v38 = vand.u32 2147483647, %v214_v32  ;;  %v231_v39 = vand.u32 2147483647, %v215_v25  ;;  %v122_v40 = vcombine.high %v118_v22, %v118_v22  ;;  %5363 = vmatpush3.bf16.msra.mxu1 %v5624_v27  ;;  %5382 = vmatprep.subr.bf16.mxu0 %v5626_v29 }
  0x1f   :  { %v6037_v41 = vpop.eup %5658  ;;  %5674 = vpow2.f32 %v267_v34  ;;  %v269_v42 = vmul.f32 1.442695, %v244_v33  ;;  %v232_v43 = vand.u32 2147483647, %v216_v35  ;;  %v182_v44 = vrot.slane %v120_v36, %v5975_v13  ;;  %5364 = vmatprep.subr.bf16.mxu1 %v5625_v28 }
  0x20   :  { %v6040_v45 = vpop.eup %5660  ;;  %v245_v46 = vsub.f32 0.0, %v229_v37  ;;  %v246_v47 = vsub.f32 0.0, %v230_v38  ;;  %v247_v48 = vsub.f32 0.0, %v231_v39  ;;  %v186_v49 = vrot.slane %v122_v40, %v5975_v13 }
  0x21   :  { %v6043_v50 = vpop.eup %5662  ;;  %5676 = vpow2.f32 %v269_v42  ;;  %v248_v26 = vsub.f32 0.0, %v232_v43  ;;  %v217_v51 = vsub.f32 %v182_v44, %v5962_v7 }
  0x22   :  { %v6046_v52 = vpop.eup %5664  ;;  %v283_v53 = vpack.c.bf16 %v6043_v50, %v6037_v41  ;;  %v271_v54 = vmul.f32 1.442695, %v245_v46  ;;  %v273_v55 = vmul.f32 1.442695, %v246_v47  ;;  %v275_v56 = vmul.f32 1.442695, %v247_v48  ;;  %5365 = vmatpush3.bf16.msra.mxu1 %v5625_v28 }
  0x23   :  { %v6050_v57 = vpop.eup %5666  ;;  %v277_v58 = vmul.f32 1.442695, %v248_v26  ;;  %v218_v59 = vsub.f32 %v186_v49, %v5962_v7  ;;  %v233_v60 = vand.u32 2147483647, %v217_v51 }
  0x24   :  { %v6053_v61 = vpop.eup %5668  ;;  %5342 = vmatprep.mubr.msk.bf16.mxu0 %vm307_vm0, %v283_v53  ;;  %v284_v62 = vpack.c.bf16 %v6050_v57, %v6046_v52  ;;  %5678 = vpow2.f32 %v271_v54 }
  0x25   :  { %v6058_v63 = vpop.eup %5670  ;;  %v285_v1 = vpack.c.bf16 %v6053_v61, %v6040_v45  ;;  %5680 = vpow2.f32 %v273_v55  ;;  %v234_v2 = vand.u32 2147483647, %v218_v59  ;;  %v249_v3 = vsub.f32 0.0, %v233_v60 }
  0x26   :  { %v6062_v4 = vpop.eup %5672  ;;  %5343 = vmatmul.mubr.msk.bf16.vlgmr.msra.gmra.mrb[0].mxu0 %vm307_vm0, %v284_v62  ;;  %5682 = vpow2.f32 %v275_v56 }
  0x27   :  { %5346 = vmatprep.mubr.msk.bf16.mxu0 %vm307_vm0, %v285_v1  ;;  %5684 = vpow2.f32 %v277_v58  ;;  %v250_v7 = vsub.f32 0.0, %v234_v2  ;;  %v279_v8 = vmul.f32 1.442695, %v249_v3  ;;  %v286_v11 = vpack.c.bf16 %v6062_v4, %v6058_v63  ;;  %5383 = vmatpush3.bf16.msra.mxu0 %v5626_v29 }
  0x28   :  { %5384 = vmatprep.subr.bf16.mxu0 %v5627_v30 }
  0x29   :  { %v6066_v9 = vpop.eup %5674  ;;  %v281_v10 = vmul.f32 1.442695, %v250_v7  ;;  %5686 = vpow2.f32 %v279_v8 }
  0x2b   :  { %v6070_v14 = vpop.eup %5676  ;;  %5688 = vpow2.f32 %v281_v10  ;;  %5385 = vmatpush3.bf16.msra.mxu0 %v5627_v30 }
  0x2c   :  { %v287_v15 = vpack.c.bf16 %v6070_v14, %v6066_v9 }
  0x2e   :  { %v6074_v6 = vpop.eup %5678  ;;  %5347 = vmatmul.mubr.msk.bf16.gmra.mrb[4].mxu0 %vm307_vm0, %v286_v11 }
  0x2f   :  { %v6077_v16 = vpop.eup %5680  ;;  %5350 = vmatprep.mubr.msk.bf16.mxu0 %vm307_vm0, %v287_v15 }
  0x30   :  { %v6080_v17 = vpop.eup %5682  ;;  %v288_v19 = vpack.c.bf16 %v6077_v16, %v6074_v6 }
  0x31   :  { %v6082_v18 = vpop.eup %5684 }
  0x32   :  { %v289_v20 = vpack.c.bf16 %v6082_v18, %v6080_v17 }
  0x33   :  { %v6088_v21 = vpop.eup %5686 }
  0x35   :  { %v6091_v22 = vpop.eup %5688 }
  0x36   :  { %5351 = vmatmul.mubr.msk.bf16.gmra.mrb[8].mxu0 %vm307_vm0, %v288_v19  ;;  %v290_v23 = vpack.c.bf16 %v6091_v22, %v6088_v21 }
  0x37   :  { %5354 = vmatprep.mubr.msk.bf16.mxu0 %vm307_vm0, %v289_v20 }
  0x3e   :  { %5355 = vmatmul.mubr.msk.bf16.gmra.mrb[12].mxu0 %vm307_vm0, %v290_v23 }
  0xf9   :  { %v5344_v24 = vpop.f32.mrb[0].mxu0 }
  0xfa   :  { %v447_v31 = vmul.f32 0.01, %v5344_v24  ;;  %v366_v32 = vpop.f32.mrb[1].mxu0  ;;  %vm431_vm1 = vcmp.gt.f32.partialorder %v5344_v24, 0.0 }
  0xfb   :  { %v445_v25 = vmul.f32 0.01, %v366_v32  ;;  %v5345_v33 = vpop.f32.mrb[2].mxu0  ;;  %vm429_vm2 = vcmp.gt.f32.partialorder %v366_v32, 0.0 }
  0xfc   :  { %vm432_vm3 = vcmp.gt.f32.partialorder %v5345_v33, 0.0  ;;  %v448_v34 = vmul.f32 0.01, %v5345_v33  ;;  %v369_v35 = vpop.f32.mrb[3].mxu0  ;;  %v463_v37 = vsel %vm431_vm1, %v5344_v24, %v447_v31 }
  0xfd   :  { %vm430_vm4 = vcmp.gt.f32.partialorder %v369_v35, 0.0  ;;  %v446_v36 = vmul.f32 0.01, %v369_v35  ;;  %v461_v40 = vsel %vm429_vm2, %v366_v32, %v445_v25 }
  0xfe   :  { %v464_v38 = vsel %vm432_vm3, %v5345_v33, %v448_v34 }
  0xff   :  { %v478_v39 = vpack.c.bf16 %v464_v38, %v463_v37  ;;  %v462_v42 = vsel %vm430_vm4, %v369_v35, %v446_v36 }
 0x100   :  { %v477_v43 = vpack.c.bf16 %v462_v42, %v461_v40  ;;  %v6118_v42 = vand.u32 127, %v16_v0 }
 0x101   :  { %v5348_v44 = vpop.f32.mrb[4].mxu0 }
 0x102   :  { %v451_v46 = vmul.f32 0.01, %v5348_v44  ;;  %v382_v47 = vpop.f32.mrb[5].mxu0  ;;  %5366 = vmatprep.mubr.msk.bf16.mxu1 %vm517_vm5, %v477_v43  ;;  %vm435_vm6 = vcmp.gt.f32.partialorder %v5348_v44, 0.0  ;;  %7702 = vst [vmem:[#allocation3_spill] sm:$0xff] %v6118_v42  ;;  %v6121_v43 = vsub.s32 1, %v5952_v5  ;;  %vm20_vm3 = vcmp.eq.s32.totalorder %v5952_v5, %v6118_v42 }
 0x103   :  { %v449_v48 = vmul.f32 0.01, %v382_v47  ;;  %v5349_v49 = vpop.f32.mrb[6].mxu0  ;;  %5367 = vmatmul.mubr.msk.bf16.vlgmr.msra.gmra.mrb[0].mxu1 %vm517_vm5, %v478_v39  ;;  %vm433_vm7 = vcmp.gt.f32.partialorder %v382_v47, 0.0 }
 0x104   :  { %vm436_vm8 = vcmp.gt.f32.partialorder %v5349_v49, 0.0  ;;  %v452_v26 = vmul.f32 0.01, %v5349_v49  ;;  %v385_v51 = vpop.f32.mrb[7].mxu0  ;;  %v467_v54 = vsel %vm435_vm6, %v5348_v44, %v451_v46  ;;  %v7648_v44 = vmov 0.0  }
 0x105   :  { %vm434_vm9 = vcmp.gt.f32.partialorder %v385_v51, 0.0  ;;  %v450_v53 = vmul.f32 0.01, %v385_v51  ;;  %v465_v56 = vsel %vm433_vm7, %v382_v47, %v449_v48  ;;  %5402 = vmatprep.subr.bf16.mxu1 %v7648_v44  ;;  %5414 = vmatprep.subr.bf16.mxu0 %v7648_v44  ;;  %v6128_v46 = vsub.s32 2, %v5952_v5 }
 0x106   :  { %v468_v55 = vsel %vm436_vm8, %v5349_v49, %v452_v26  ;;  %v6134_v0 = vsel %vm20_vm3, 1e+08, %v7648_v44  ;;  %v6137_v47 = vsub.s32 4, %v5952_v5 }
 0x107   :  { %v480_v58 = vpack.c.bf16 %v468_v55, %v467_v54  ;;  %v466_v59 = vsel %vm434_vm9, %v385_v51, %v450_v53  ;;  %v983_v48 = vrot.slane %v6134_v0, %v6121_v43  ;;  %v976_v49 = vrot.slane %v6134_v0, %v5975_v13 }
 0x108   :  { %v479_v60 = vpack.c.bf16 %v466_v59, %v465_v56  ;;  %v990_v26 = vrot.slane %v6134_v0, %v6128_v46  ;;  %v6146_v51 = vsub.s32 3, %v5952_v5  ;;  %v1004_v53 = vrot.slane %v6134_v0, %v6137_v47 }
 0x109   :  { %v5352_v62 = vpop.f32.mrb[8].mxu0  ;;  %985 = vbcast.lane.b32.xlu1 %v983_v48, 256  ;;  %978 = vbcast.lane.b32.xlu0 %v976_v49, 256  ;;  %v6153_v55 = vsub.s32 5, %v5952_v5 }
 0x10a   :  { %v455_v1 = vmul.f32 0.01, %v5352_v62  ;;  %v398_v2 = vpop.f32.mrb[9].mxu0  ;;  %5370 = vmatprep.mubr.msk.bf16.mxu1 %vm517_vm5, %v479_v60  ;;  %vm439_vm10 = vcmp.gt.f32.partialorder %v5352_v62, 0.0  ;;  %v997_v54 = vrot.slane %v6134_v0, %v6146_v51 }
 0x10b   :  { %v453_v3 = vmul.f32 0.01, %v398_v2  ;;  %v5353_v7 = vpop.f32.mrb[10].mxu0  ;;  %5371 = vmatmul.mubr.msk.bf16.gmra.mrb[4].mxu1 %vm517_vm5, %v480_v58  ;;  %vm437_vm11 = vcmp.gt.f32.partialorder %v398_v2, 0.0  ;;  %v1011_v56 = vrot.slane %v6134_v0, %v6153_v55 }
 0x10c   :  { %vm440_vm12 = vcmp.gt.f32.partialorder %v5353_v7, 0.0  ;;  %v456_v8 = vmul.f32 0.01, %v5353_v7  ;;  %v401_v10 = vpop.f32.mrb[11].mxu0  ;;  %v471_v15 = vsel %vm439_vm10, %v5352_v62, %v455_v1 }
 0x10d   :  { %vm438_vm13 = vcmp.gt.f32.partialorder %v401_v10, 0.0  ;;  %v454_v11 = vmul.f32 0.01, %v401_v10  ;;  %v469_v20 = vsel %vm437_vm11, %v398_v2, %v453_v3  ;;  %992 = vbcast.lane.b32.xlu1 %v990_v26, 256  ;;  %1006 = vbcast.lane.b32.xlu0 %v1004_v53, 256 }
 0x10e   :  { %v472_v19 = vsel %vm440_vm12, %v5353_v7, %v456_v8 }
 0x10f   :  { %v482_v23 = vpack.c.bf16 %v472_v19, %v471_v15  ;;  %v470_v27 = vsel %vm438_vm13, %v401_v10, %v454_v11 }
 0x110   :  { %v481_v28 = vpack.c.bf16 %v470_v27, %v469_v20 }
 0x111   :  { %v5356_v29 = vpop.f32.mrb[12].mxu0  ;;  %999 = vbcast.lane.b32.xlu1 %v997_v54, 256 }
 0x112   :  { %v459_v30 = vmul.f32 0.01, %v5356_v29  ;;  %v414_v24 = vpop.f32.mrb[13].mxu0  ;;  %5374 = vmatprep.mubr.msk.bf16.mxu1 %vm517_vm5, %v481_v28  ;;  %vm443_vm14 = vcmp.gt.f32.partialorder %v5356_v29, 0.0 }
 0x113   :  { %v457_v31 = vmul.f32 0.01, %v414_v24  ;;  %v5357_v32 = vpop.f32.mrb[14].mxu0  ;;  %5375 = vmatmul.mubr.msk.bf16.gmra.mrb[8].mxu1 %vm517_vm5, %v482_v23  ;;  %vm441_vm15 = vcmp.gt.f32.partialorder %v414_v24, 0.0 }
 0x114   :  { %vm444_vm1 = vcmp.gt.f32.partialorder %v5357_v32, 0.0  ;;  %v460_v25 = vmul.f32 0.01, %v5357_v32  ;;  %v417_v33 = vpop.f32.mrb[15].mxu0  ;;  %v475_v35 = vsel %vm443_vm14, %v5356_v29, %v459_v30 }
 0x115   :  { %vm442_vm2 = vcmp.gt.f32.partialorder %v417_v33, 0.0  ;;  %v458_v34 = vmul.f32 0.01, %v417_v33  ;;  %v473_v37 = vsel %vm441_vm15, %v414_v24, %v457_v31  ;;  %1013 = vbcast.lane.b32.xlu1 %v1011_v56, 256 }
 0x116   :  { %v476_v36 = vsel %vm444_vm1, %v5357_v32, %v460_v25 }
 0x117   :  { %v484_v38 = vpack.c.bf16 %v476_v36, %v475_v35  ;;  %v474_v39 = vsel %vm442_vm2, %v417_v33, %v458_v34 }
 0x118   :  { %v483_v40 = vpack.c.bf16 %v474_v39, %v473_v37 }
 0x11a   :  { %5378 = vmatprep.mubr.msk.bf16.mxu1 %vm517_vm5, %v483_v40 }
 0x11b   :  { %5379 = vmatmul.mubr.msk.bf16.gmra.mrb[12].mxu1 %vm517_vm5, %v484_v38 }
 0x1d6   :  { %v5368_v58 = vpop.f32.mrb[0].mxu1 }
 0x1d7   :  { %v657_v59 = vmul.f32 0.01, %v5368_v58  ;;  %v576_v60 = vpop.f32.mrb[1].mxu1  ;;  %vm641_vm4 = vcmp.gt.f32.partialorder %v5368_v58, 0.0 }
 0x1d8   :  { %v655_v62 = vmul.f32 0.01, %v576_v60  ;;  %v5369_v1 = vpop.f32.mrb[2].mxu1  ;;  %vm639_vm6 = vcmp.gt.f32.partialorder %v576_v60, 0.0 }
 0x1d9   :  { %vm642_vm7 = vcmp.gt.f32.partialorder %v5369_v1, 0.0  ;;  %v658_v2 = vmul.f32 0.01, %v5369_v1  ;;  %v579_v3 = vpop.f32.mrb[3].mxu1  ;;  %v673_v8 = vsel %vm641_vm4, %v5368_v58, %v657_v59 }
 0x1da   :  { %vm640_vm8 = vcmp.gt.f32.partialorder %v579_v3, 0.0  ;;  %v656_v7 = vmul.f32 0.01, %v579_v3  ;;  %v671_v11 = vsel %vm639_vm6, %v576_v60, %v655_v62 }
 0x1db   :  { %v674_v10 = vsel %vm642_vm7, %v5369_v1, %v658_v2 }
 0x1dc   :  { %v688_v15 = vpack.c.bf16 %v674_v10, %v673_v8  ;;  %v672_v19 = vsel %vm640_vm8, %v579_v3, %v656_v7 }
 0x1dd   :  { %v687_v20 = vpack.c.bf16 %v672_v19, %v671_v11 }
 0x1de   :  { %v5372_v23 = vpop.f32.mrb[4].mxu1 }
 0x1df   :  { %v661_v27 = vmul.f32 0.01, %v5372_v23  ;;  %v592_v28 = vpop.f32.mrb[5].mxu1  ;;  %5386 = vmatprep.mubr.msk.bf16.mxu0 %vm307_vm0, %v687_v20  ;;  %vm645_vm9 = vcmp.gt.f32.partialorder %v5372_v23, 0.0 }
 0x1e0   :  { %v659_v29 = vmul.f32 0.01, %v592_v28  ;;  %v5373_v30 = vpop.f32.mrb[6].mxu1  ;;  %5387 = vmatmul.mubr.msk.bf16.vlgmr.msra.gmra.mrb[16].mxu0 %vm307_vm0, %v688_v15  ;;  %vm643_vm10 = vcmp.gt.f32.partialorder %v592_v28, 0.0 }
 0x1e1   :  { %vm646_vm11 = vcmp.gt.f32.partialorder %v5373_v30, 0.0  ;;  %v662_v24 = vmul.f32 0.01, %v5373_v30  ;;  %v595_v31 = vpop.f32.mrb[7].mxu1  ;;  %v677_v25 = vsel %vm645_vm9, %v5372_v23, %v661_v27 }
 0x1e2   :  { %vm644_vm12 = vcmp.gt.f32.partialorder %v595_v31, 0.0  ;;  %v660_v32 = vmul.f32 0.01, %v595_v31  ;;  %v675_v34 = vsel %vm643_vm10, %v592_v28, %v659_v29 }
 0x1e3   :  { %v678_v33 = vsel %vm646_vm11, %v5373_v30, %v662_v24  ;;  %v882_v24 = vld [vmem:[%s7644_s1 + $0x44] sm:$0x1] }
 0x1e4   :  { %v690_v35 = vpack.c.bf16 %v678_v33, %v677_v25  ;;  %v676_v36 = vsel %vm644_vm12, %v595_v31, %v660_v32  ;;  %v883_v31 = vunpack.c.l.bf16 %v882_v24  ;;  %v880_v32 = vld [vmem:[%s7644_s1 + $0x40] sm:$0x1] }
 0x1e5   :  { %v689_v37 = vpack.c.bf16 %v676_v36, %v675_v34  ;;  %v881_v25 = vunpack.c.l.bf16 %v880_v32 }
 0x1e6   :  { %v5376_v38 = vpop.f32.mrb[8].mxu1  ;;  %5550 = vpush %v883_v31 }
 0x1e7   :  { %v665_v39 = vmul.f32 0.01, %v5376_v38  ;;  %v608_v40 = vpop.f32.mrb[9].mxu1  ;;  %5390 = vmatprep.mubr.msk.bf16.mxu0 %vm307_vm0, %v689_v37  ;;  %vm649_vm13 = vcmp.gt.f32.partialorder %v5376_v38, 0.0  ;;  %v6172_v34 = vrot.slane %v881_v25, %v5975_v13 }
 0x1e8   :  { %v663_v48 = vmul.f32 0.01, %v608_v40  ;;  %v5377_v49 = vpop.f32.mrb[10].mxu1  ;;  %5391 = vmatmul.mubr.msk.bf16.gmra.mrb[20].mxu0 %vm307_vm0, %v690_v35  ;;  %vm647_vm14 = vcmp.gt.f32.partialorder %v608_v40, 0.0 }
 0x1e9   :  { %vm650_vm15 = vcmp.gt.f32.partialorder %v5377_v49, 0.0  ;;  %v666_v26 = vmul.f32 0.01, %v5377_v49  ;;  %v611_v53 = vpop.f32.mrb[11].mxu1  ;;  %v681_v56 = vsel %vm649_vm13, %v5376_v38, %v665_v39 }
 0x1ea   :  { %vm648_vm1 = vcmp.gt.f32.partialorder %v611_v53, 0.0  ;;  %v664_v54 = vmul.f32 0.01, %v611_v53  ;;  %v679_v59 = vsel %vm647_vm14, %v608_v40, %v663_v48 }
 0x1eb   :  { %v682_v58 = vsel %vm650_vm15, %v5377_v49, %v666_v26 }
 0x1ec   :  { %v692_v60 = vpack.c.bf16 %v682_v58, %v681_v56  ;;  %v680_v62 = vsel %vm648_vm1, %v611_v53, %v664_v54 }
 0x1ed   :  { %v691_v1 = vpack.c.bf16 %v680_v62, %v679_v59 }
 0x1ee   :  { %v5380_v2 = vpop.f32.mrb[12].mxu1 }
 0x1ef   :  { %v669_v3 = vmul.f32 0.01, %v5380_v2  ;;  %v624_v7 = vpop.f32.mrb[13].mxu1  ;;  %5394 = vmatprep.mubr.msk.bf16.mxu0 %vm307_vm0, %v691_v1  ;;  %vm653_vm2 = vcmp.gt.f32.partialorder %v5380_v2, 0.0 }
 0x1f0   :  { %v667_v8 = vmul.f32 0.01, %v624_v7  ;;  %v5381_v10 = vpop.f32.mrb[14].mxu1  ;;  %5395 = vmatmul.mubr.msk.bf16.gmra.mrb[24].mxu0 %vm307_vm0, %v692_v60  ;;  %vm651_vm4 = vcmp.gt.f32.partialorder %v624_v7, 0.0 }
 0x1f1   :  { %vm654_vm6 = vcmp.gt.f32.partialorder %v5381_v10, 0.0  ;;  %v670_v11 = vmul.f32 0.01, %v5381_v10  ;;  %v627_v15 = vpop.f32.mrb[15].mxu1  ;;  %v685_v20 = vsel %vm653_vm2, %v5380_v2, %v669_v3 }
 0x1f2   :  { %vm652_vm7 = vcmp.gt.f32.partialorder %v627_v15, 0.0  ;;  %v668_v19 = vmul.f32 0.01, %v627_v15  ;;  %v683_v27 = vsel %vm651_vm4, %v624_v7, %v667_v8 }
 0x1f3   :  { %v686_v23 = vsel %vm654_vm6, %v5381_v10, %v670_v11 }
 0x1f4   :  { %v694_v28 = vpack.c.bf16 %v686_v23, %v685_v20  ;;  %v684_v29 = vsel %vm652_vm7, %v627_v15, %v668_v19 }
 0x1f5   :  { %v693_v30 = vpack.c.bf16 %v684_v29, %v683_v27 }
 0x1f7   :  { %5398 = vmatprep.mubr.msk.bf16.mxu0 %vm307_vm0, %v693_v30 }
 0x1f8   :  { %5399 = vmatmul.mubr.msk.bf16.gmra.mrb[28].mxu0 %vm307_vm0, %v694_v28 }
 0x217   :  { %s5551_s9 = spop %5550 }
 0x2b3   :  { %v5388_v33 = vpop.f32.mrb[16].mxu0 }
 0x2b4   :  { %vm834_vm8 = vcmp.gt.f32.partialorder %v5388_v33, 0.0  ;;  %v850_v35 = vmul.f32 0.01, %v5388_v33  ;;  %v769_v36 = vpop.f32.mrb[17].mxu0 }
 0x2b5   :  { %vm832_vm9 = vcmp.gt.f32.partialorder %v769_v36, 0.0  ;;  %v848_v37 = vmul.f32 0.01, %v769_v36  ;;  %v5389_v38 = vpop.f32.mrb[18].mxu0 }
 0x2b6   :  { %vm835_vm10 = vcmp.gt.f32.partialorder %v5389_v38, 0.0  ;;  %v851_v39 = vmul.f32 0.01, %v5389_v38  ;;  %v772_v40 = vpop.f32.mrb[19].mxu0  ;;  %v866_v48 = vsel %vm834_vm8, %v5388_v33, %v850_v35 }
 0x2b7   :  { %vm833_vm11 = vcmp.gt.f32.partialorder %v772_v40, 0.0  ;;  %v849_v49 = vmul.f32 0.01, %v772_v40  ;;  %v890_v26 = vmul.f32 %v6172_v34, %v866_v48  ;;  %v864_v53 = vsel %vm832_vm9, %v769_v36, %v848_v37 }
 0x2b8   :  { %v888_v54 = vmul.f32 %v6172_v34, %v864_v53  ;;  %v867_v56 = vsel %vm835_vm10, %v5389_v38, %v851_v39 }
 0x2b9   :  { %v910_v58 = vsel %vm307_vm0, %v890_v26, 0.0  ;;  %v891_v59 = vmul.f32 %v6172_v34, %v867_v56  ;;  %v865_v60 = vsel %vm833_vm11, %v772_v40, %v849_v49  ;;  %vm1181_vm11 = vcmask 1041409  }
 0x2ba   :  { %911 = vadd.xlane.f32.xlu1 %v910_v58  ;;  %v904_v62 = vsel %vm307_vm0, %v888_v54, 0.0  ;;  %v889_v1 = vmul.f32 %v6172_v34, %v865_v60 }
 0x2bb   :  { %905 = vadd.xlane.f32.xlu0 %v904_v62  ;;  %v5392_v2 = vpop.f32.mrb[20].mxu0  ;;  %v913_v11 = vsel %vm307_vm0, %v891_v59, 0.0 }
 0x2bc   :  { %vm838_vm12 = vcmp.gt.f32.partialorder %v5392_v2, 0.0  ;;  %v854_v3 = vmul.f32 0.01, %v5392_v2  ;;  %v785_v7 = vpop.f32.mrb[21].mxu0  ;;  %v907_v20 = vsel %vm307_vm0, %v889_v1, 0.0 }
 0x2bd   :  { %vm836_vm13 = vcmp.gt.f32.partialorder %v785_v7, 0.0  ;;  %v852_v8 = vmul.f32 0.01, %v785_v7  ;;  %v5393_v10 = vpop.f32.mrb[22].mxu0 }
 0x2be   :  { %vm839_vm14 = vcmp.gt.f32.partialorder %v5393_v10, 0.0  ;;  %v855_v15 = vmul.f32 0.01, %v5393_v10  ;;  %914 = vadd.xlane.f32.xlu1 %v913_v11  ;;  %v788_v19 = vpop.f32.mrb[23].mxu0  ;;  %v870_v23 = vsel %vm838_vm12, %v5392_v2, %v854_v3  ;;  %v5920_v11 = vmov 0  }
 0x2bf   :  { %vm837_vm15 = vcmp.gt.f32.partialorder %v788_v19, 0.0  ;;  %v853_v27 = vmul.f32 0.01, %v788_v19  ;;  %908 = vadd.xlane.f32.xlu0 %v907_v20  ;;  %v894_v28 = vmul.f32 %v6172_v34, %v870_v23  ;;  %v868_v29 = vsel %vm836_vm13, %v785_v7, %v852_v8  ;;  %5561 = vset.pattern.permute.xlu1 %v5920_v11 }
 0x2c0   :  { %v871_v30 = vsel %vm839_vm14, %v5393_v10, %v855_v15  ;;  %v892_v32 = vmul.f32 %v6172_v34, %v868_v29  ;;  %5562 = vset.pattern.permute.xlu0 %v5920_v11  ;;  %vm1183_vm12 = vcmask 1042434   ;;  %vm1185_vm13 = vcmask 1043459  }
 0x2c1   :  { %v922_v24 = vsel %vm307_vm0, %v894_v28, 0.0  ;;  %v895_v31 = vmul.f32 %v6172_v34, %v871_v30  ;;  %v869_v25 = vsel %vm837_vm15, %v788_v19, %v853_v27  ;;  %vm1187_vm14 = vcmask 1044484  }
 0x2c2   :  { %v893_v33 = vmul.f32 %v6172_v34, %v869_v25  ;;  %v916_v48 = vsel %vm307_vm0, %v892_v32, 0.0  ;;  %vm1189_vm15 = vcmask 1045509  }
 0x2c3   :  { %923 = vadd.xlane.f32.xlu0 %v922_v24  ;;  %v5396_v35 = vpop.f32.mrb[24].mxu0  ;;  %v925_v36 = vsel %vm307_vm0, %v895_v31, 0.0 }
 0x2c4   :  { %vm842_vm1 = vcmp.gt.f32.partialorder %v5396_v35, 0.0  ;;  %v858_v37 = vmul.f32 0.01, %v5396_v35  ;;  %926 = vadd.xlane.f32.xlu1 %v925_v36  ;;  %v801_v38 = vpop.f32.mrb[25].mxu0  ;;  %v919_v53 = vsel %vm307_vm0, %v893_v33, 0.0 }
 0x2c5   :  { %vm840_vm2 = vcmp.gt.f32.partialorder %v801_v38, 0.0  ;;  %v856_v39 = vmul.f32 0.01, %v801_v38  ;;  %v5397_v40 = vpop.f32.mrb[26].mxu0 }
 0x2c6   :  { %vm843_vm4 = vcmp.gt.f32.partialorder %v5397_v40, 0.0  ;;  %v859_v49 = vmul.f32 0.01, %v5397_v40  ;;  %v804_v26 = vpop.f32.mrb[27].mxu0  ;;  %v874_v54 = vsel %vm842_vm1, %v5396_v35, %v858_v37  ;;  %vm1191_vm1 = vcmask 1046534  }
 0x2c7   :  { %vm841_vm6 = vcmp.gt.f32.partialorder %v804_v26, 0.0  ;;  %v857_v56 = vmul.f32 0.01, %v804_v26  ;;  %917 = vadd.xlane.f32.xlu0 %v916_v48  ;;  %v898_v58 = vmul.f32 %v6172_v34, %v874_v54  ;;  %v872_v59 = vsel %vm840_vm2, %v801_v38, %v856_v39 }
 0x2c8   :  { %920 = vadd.xlane.f32.xlu1 %v919_v53  ;;  %v875_v60 = vsel %vm843_vm4, %v5397_v40, %v859_v49  ;;  %v896_v2 = vmul.f32 %v6172_v34, %v872_v59  ;;  %v6210_v53 = vsub.s32 6, %v5952_v5  ;;  %vm7700_vm2 = vcmask 1047559  }
 0x2c9   :  { %v934_v62 = vsel %vm307_vm0, %v898_v58, 0.0  ;;  %v899_v1 = vmul.f32 %v6172_v34, %v875_v60  ;;  %v873_v3 = vsel %vm841_vm6, %v804_v26, %v857_v56  ;;  %v6207_v26 = vsub.s32 7, %v5952_v5  ;;  %v6222_v60 = vpop.permute.xlu0 %978 }
 0x2ca   :  { %v897_v7 = vmul.f32 %v6172_v34, %v873_v3  ;;  %v928_v27 = vsel %vm307_vm0, %v896_v2, 0.0  ;;  %v1018_v56 = vrot.slane %v6134_v0, %v6210_v53  ;;  %7705 = vst [vmem:[#allocation6_spill] sm:$0xff] %v6222_v60  ;;  %v954_v2 = vstv %s5551_s9 }
 0x2cb   :  { %935 = vadd.xlane.f32.xlu0 %v934_v62  ;;  %v5400_v8 = vpop.f32.mrb[28].mxu0  ;;  %v937_v10 = vsel %vm307_vm0, %v899_v1, 0.0  ;;  %v1025_v54 = vrot.slane %v6134_v0, %v6207_v26  ;;  %vm7699_vm4 = vcmask 64512   ;;  %vm5922_vm6 = vmmov 0  }
 0x2cc   :  { %vm846_vm7 = vcmp.gt.f32.partialorder %v5400_v8, 0.0  ;;  %v862_v15 = vmul.f32 0.01, %v5400_v8  ;;  %938 = vadd.xlane.f32.xlu1 %v937_v10  ;;  %v817_v19 = vpop.f32.mrb[29].mxu0  ;;  %v931_v30 = vsel %vm307_vm0, %v897_v7, 0.0 }
 0x2cd   :  { %vm844_vm8 = vcmp.gt.f32.partialorder %v817_v19, 0.0  ;;  %v860_v20 = vmul.f32 0.01, %v817_v19  ;;  %v5401_v23 = vpop.f32.mrb[30].mxu0  ;;  %v6226_v1 = vpop.permute.xlu0 %1006 }
 0x2ce   :  { %vm847_vm9 = vcmp.gt.f32.partialorder %v5401_v23, 0.0  ;;  %v863_v28 = vmul.f32 0.01, %v5401_v23  ;;  %v820_v29 = vpop.f32.mrb[31].mxu0  ;;  %v878_v24 = vsel %vm846_vm7, %v5400_v8, %v862_v15  ;;  %7707 = vst [vmem:[#allocation8_spill] sm:$0xff] %v6226_v1 }
 0x2cf   :  { %vm845_vm10 = vcmp.gt.f32.partialorder %v820_v29, 0.0  ;;  %v861_v31 = vmul.f32 0.01, %v820_v29  ;;  %929 = vadd.xlane.f32.xlu0 %v928_v27  ;;  %v902_v32 = vmul.f32 %v6172_v34, %v878_v24  ;;  %v876_v25 = vsel %vm844_vm8, %v817_v19, %v860_v20 }
 0x2d0   :  { %932 = vadd.xlane.f32.xlu1 %v931_v30  ;;  %v879_v33 = vsel %vm847_vm9, %v5401_v23, %v863_v28  ;;  %v900_v38 = vmul.f32 %v6172_v34, %v876_v25 }
 0x2d1   :  { %v946_v35 = vsel %vm307_vm0, %v902_v32, 0.0  ;;  %v903_v36 = vmul.f32 %v6172_v34, %v879_v33  ;;  %v877_v37 = vsel %vm845_vm10, %v820_v29, %v861_v31 }
 0x2d2   :  { %v901_v40 = vmul.f32 %v6172_v34, %v877_v37  ;;  %v940_v48 = vsel %vm307_vm0, %v900_v38, 0.0  ;;  %v6216_v34 = vpop.permute.xlu1 %985 }
 0x2d3   :  { %947 = vadd.xlane.f32.xlu0 %v946_v35  ;;  %v949_v39 = vsel %vm307_vm0, %v903_v36, 0.0  ;;  %7703 = vst [vmem:[#allocation4_spill] sm:$0xff] %v6216_v34 }
 0x2d4   :  { %950 = vadd.xlane.f32.xlu1 %v949_v39  ;;  %v943_v49 = vsel %vm307_vm0, %v901_v40, 0.0 }
 0x2d6   :  { %v6218_v58 = vpop.permute.xlu1 %992 }
 0x2d7   :  { %941 = vadd.xlane.f32.xlu0 %v940_v48 }
 0x2d8   :  { %944 = vadd.xlane.f32.xlu1 %v943_v49 }
 0x2da   :  { %v6220_v59 = vpop.permute.xlu1 %999 }
 0x2db   :  { %7704 = vst [vmem:[#allocation5_spill] sm:$0xff] %v6220_v59 }
 0x2de   :  { %v6224_v62 = vpop.permute.xlu1 %1013 }
 0x2df   :  { %7706 = vst [vmem:[#allocation7_spill] sm:$0xff] %v6224_v62 }
 0x2e9   :  { %1027 = vbcast.lane.b32.xlu1 %v1025_v54, 256 }
 0x2ed   :  { %1020 = vbcast.lane.b32.xlu0 %v1018_v56, 256 }
 0x347   :  { %v912_v3 = vpop.xlane.xlu1 %911 }
 0x348   :  { %v958_v7 = vadd.f32 %v954_v2, %v912_v3  ;;  %v906_v8 = vpop.xlane.xlu0 %905 }
 0x349   :  { %v956_v0 = vadd.f32 %v954_v2, %v906_v8 }
 0x34a   :  { %v6229_v10 = vsub.f32 %v958_v7, %v6218_v58 }
 0x34b   :  { %v6232_v11 = vsub.f32 %v956_v0, %v6222_v60  ;;  %v915_v15 = vpop.xlane.xlu1 %914 }
 0x34c   :  { %v959_v19 = vadd.f32 %v954_v2, %v915_v15  ;;  %v909_v20 = vpop.xlane.xlu0 %908  ;;  %1076 = vperm.xlu1 %5561, %v6229_v10  }
 0x34d   :  { %v957_v23 = vadd.f32 %v954_v2, %v909_v20  ;;  %1070 = vperm.xlu0 %5562, %v6232_v11  }
 0x34e   :  { %v6237_v27 = vsub.f32 %v959_v19, %v6220_v59 }
 0x34f   :  { %v6240_v28 = vsub.f32 %v957_v23, %v6216_v34 }
 0x350   :  { %v924_v29 = vpop.xlane.xlu0 %923 }
 0x351   :  { %v927_v30 = vpop.xlane.xlu1 %926  ;;  %1079 = vperm.xlu0 %5562, %v6237_v27   ;;  %1073 = vperm.xlu1 %5561, %v6240_v28   ;;  %v962_v40 = vadd.f32 %v954_v2, %v924_v29 }
 0x352   :  { %v963_v48 = vadd.f32 %v954_v2, %v927_v30 }
 0x354   :  { %v918_v24 = vpop.xlane.xlu0 %917 }
 0x355   :  { %v921_v31 = vpop.xlane.xlu1 %920  ;;  %v960_v54 = vadd.f32 %v954_v2, %v918_v24 }
 0x356   :  { %v961_v7 = vadd.f32 %v954_v2, %v921_v31 }
 0x357   :  { %v6257_v0 = vsub.f32 %v960_v54, %v6226_v1 }
 0x358   :  { %v936_v32 = vpop.xlane.xlu0 %935  ;;  %v6260_v19 = vsub.f32 %v961_v7, %v6224_v62 }
 0x359   :  { %v939_v25 = vpop.xlane.xlu1 %938  ;;  %v966_v15 = vadd.f32 %v954_v2, %v936_v32 }
 0x35a   :  { %v967_v20 = vadd.f32 %v954_v2, %v939_v25 }
 0x35b   :  { %v6265_v23 = vsub.f32 %v966_v15, %v6218_v58 }
 0x35c   :  { %v930_v33 = vpop.xlane.xlu0 %929  ;;  %v6268_v30 = vsub.f32 %v967_v20, %v6220_v59 }
 0x35d   :  { %v933_v35 = vpop.xlane.xlu1 %932  ;;  %v964_v29 = vadd.f32 %v954_v2, %v930_v33 }
 0x35e   :  { %v965_v24 = vadd.f32 %v954_v2, %v933_v35 }
 0x35f   :  { %v6273_v31 = vsub.f32 %v964_v29, %v6222_v60 }
 0x360   :  { %v948_v36 = vpop.xlane.xlu0 %947  ;;  %v6276_v25 = vsub.f32 %v965_v24, %v6216_v34 }
 0x361   :  { %v951_v37 = vpop.xlane.xlu1 %950 }
 0x362   :  { %v971_v54 = vadd.f32 %v954_v2, %v951_v37 }
 0x364   :  { %v942_v38 = vpop.xlane.xlu0 %941 }
 0x365   :  { %v945_v39 = vpop.xlane.xlu1 %944  ;;  %v968_v32 = vadd.f32 %v954_v2, %v942_v38 }
 0x367   :  { %v6281_v33 = vsub.f32 %v968_v32, %v6226_v1 }
 0x368   :  { %v6244_v49 = vpop.permute.xlu0 %1020 }
 0x369   :  { %7708 = vst [vmem:[#allocation9_spill] sm:$0xff] %v6244_v49  ;;  %v6246_v56 = vpop.permute.xlu1 %1027  ;;  %v6249_v3 = vsub.f32 %v962_v40, %v6244_v49  ;;  %v969_v40 = vadd.f32 %v954_v2, %v945_v39 }
 0x36a   :  { %7709 = vst [vmem:[#allocation10_spill] sm:$0xff] %v6246_v56  ;;  %v6252_v8 = vsub.f32 %v963_v48, %v6246_v56  ;;  %v970_v48 = vadd.f32 %v954_v2, %v948_v36  ;;  %v6292_v39 = vsub.f32 %v971_v54, %v6246_v56  ;;  %v6298_v36 = vsub.s32 %v6118_v42, %v5952_v5 }
 0x36b   :  { %1088 = vperm.xlu1 %5561, %v6249_v3   ;;  %v6284_v35 = vsub.f32 %v969_v40, %v6224_v62 }
 0x36c   :  { %1091 = vperm.xlu0 %5562, %v6252_v8   ;;  %v6289_v38 = vsub.f32 %v970_v48, %v6244_v49 }
 0x36f   :  { %1082 = vperm.xlu1 %5561, %v6257_v0  }
 0x370   :  { %1085 = vperm.xlu0 %5562, %v6260_v19  }
 0x373   :  { %1100 = vperm.xlu1 %5561, %v6265_v23  }
 0x374   :  { %1103 = vperm.xlu0 %5562, %v6268_v30  }
 0x377   :  { %1094 = vperm.xlu1 %5561, %v6273_v31  }
 0x378   :  { %1097 = vperm.xlu0 %5562, %v6276_v25  }
 0x37b   :  { %1106 = vperm.xlu1 %5561, %v6281_v33  }
 0x37c   :  { %1109 = vperm.xlu0 %5562, %v6284_v35  }
 0x37f   :  { %1112 = vperm.xlu1 %5561, %v6289_v38  }
 0x380   :  { %1115 = vperm.xlu0 %5562, %v6292_v39  }
 0x3cb   :  { %v1077_v7 = vpop.permute.xlu1 %1076 }
 0x3cc   :  { %v1071_v15 = vpop.permute.xlu0 %1070  ;;  %v1128_v40 = vrot.slane %v1077_v7, %v6298_v36 }
 0x3cd   :  { %v1120_v29 = vrot.slane %v1071_v15, %v6298_v36 }
 0x3d0   :  { %v1074_v20 = vpop.permute.xlu1 %1073  ;;  %v1080_v37 = vpop.permute.xlu0 %1079 }
 0x3d1   :  { %v1124_v2 = vrot.slane %v1074_v20, %v6298_v36  ;;  %v1132_v44 = vrot.slane %v1080_v37, %v6298_v36 }
 0x3d3   :  { %v1182_v24 = vsel %vm1181_vm11, %v1124_v2, %v1120_v29 }
 0x3d4   :  { %v1184_v54 = vsel %vm1183_vm12, %v1128_v40, %v1182_v24 }
 0x3d5   :  { %v1186_v15 = vsel %vm1185_vm13, %v1132_v44, %v1184_v54 }
 0x3ea   :  { %v1089_v32 = vpop.permute.xlu1 %1088 }
 0x3eb   :  { %v1092_v48 = vpop.permute.xlu0 %1091  ;;  %v1144_v2 = vrot.slane %v1089_v32, %v6298_v36 }
 0x3ec   :  { %v1148_v29 = vrot.slane %v1092_v48, %v6298_v36 }
 0x3ee   :  { %v1083_v62 = vpop.permute.xlu1 %1082 }
 0x3ef   :  { %v1136_v20 = vrot.slane %v1083_v62, %v6298_v36  ;;  %v1086_v1 = vpop.permute.xlu0 %1085 }
 0x3f0   :  { %v1140_v56 = vrot.slane %v1086_v1, %v6298_v36 }
 0x3f1   :  { %v1188_v7 = vsel %vm1187_vm14, %v1136_v20, %v1186_v15 }
 0x3f2   :  { %v1101_v24 = vpop.permute.xlu1 %1100  ;;  %v1190_v37 = vsel %vm1189_vm15, %v1140_v56, %v1188_v7 }
 0x3f3   :  { %v1104_v40 = vpop.permute.xlu0 %1103  ;;  %v1192_v62 = vsel %vm1191_vm1, %v1144_v2, %v1190_v37  ;;  %v1160_v48 = vrot.slane %v1101_v24, %v6298_v36 }
 0x3f4   :  { %v1194_v49 = vsel %vm7700_vm2, %v1148_v29, %v1192_v62  ;;  %v1164_v15 = vrot.slane %v1104_v40, %v6298_v36 }
 0x3f5   :  { %v1205_v44 = vsel %vm7699_vm4, %v1194_v49, -inf }
 0x3f6   :  { %1206 = vmax.xlane.f32.xlu1 %v1205_v44  ;;  %v1095_v1 = vpop.permute.xlu1 %1094 }
 0x3f7   :  { %v1152_v32 = vrot.slane %v1095_v1, %v6298_v36  ;;  %v1098_v54 = vpop.permute.xlu0 %1097 }
 0x3f8   :  { %v1156_v20 = vrot.slane %v1098_v54, %v6298_v36 }
 0x3fa   :  { %v1195_v56 = vsel %vm1181_vm11, %v1156_v20, %v1152_v32  ;;  %v1107_v7 = vpop.permute.xlu1 %1106 }
 0x3fb   :  { %v1196_v2 = vsel %vm1183_vm12, %v1160_v48, %v1195_v56  ;;  %v1168_v29 = vrot.slane %v1107_v7, %v6298_v36  ;;  %v1110_v37 = vpop.permute.xlu0 %1109 }
 0x3fc   :  { %v1197_v49 = vsel %vm1185_vm13, %v1164_v15, %v1196_v2  ;;  %v1172_v62 = vrot.slane %v1110_v37, %v6298_v36 }
 0x3fd   :  { %v1198_v44 = vsel %vm1187_vm14, %v1168_v29, %v1197_v49 }
 0x3fe   :  { %v1113_v1 = vpop.permute.xlu1 %1112  ;;  %v1199_v32 = vsel %vm1189_vm15, %v1172_v62, %v1198_v44 }
 0x3ff   :  { %v1176_v54 = vrot.slane %v1113_v1, %v6298_v36  ;;  %v1116_v24 = vpop.permute.xlu0 %1115 }
 0x400   :  { %v1180_v40 = vrot.slane %v1116_v24, %v6298_v36 }
 0x401   :  { %v1200_v20 = vsel %vm1191_vm1, %v1176_v54, %v1199_v32 }
 0x402   :  { %v1201_v48 = vsel %vm7700_vm2, %v1180_v40, %v1200_v20 }
 0x403   :  { %v1208_v56 = vsel %vm7699_vm4, %v1201_v48, -inf }
 0x404   :  { %1209 = vmax.xlane.f32.xlu0 %v1208_v56 }
 0x483   :  { %v1207_v15 = vpop.xlane.xlu1 %1206 }
 0x484   :  { %v1216_v7 = vrot.slane %v1207_v15, %v5975_v13  ;;  %v1220_v2 = vrot.slane %v1207_v15, %v6121_v43  ;;  %v1224_v29 = vrot.slane %v1207_v15, %v6128_v46  ;;  %v1228_v37 = vrot.slane %v1207_v15, %v6146_v51 }
 0x485   :  { %v1232_v49 = vrot.slane %v1207_v15, %v6137_v47  ;;  %v1236_v54 = vrot.slane %v1207_v15, %v6153_v55  ;;  %v1240_v20 = vrot.slane %v1207_v15, %v6210_v53  ;;  %v1244_v34 = vrot.slane %v1207_v15, %v6207_v26 }
 0x486   :  { %v1294_v62 = vsub.f32 %v6240_v28, %v1220_v2  ;;  %v1293_v44 = vsub.f32 %v6232_v11, %v1216_v7  ;;  %v1295_v1 = vsub.f32 %v6229_v10, %v1224_v29  ;;  %v1296_v24 = vsub.f32 %v6237_v27, %v1228_v37 }
 0x487   :  { %v1297_v56 = vsub.f32 %v6257_v0, %v1232_v49  ;;  %v1298_v11 = vsub.f32 %v6260_v19, %v1236_v54  ;;  %v1299_v10 = vsub.f32 %v6249_v3, %v1240_v20  ;;  %v1300_v2 = vsub.f32 %v6252_v8, %v1244_v34 }
 0x488   :  { %v1311_v40 = vmul.f32 1.442695, %v1294_v62  ;;  %v1309_v32 = vmul.f32 1.442695, %v1293_v44  ;;  %v1313_v48 = vmul.f32 1.442695, %v1295_v1 }
 0x489   :  { %v1315_v28 = vmul.f32 1.442695, %v1296_v24  ;;  %v1317_v7 = vmul.f32 1.442695, %v1297_v56  ;;  %v1319_v27 = vmul.f32 1.442695, %v1298_v11 }
 0x48a   :  { %5690 = vpow2.f32 %v1311_v40  ;;  %v1321_v37 = vmul.f32 1.442695, %v1299_v10  ;;  %v1323_v19 = vmul.f32 1.442695, %v1300_v2 }
 0x48b   :  { %5692 = vpow2.f32 %v1309_v32 }
 0x48c   :  { %5694 = vpow2.f32 %v1313_v48 }
 0x48d   :  { %5696 = vpow2.f32 %v1315_v28 }
 0x48e   :  { %5698 = vpow2.f32 %v1317_v7 }
 0x48f   :  { %5700 = vpow2.f32 %v1319_v27 }
 0x490   :  { %5702 = vpow2.f32 %v1321_v37 }
 0x491   :  { %v1210_v29 = vpop.xlane.xlu0 %1209  ;;  %5704 = vpow2.f32 %v1323_v19 }
 0x492   :  { %v1248_v62 = vrot.slane %v1210_v29, %v5975_v13  ;;  %v1252_v0 = vrot.slane %v1210_v29, %v6121_v43  ;;  %v1256_v15 = vrot.slane %v1210_v29, %v6128_v46  ;;  %v1260_v49 = vrot.slane %v1210_v29, %v6146_v51 }
 0x493   :  { %v1264_v8 = vrot.slane %v1210_v29, %v6137_v47  ;;  %v1268_v40 = vrot.slane %v1210_v29, %v6153_v55  ;;  %v1272_v48 = vrot.slane %v1210_v29, %v6210_v53  ;;  %v1276_v28 = vrot.slane %v1210_v29, %v6207_v26 }
 0x494   :  { %v6352_v3 = vpop.eup %5690  ;;  %v1301_v44 = vsub.f32 %v6273_v31, %v1248_v62  ;;  %v1302_v1 = vsub.f32 %v6276_v25, %v1252_v0  ;;  %v1303_v24 = vsub.f32 %v6265_v23, %v1256_v15  ;;  %v1304_v31 = vsub.f32 %v6268_v30, %v1260_v49 }
 0x495   :  { %v6356_v34 = vpop.eup %5692  ;;  %1361 = vperm.xlu1 %5561, %v6352_v3   ;;  %v1305_v23 = vsub.f32 %v6281_v33, %v1264_v8  ;;  %v1306_v30 = vsub.f32 %v6284_v35, %v1268_v40  ;;  %v1307_v2 = vsub.f32 %v6289_v38, %v1272_v48  ;;  %v1308_v29 = vsub.f32 %v6292_v39, %v1276_v28 }
 0x496   :  { %1358 = vperm.xlu0 %5562, %v6356_v34   ;;  %v1325_v54 = vmul.f32 1.442695, %v1301_v44  ;;  %v1327_v32 = vmul.f32 1.442695, %v1302_v1  ;;  %v6364_v20 = vpop.eup %5694  ;;  %v1329_v56 = vmul.f32 1.442695, %v1303_v24 }
 0x497   :  { %v6366_v25 = vpop.eup %5696  ;;  %v1331_v11 = vmul.f32 1.442695, %v1304_v31  ;;  %v1333_v27 = vmul.f32 1.442695, %v1305_v23  ;;  %v1335_v33 = vmul.f32 1.442695, %v1306_v30 }
 0x498   :  { %5706 = vpow2.f32 %v1325_v54  ;;  %v6374_v10 = vpop.eup %5698  ;;  %v1337_v35 = vmul.f32 1.442695, %v1307_v2  ;;  %v1339_v0 = vmul.f32 1.442695, %v1308_v29  ;;  %v5921_v1 = vmov 1.0  }
 0x499   :  { %1364 = vperm.xlu1 %5561, %v6364_v20   ;;  %5708 = vpow2.f32 %v1327_v32  ;;  %v6376_v7 = vpop.eup %5700  ;;  %v6409_v8 = vsel %vm20_vm3, 0.0, %v5921_v1  ;;  %vm7698_vm3 = vcmask 1043456  }
 0x49a   :  { %1367 = vperm.xlu0 %5562, %v6366_v25   ;;  %5710 = vpow2.f32 %v1329_v56  ;;  %v6382_v37 = vpop.eup %5702  ;;  %v1779_v40 = vrot.slane %v6409_v8, %v6121_v43  ;;  %v1772_v32 = vrot.slane %v6409_v8, %v5975_v13  ;;  %v1786_v31 = vrot.slane %v6409_v8, %v6128_v46 }
 0x49b   :  { %5712 = vpow2.f32 %v1331_v11  ;;  %v6384_v62 = vpop.eup %5704  ;;  %v1793_v48 = vrot.slane %v6409_v8, %v6146_v51  ;;  %v1800_v56 = vrot.slane %v6409_v8, %v6137_v47  ;;  %v1807_v23 = vrot.slane %v6409_v8, %v6153_v55 }
 0x49c   :  { %5714 = vpow2.f32 %v1333_v27 }
 0x49d   :  { %1370 = vperm.xlu1 %5561, %v6374_v10   ;;  %5716 = vpow2.f32 %v1335_v33 }
 0x49e   :  { %1373 = vperm.xlu0 %5562, %v6376_v7   ;;  %5718 = vpow2.f32 %v1337_v35 }
 0x49f   :  { %5720 = vpow2.f32 %v1339_v0 }
 0x4a1   :  { %1376 = vperm.xlu1 %5561, %v6382_v37  }
 0x4a2   :  { %1379 = vperm.xlu0 %5562, %v6384_v62   ;;  %v6388_v15 = vpop.eup %5706 }
 0x4a3   :  { %v6390_v49 = vpop.eup %5708 }
 0x4a4   :  { %v6394_v38 = vpop.eup %5710 }
 0x4a5   :  { %1382 = vperm.xlu1 %5561, %v6388_v15   ;;  %v6396_v39 = vpop.eup %5712 }
 0x4a6   :  { %1385 = vperm.xlu0 %5562, %v6390_v49   ;;  %v6400_v19 = vpop.eup %5714 }
 0x4a7   :  { %v6402_v44 = vpop.eup %5716 }
 0x4a8   :  { %v6411_v54 = vpop.eup %5718 }
 0x4a9   :  { %1388 = vperm.xlu1 %5561, %v6394_v38   ;;  %v6413_v24 = vpop.eup %5720 }
 0x4aa   :  { %1391 = vperm.xlu0 %5562, %v6396_v39  }
 0x4ad   :  { %1394 = vperm.xlu1 %5561, %v6400_v19  }
 0x4ae   :  { %1397 = vperm.xlu0 %5562, %v6402_v44  }
 0x4b1   :  { %1400 = vperm.xlu1 %5561, %v6411_v54  }
 0x4b2   :  { %1403 = vperm.xlu0 %5562, %v6413_v24  }
 0x4b5   :  { %1781 = vbcast.lane.b32.xlu1 %v1779_v40, 256 }
 0x4b6   :  { %1774 = vbcast.lane.b32.xlu0 %v1772_v32, 256 }
 0x4b9   :  { %1788 = vbcast.lane.b32.xlu1 %v1786_v31, 256 }
 0x4ba   :  { %1795 = vbcast.lane.b32.xlu0 %v1793_v48, 256 }
 0x4bd   :  { %1802 = vbcast.lane.b32.xlu1 %v1800_v56, 256 }
 0x4be   :  { %1809 = vbcast.lane.b32.xlu0 %v1807_v23, 256 }
 0x514   :  { %v1362_v28 = vpop.permute.xlu1 %1361 }
 0x515   :  { %v1359_v11 = vpop.permute.xlu0 %1358  ;;  %v1412_v30 = vrot.slane %v1362_v28, %v6298_v36 }
 0x516   :  { %v1408_v27 = vrot.slane %v1359_v11, %v6298_v36 }
 0x518   :  { %v1365_v2 = vpop.permute.xlu1 %1364  ;;  %v1469_v35 = vsel %vm1181_vm11, %v1412_v30, %v1408_v27 }
 0x519   :  { %v1416_v33 = vrot.slane %v1365_v2, %v6298_v36  ;;  %v1368_v29 = vpop.permute.xlu0 %1367 }
 0x51a   :  { %v1420_v0 = vrot.slane %v1368_v29, %v6298_v36 }
 0x51b   :  { %v1470_v1 = vsel %vm1183_vm12, %v1416_v33, %v1469_v35 }
 0x51c   :  { %v1371_v40 = vpop.permute.xlu1 %1370  ;;  %v1471_v48 = vsel %vm1185_vm13, %v1420_v0, %v1470_v1 }
 0x51d   :  { %v1424_v32 = vrot.slane %v1371_v40, %v6298_v36  ;;  %v1374_v31 = vpop.permute.xlu0 %1373 }
 0x51e   :  { %v1428_v56 = vrot.slane %v1374_v31, %v6298_v36 }
 0x51f   :  { %v1472_v23 = vsel %vm1187_vm14, %v1424_v32, %v1471_v48 }
 0x520   :  { %v1377_v28 = vpop.permute.xlu1 %1376  ;;  %v1473_v27 = vsel %vm1189_vm15, %v1428_v56, %v1472_v23 }
 0x521   :  { %v1432_v11 = vrot.slane %v1377_v28, %v6298_v36  ;;  %v1380_v2 = vpop.permute.xlu0 %1379 }
 0x522   :  { %v1436_v30 = vrot.slane %v1380_v2, %v6298_v36 }
 0x523   :  { %v1474_v33 = vsel %vm1191_vm1, %v1432_v11, %v1473_v27 }
 0x524   :  { %v1383_v29 = vpop.permute.xlu1 %1382  ;;  %v1475_v35 = vsel %vm7700_vm2, %v1436_v30, %v1474_v33 }
 0x525   :  { %v1386_v40 = vpop.permute.xlu0 %1385  ;;  %v1485_v0 = vsel %vm7699_vm4, %v1475_v35, 0.0  ;;  %v1440_v1 = vrot.slane %v1383_v29, %v6298_v36 }
 0x526   :  { %v1444_v32 = vrot.slane %v1386_v40, %v6298_v36  ;;  %1486 = vadd.xlane.f32.xlu1 %v1485_v0 }
 0x528   :  { %v1389_v31 = vpop.permute.xlu1 %1388  ;;  %v1476_v2 = vsel %vm1181_vm11, %v1444_v32, %v1440_v1 }
 0x529   :  { %v1448_v48 = vrot.slane %v1389_v31, %v6298_v36  ;;  %v1392_v28 = vpop.permute.xlu0 %1391 }
 0x52a   :  { %v1452_v56 = vrot.slane %v1392_v28, %v6298_v36  ;;  %v1814_v28 = vrot.slane %v6409_v8, %v6210_v53 }
 0x52b   :  { %v1477_v23 = vsel %vm1183_vm12, %v1448_v48, %v1476_v2 }
 0x52c   :  { %v1395_v11 = vpop.permute.xlu1 %1394  ;;  %v1478_v33 = vsel %vm1185_vm13, %v1452_v56, %v1477_v23  ;;  %v1821_v23 = vrot.slane %v6409_v8, %v6207_v26 }
 0x52d   :  { %v1456_v30 = vrot.slane %v1395_v11, %v6298_v36  ;;  %v1398_v27 = vpop.permute.xlu0 %1397 }
 0x52e   :  { %v1460_v29 = vrot.slane %v1398_v27, %v6298_v36 }
 0x52f   :  { %v1479_v35 = vsel %vm1187_vm14, %v1456_v30, %v1478_v33 }
 0x530   :  { %v1401_v40 = vpop.permute.xlu1 %1400  ;;  %v1480_v32 = vsel %vm1189_vm15, %v1460_v29, %v1479_v35 }
 0x531   :  { %v1464_v0 = vrot.slane %v1401_v40, %v6298_v36  ;;  %v1404_v31 = vpop.permute.xlu0 %1403 }
 0x532   :  { %v1468_v1 = vrot.slane %v1404_v31, %v6298_v36 }
 0x533   :  { %v1481_v48 = vsel %vm1191_vm1, %v1464_v0, %v1480_v32 }
 0x534   :  { %v1482_v2 = vsel %vm7700_vm2, %v1468_v1, %v1481_v48  ;;  %v6465_v11 = vpop.permute.xlu1 %1781 }
 0x535   :  { %v1488_v56 = vsel %vm7699_vm4, %v1482_v2, 0.0  ;;  %7710 = vst [vmem:[#allocation11_spill] sm:$0xff] %v6465_v11  ;;  %v6471_v33 = vpop.permute.xlu0 %1774 }
 0x536   :  { %1489 = vadd.xlane.f32.xlu0 %v1488_v56 }
 0x537   :  { %1816 = vbcast.lane.b32.xlu1 %v1814_v28, 256 }
 0x538   :  { %v6467_v30 = vpop.permute.xlu1 %1788 }
 0x539   :  { %7711 = vst [vmem:[#allocation12_spill] sm:$0xff] %v6467_v30  ;;  %v6479_v32 = vpop.permute.xlu0 %1795 }
 0x53a   :  { %7713 = vst [vmem:[#allocation14_spill] sm:$0xff] %v6479_v32 }
 0x53c   :  { %v6469_v27 = vpop.permute.xlu1 %1802 }
 0x53d   :  { %7712 = vst [vmem:[#allocation13_spill] sm:$0xff] %v6469_v27  ;;  %v6483_v2 = vpop.permute.xlu0 %1809 }
 0x53e   :  { %7714 = vst [vmem:[#allocation15_spill] sm:$0xff] %v6483_v2 }
 0x54c   :  { %1823 = vbcast.lane.b32.xlu0 %v1821_v23, 256 }
 0x5b3   :  { %v1487_v29 = vpop.xlane.xlu1 %1486 }
 0x5b4   :  { %v1500_v35 = vrot.slane %v1487_v29, %v6121_v43  ;;  %v1496_v40 = vrot.slane %v1487_v29, %v5975_v13  ;;  %v1504_v0 = vrot.slane %v1487_v29, %v6128_v46  ;;  %v1508_v31 = vrot.slane %v1487_v29, %v6146_v51 }
 0x5b5   :  { %v1512_v8 = vrot.slane %v1487_v29, %v6137_v47  ;;  %v1516_v1 = vrot.slane %v1487_v29, %v6153_v55  ;;  %v1520_v48 = vrot.slane %v1487_v29, %v6210_v53  ;;  %v1524_v28 = vrot.slane %v1487_v29, %v6207_v26 }
 0x5b6   :  { %5722 = vrcp.f32 %v1500_v35 }
 0x5b7   :  { %5724 = vrcp.f32 %v1496_v40 }
 0x5b8   :  { %5726 = vrcp.f32 %v1504_v0 }
 0x5b9   :  { %5728 = vrcp.f32 %v1508_v31 }
 0x5ba   :  { %5730 = vrcp.f32 %v1512_v8 }
 0x5bb   :  { %5732 = vrcp.f32 %v1516_v1 }
 0x5bc   :  { %5734 = vrcp.f32 %v1520_v48 }
 0x5bd   :  { %5736 = vrcp.f32 %v1524_v28 }
 0x5c0   :  { %v5723_v56 = vpop.eup %5722 }
 0x5c1   :  { %v5725_v23 = vpop.eup %5724  ;;  %v6486_v35 = vmul.f32 %v5723_v56, %v6352_v3 }
 0x5c2   :  { %v5727_v40 = vpop.eup %5726  ;;  %v6489_v0 = vmul.f32 %v5725_v23, %v6356_v34 }
 0x5c3   :  { %7715 = vst [vmem:[#allocation16_spill] sm:$0xff] %v6486_v35  ;;  %v5729_v31 = vpop.eup %5728  ;;  %v1490_v5 = vpop.xlane.xlu0 %1489  ;;  %v6493_v8 = vmul.f32 %v6465_v11, %v6486_v35  ;;  %v6496_v29 = vmul.f32 %v5727_v40, %v6364_v20 }
 0x5c4   :  { %7716 = vst [vmem:[#allocation17_spill] sm:$0xff] %v6489_v0  ;;  %v5731_v1 = vpop.eup %5730  ;;  %v6500_v48 = vmul.f32 %v6471_v33, %v6489_v0  ;;  %v6503_v3 = vmul.f32 %v5729_v31, %v6366_v25  ;;  %v1528_v34 = vrot.slane %v1490_v5, %v5975_v13  ;;  %v1532_v28 = vrot.slane %v1490_v5, %v6121_v43 }
 0x5c5   :  { %7717 = vst [vmem:[#allocation18_spill] sm:$0xff] %v6496_v29  ;;  %v5733_v56 = vpop.eup %5732  ;;  %v1850_v23 = vand.u32 2147483647, %v6493_v8  ;;  %v6510_v42 = vmul.f32 %v6467_v30, %v6496_v29  ;;  %v6513_v20 = vmul.f32 %v5731_v1, %v6374_v10  ;;  %v1536_v40 = vrot.slane %v1490_v5, %v6128_v46 }
 0x5c6   :  { %7718 = vst [vmem:[#allocation19_spill] sm:$0xff] %v6503_v3  ;;  %v1849_v35 = vand.u32 2147483647, %v6500_v48  ;;  %v6519_v25 = vmul.f32 %v6479_v32, %v6503_v3  ;;  %v6522_v31 = vmul.f32 %v5733_v56, %v6376_v7  ;;  %5738 = vrcp.f32 %v1528_v34  ;;  %v5735_v0 = vpop.eup %5734 }
 0x5c7   :  { %7719 = vst [vmem:[#allocation20_spill] sm:$0xff] %v6513_v20  ;;  %1885 = vperm.xlu0 %5562, %v1850_v23   ;;  %5740 = vrcp.f32 %v1532_v28  ;;  %v5737_v29 = vpop.eup %5736  ;;  %v1851_v10 = vand.u32 2147483647, %v6510_v42  ;;  %v1540_v3 = vrot.slane %v1490_v5, %v6146_v51  ;;  %v1544_v7 = vrot.slane %v1490_v5, %v6137_v47  ;;  %v6532_v56 = vpop.permute.xlu0 %1823 }
 0x5c8   :  { %7720 = vst [vmem:[#allocation21_spill] sm:$0xff] %v6522_v31  ;;  %1882 = vperm.xlu1 %5561, %v1849_v35   ;;  %5742 = vrcp.f32 %v1536_v40  ;;  %v1852_v1 = vand.u32 2147483647, %v6519_v25  ;;  %v6528_v59 = vmul.f32 %v6483_v2, %v6522_v31  ;;  %7721 = vst [vmem:[#allocation22_spill] sm:$0xff] %v6532_v56  ;;  %v6536_v34 = vmul.f32 %v6469_v27, %v6513_v20  ;;  %v6543_v40 = vpop.permute.xlu1 %1816 }
 0x5c9   :  { %v6539_v35 = vmul.f32 %v5735_v0, %v6382_v37  ;;  %v1548_v28 = vrot.slane %v1490_v5, %v6153_v55  ;;  %v1552_v23 = vrot.slane %v1490_v5, %v6210_v53  ;;  %7723 = vst [vmem:[#allocation24_spill] sm:$0xff] %v6543_v40  ;;  %v6546_v31 = vmul.f32 %v5737_v29, %v6384_v62 }
 0x5ca   :  { %5744 = vrcp.f32 %v1540_v3  ;;  %v1556_v60 = vrot.slane %v1490_v5, %v6207_v26  ;;  %v1854_v20 = vand.u32 2147483647, %v6528_v59  ;;  %v1853_v0 = vand.u32 2147483647, %v6536_v34 }
 0x5cb   :  { %7722 = vst [vmem:[#allocation23_spill] sm:$0xff] %v6539_v35  ;;  %1891 = vperm.xlu0 %5562, %v1852_v1   ;;  %7724 = vst [vmem:[#allocation25_spill] sm:$0xff] %v6546_v31  ;;  %5746 = vrcp.f32 %v1544_v7  ;;  %v6552_v37 = vmul.f32 %v6532_v56, %v6546_v31  ;;  %v6557_v1 = vmul.f32 %v6543_v40, %v6539_v35 }
 0x5cc   :  { %1888 = vperm.xlu1 %5561, %v1851_v10   ;;  %5748 = vrcp.f32 %v1548_v28 }
 0x5cd   :  { %5750 = vrcp.f32 %v1552_v23  ;;  %v1856_v29 = vand.u32 2147483647, %v6552_v37  ;;  %v1855_v7 = vand.u32 2147483647, %v6557_v1 }
 0x5ce   :  { %5752 = vrcp.f32 %v1556_v60 }
 0x5cf   :  { %1897 = vperm.xlu0 %5562, %v1854_v20  }
 0x5d0   :  { %v5739_v62 = vpop.eup %5738  ;;  %1894 = vperm.xlu1 %5561, %v1853_v0  }
 0x5d1   :  { %v5741_v5 = vpop.eup %5740  ;;  %v6561_v3 = vmul.f32 %v5739_v62, %v6388_v15 }
 0x5d2   :  { %v5743_v10 = vpop.eup %5742  ;;  %v6565_v28 = vmul.f32 %v5741_v5, %v6390_v49 }
 0x5d3   :  { %7725 = vst [vmem:[#allocation26_spill] sm:$0xff] %v6561_v3  ;;  %1903 = vperm.xlu0 %5562, %v1856_v29   ;;  %v6569_v23 = vmul.f32 %v6471_v33, %v6561_v3  ;;  %v6572_v60 = vmul.f32 %v5743_v10, %v6394_v38 }
 0x5d4   :  { %7726 = vst [vmem:[#allocation27_spill] sm:$0xff] %v6565_v28  ;;  %1900 = vperm.xlu1 %5561, %v1855_v7   ;;  %v6576_v20 = vmul.f32 %v6465_v11, %v6565_v28  ;;  %v5745_v15 = vpop.eup %5744 }
 0x5d5   :  { %7727 = vst [vmem:[#allocation28_spill] sm:$0xff] %v6572_v60  ;;  %v1857_v0 = vand.u32 2147483647, %v6569_v23  ;;  %v6581_v49 = vmul.f32 %v6467_v30, %v6572_v60  ;;  %v5747_v62 = vpop.eup %5746  ;;  %v6585_v29 = vmul.f32 %v5745_v15, %v6396_v39 }
 0x5d6   :  { %v1858_v5 = vand.u32 2147483647, %v6576_v20  ;;  %v5749_v38 = vpop.eup %5748  ;;  %v6588_v10 = vmul.f32 %v5747_v62, %v6400_v19 }
 0x5d7   :  { %7728 = vst [vmem:[#allocation29_spill] sm:$0xff] %v6585_v29  ;;  %v5751_v7 = vpop.eup %5750  ;;  %v6592_v28 = vmul.f32 %v6479_v32, %v6585_v29  ;;  %v6595_v60 = vmul.f32 %v5749_v38, %v6402_v44  ;;  %v1859_v31 = vand.u32 2147483647, %v6581_v49 }
 0x5d8   :  { %7729 = vst [vmem:[#allocation30_spill] sm:$0xff] %v6588_v10  ;;  %1906 = vperm.xlu1 %5561, %v1857_v0   ;;  %1909 = vperm.xlu0 %5562, %v1858_v5   ;;  %v5753_v3 = vpop.eup %5752  ;;  %v6600_v39 = vmul.f32 %v6469_v27, %v6588_v10  ;;  %v6608_v0 = vmul.f32 %v5751_v7, %v6411_v54 }
 0x5d9   :  { %7730 = vst [vmem:[#allocation31_spill] sm:$0xff] %v6595_v60  ;;  %v1860_v19 = vand.u32 2147483647, %v6592_v28  ;;  %v6605_v15 = vmul.f32 %v6483_v2, %v6595_v60  ;;  %v6611_v62 = vmul.f32 %v5753_v3, %v6413_v24 }
 0x5da   :  { %7731 = vst [vmem:[#allocation32_spill] sm:$0xff] %v6608_v0  ;;  %v1861_v44 = vand.u32 2147483647, %v6600_v39  ;;  %v6617_v38 = vmul.f32 %v6543_v40, %v6608_v0 }
 0x5db   :  { %7732 = vst [vmem:[#allocation33_spill] sm:$0xff] %v6611_v62  ;;  %v1862_v5 = vand.u32 2147483647, %v6605_v15  ;;  %v6621_v60 = vmul.f32 %v6532_v56, %v6611_v62 }
 0x5dc   :  { %1912 = vperm.xlu1 %5561, %v1859_v31   ;;  %1915 = vperm.xlu0 %5562, %v1860_v19   ;;  %v1863_v54 = vand.u32 2147483647, %v6617_v38 }
 0x5dd   :  { %v1864_v24 = vand.u32 2147483647, %v6621_v60 }
 0x5e0   :  { %1918 = vperm.xlu1 %5561, %v1861_v44   ;;  %1921 = vperm.xlu0 %5562, %v1862_v5  }
 0x5e4   :  { %1924 = vperm.xlu1 %5561, %v1863_v54   ;;  %1927 = vperm.xlu0 %5562, %v1864_v24  }
 0x646   :  { %v1886_v31 = vpop.permute.xlu0 %1885 }
 0x647   :  { %v1883_v3 = vpop.permute.xlu1 %1882  ;;  %v1936_v19 = vrot.slane %v1886_v31, %v6298_v36 }
 0x648   :  { %v1932_v7 = vrot.slane %v1883_v3, %v6298_v36 }
 0x64a   :  { %v1892_v0 = vpop.permute.xlu0 %1891  ;;  %v1993_v62 = vsel %vm1181_vm11, %v1936_v19, %v1932_v7 }
 0x64b   :  { %v1889_v10 = vpop.permute.xlu1 %1888  ;;  %v1944_v44 = vrot.slane %v1892_v0, %v6298_v36 }
 0x64c   :  { %v1940_v29 = vrot.slane %v1889_v10, %v6298_v36 }
 0x64e   :  { %v1994_v5 = vsel %vm1183_vm12, %v1940_v29, %v1993_v62  ;;  %v1898_v35 = vpop.permute.xlu0 %1897 }
 0x64f   :  { %v1895_v56 = vpop.permute.xlu1 %1894  ;;  %v1995_v24 = vsel %vm1185_vm13, %v1944_v44, %v1994_v5  ;;  %v1952_v3 = vrot.slane %v1898_v35, %v6298_v36 }
 0x650   :  { %v1948_v54 = vrot.slane %v1895_v56, %v6298_v36 }
 0x652   :  { %v1996_v31 = vsel %vm1187_vm14, %v1948_v54, %v1995_v24  ;;  %v1904_v40 = vpop.permute.xlu0 %1903 }
 0x653   :  { %v1901_v2 = vpop.permute.xlu1 %1900  ;;  %v1960_v10 = vrot.slane %v1904_v40, %v6298_v36  ;;  %v1997_v0 = vsel %vm1189_vm15, %v1952_v3, %v1996_v31 }
 0x654   :  { %v1956_v7 = vrot.slane %v1901_v2, %v6298_v36 }
 0x656   :  { %v1998_v29 = vsel %vm1191_vm1, %v1956_v7, %v1997_v0 }
 0x657   :  { %v1907_v62 = vpop.permute.xlu1 %1906  ;;  %v1910_v19 = vpop.permute.xlu0 %1909  ;;  %v1999_v56 = vsel %vm7700_vm2, %v1960_v10, %v1998_v29 }
 0x658   :  { %v2009_v44 = vsel %vm7699_vm4, %v1999_v56, 0.0  ;;  %v1964_v35 = vrot.slane %v1907_v62, %v6298_v36  ;;  %v1968_v5 = vrot.slane %v1910_v19, %v6298_v36 }
 0x659   :  { %2010 = vadd.xlane.f32.xlu1 %v2009_v44 }
 0x65a   :  { %v2000_v2 = vsel %vm1181_vm11, %v1968_v5, %v1964_v35 }
 0x65b   :  { %v1913_v54 = vpop.permute.xlu1 %1912  ;;  %v1916_v24 = vpop.permute.xlu0 %1915 }
 0x65c   :  { %v1972_v40 = vrot.slane %v1913_v54, %v6298_v36  ;;  %v1976_v3 = vrot.slane %v1916_v24, %v6298_v36 }
 0x65e   :  { %v2001_v31 = vsel %vm1183_vm12, %v1972_v40, %v2000_v2 }
 0x65f   :  { %v1919_v7 = vpop.permute.xlu1 %1918  ;;  %v1922_v0 = vpop.permute.xlu0 %1921  ;;  %v2002_v29 = vsel %vm1185_vm13, %v1976_v3, %v2001_v31  ;;  %v6660_v3 = vld [vmem:[%s7645_s0] sm:$0xff] }
 0x660   :  { %v1980_v10 = vrot.slane %v1919_v7, %v6298_v36  ;;  %v1984_v62 = vrot.slane %v1922_v0, %v6298_v36  ;;  %v2147_v31 = vpack.c.bf16 %v6660_v3, %v6660_v3  ;;  %v7733_v0 = vmov 0.0  }
 0x661   :  { %5404 = vmatprep.mubr.msk.bf16.mxu1 %vm5922_vm6, %v7733_v0  ;;  %5422 = vmatprep.mubr.msk.bf16.mxu0 %vm5922_vm6, %v7733_v0 }
 0x662   :  { %v2003_v19 = vsel %vm1187_vm14, %v1980_v10, %v2002_v29  ;;  %v2234_v7 = vsel %vm7698_vm3, %v2147_v31, 0 }
 0x663   :  { %v1925_v56 = vpop.permute.xlu1 %1924  ;;  %v1928_v44 = vpop.permute.xlu0 %1927  ;;  %v2004_v5 = vsel %vm1189_vm15, %v1984_v62, %v2003_v19  ;;  %5403 = vmatpush3.bf16.msra.mxu1 %v2234_v7 }
 0x664   :  { %v1988_v54 = vrot.slane %v1925_v56, %v6298_v36  ;;  %v1992_v35 = vrot.slane %v1928_v44, %v6298_v36  ;;  %5408 = vmatprep.subr.bf16.mxu1 %v7733_v0 }
 0x666   :  { %v2005_v24 = vsel %vm1191_vm1, %v1988_v54, %v2004_v5 }
 0x667   :  { %v2006_v40 = vsel %vm7700_vm2, %v1992_v35, %v2005_v24 }
 0x668   :  { %v2012_v2 = vsel %vm7699_vm4, %v2006_v40, 0.0 }
 0x669   :  { %2013 = vadd.xlane.f32.xlu0 %v2012_v2 }
 0x6e6   :  { %v2011_v10 = vpop.xlane.xlu1 %2010 }
 0x6e7   :  { %v2015_v29 = vmax.f32 %v2011_v10, 1e-12 }
 0x6e9   :  { %v2026_v62 = vrot.slane %v2015_v29, %v6121_v43  ;;  %v2022_v19 = vrot.slane %v2015_v29, %v5975_v13  ;;  %v2030_v56 = vrot.slane %v2015_v29, %v6128_v46  ;;  %v2034_v44 = vrot.slane %v2015_v29, %v6146_v51 }
 0x6ea   :  { %v2038_v54 = vrot.slane %v2015_v29, %v6137_v47  ;;  %v2042_v35 = vrot.slane %v2015_v29, %v6153_v55  ;;  %v2046_v5 = vrot.slane %v2015_v29, %v6210_v53  ;;  %v2050_v24 = vrot.slane %v2015_v29, %v6207_v26 }
 0x6eb   :  { %5754 = vrcp.f32 %v2026_v62 }
 0x6ec   :  { %5756 = vrcp.f32 %v2022_v19 }
 0x6ed   :  { %5758 = vrcp.f32 %v2030_v56 }
 0x6ee   :  { %5760 = vrcp.f32 %v2034_v44 }
 0x6ef   :  { %5762 = vrcp.f32 %v2038_v54 }
 0x6f0   :  { %5764 = vrcp.f32 %v2042_v35 }
 0x6f1   :  { %5766 = vrcp.f32 %v2046_v5 }
 0x6f2   :  { %5768 = vrcp.f32 %v2050_v24 }
 0x6f5   :  { %v5755_v40 = vpop.eup %5754 }
 0x6f6   :  { %v5757_v2 = vpop.eup %5756  ;;  %v2014_v31 = vpop.xlane.xlu0 %2013  ;;  %v2102_v7 = vmul.f32 %v5755_v40, %v6493_v8 }
 0x6f7   :  { %v5759_v10 = vpop.eup %5758  ;;  %v2016_v62 = vmax.f32 %v2014_v31, 1e-12  ;;  %v2100_v19 = vmul.f32 %v5757_v2, %v6500_v48 }
 0x6f8   :  { %v5761_v27 = vpop.eup %5760  ;;  %v2132_v56 = vpack.c.bf16 %v2102_v7, %v2102_v7  ;;  %v2104_v32 = vmul.f32 %v5759_v10, %v6510_v42 }
 0x6f9   :  { %v5763_v44 = vpop.eup %5762  ;;  %v2131_v30 = vpack.c.bf16 %v2100_v19, %v2100_v19  ;;  %v2106_v29 = vmul.f32 %v5761_v27, %v6519_v25  ;;  %v2058_v54 = vrot.slane %v2016_v62, %v6121_v43  ;;  %v2054_v35 = vrot.slane %v2016_v62, %v5975_v13 }
 0x6fa   :  { %v5765_v5 = vpop.eup %5764  ;;  %v2158_v24 = vunpack.c.l.b16 %v2132_v56  ;;  %v2133_v11 = vpack.c.bf16 %v2104_v32, %v2104_v32  ;;  %v2108_v8 = vmul.f32 %v5763_v44, %v6536_v34  ;;  %v2066_v40 = vrot.slane %v2016_v62, %v6146_v51 }
 0x6fb   :  { %v5767_v48 = vpop.eup %5766  ;;  %v2157_v2 = vunpack.c.l.b16 %v2131_v30  ;;  %v2134_v31 = vpack.c.bf16 %v2106_v29, %v2106_v29  ;;  %v2110_v42 = vmul.f32 %v5765_v5, %v6528_v59  ;;  %5770 = vrcp.f32 %v2058_v54 }
 0x6fc   :  { %v5769_v7 = vpop.eup %5768  ;;  %2169 = vperm.xlu1 %5561, %v2158_v24   ;;  %5772 = vrcp.f32 %v2054_v35  ;;  %v2159_v27 = vunpack.c.l.b16 %v2133_v11  ;;  %v2135_v25 = vpack.c.bf16 %v2108_v8, %v2108_v8  ;;  %v2112_v32 = vmul.f32 %v5767_v48, %v6557_v1 }
 0x6fd   :  { %2166 = vperm.xlu0 %5562, %v2157_v2   ;;  %5774 = vrcp.f32 %v2066_v40  ;;  %v2160_v10 = vunpack.c.l.b16 %v2134_v31  ;;  %v2062_v34 = vrot.slane %v2016_v62, %v6128_v46  ;;  %v2074_v19 = vrot.slane %v2016_v62, %v6153_v55 }
 0x6fe   :  { %v2136_v56 = vpack.c.bf16 %v2110_v42, %v2110_v42  ;;  %v2114_v30 = vmul.f32 %v5769_v7, %v6552_v37  ;;  %v2070_v59 = vrot.slane %v2016_v62, %v6137_v47  ;;  %v2082_v44 = vrot.slane %v2016_v62, %v6207_v26 }
 0x6ff   :  { %5776 = vrcp.f32 %v2062_v34  ;;  %v2078_v11 = vrot.slane %v2016_v62, %v6210_v53  ;;  %v2161_v29 = vunpack.c.l.b16 %v2135_v25  ;;  %v2137_v54 = vpack.c.bf16 %v2112_v32, %v2112_v32 }
 0x700   :  { %2172 = vperm.xlu1 %5561, %v2159_v27   ;;  %5778 = vrcp.f32 %v2074_v19  ;;  %v2162_v1 = vunpack.c.l.b16 %v2136_v56  ;;  %v2138_v35 = vpack.c.bf16 %v2114_v30, %v2114_v30 }
 0x701   :  { %2175 = vperm.xlu0 %5562, %v2160_v10   ;;  %5780 = vrcp.f32 %v2070_v59  ;;  %v2163_v24 = vunpack.c.l.b16 %v2137_v54 }
 0x702   :  { %5782 = vrcp.f32 %v2082_v44  ;;  %v2164_v48 = vunpack.c.l.b16 %v2138_v35 }
 0x703   :  { %5784 = vrcp.f32 %v2078_v11 }
 0x704   :  { %2178 = vperm.xlu1 %5561, %v2161_v29  }
 0x705   :  { %v5771_v5 = vpop.eup %5770  ;;  %2181 = vperm.xlu0 %5562, %v2162_v1  }
 0x706   :  { %v5773_v37 = vpop.eup %5772  ;;  %v2118_v8 = vmul.f32 %v5771_v5, %v6576_v20 }
 0x707   :  { %v5775_v40 = vpop.eup %5774  ;;  %v2116_v62 = vmul.f32 %v5773_v37, %v6569_v23 }
 0x708   :  { %2184 = vperm.xlu1 %5561, %v2163_v24   ;;  %v2140_v2 = vpack.c.bf16 %v2118_v8, %v2118_v8  ;;  %v2122_v31 = vmul.f32 %v5775_v40, %v6592_v28 }
 0x709   :  { %2187 = vperm.xlu0 %5562, %v2164_v48   ;;  %v2139_v42 = vpack.c.bf16 %v2116_v62, %v2116_v62  ;;  %v5777_v7 = vpop.eup %5776 }
 0x70a   :  { %v2285_v27 = vunpack.c.l.b16 %v2140_v2  ;;  %v2142_v25 = vpack.c.bf16 %v2122_v31, %v2122_v31  ;;  %v5779_v10 = vpop.eup %5778  ;;  %v2120_v34 = vmul.f32 %v5777_v7, %v6581_v49 }
 0x70b   :  { %v2284_v32 = vunpack.c.l.b16 %v2139_v42  ;;  %v5781_v19 = vpop.eup %5780  ;;  %v2126_v20 = vmul.f32 %v5779_v10, %v6605_v15 }
 0x70c   :  { %v5783_v56 = vpop.eup %5782  ;;  %v2141_v23 = vpack.c.bf16 %v2120_v34, %v2120_v34  ;;  %v2124_v30 = vmul.f32 %v5781_v19, %v6600_v39  ;;  %v2287_v28 = vunpack.c.l.b16 %v2142_v25 }
 0x70d   :  { %2296 = vperm.xlu0 %5562, %v2285_v27   ;;  %2293 = vperm.xlu1 %5561, %v2284_v32   ;;  %v5785_v59 = vpop.eup %5784  ;;  %v2144_v44 = vpack.c.bf16 %v2126_v20, %v2126_v20  ;;  %v2130_v11 = vmul.f32 %v5783_v56, %v6621_v60 }
 0x70e   :  { %v2286_v29 = vunpack.c.l.b16 %v2141_v23  ;;  %v2143_v54 = vpack.c.bf16 %v2124_v30, %v2124_v30  ;;  %v2128_v1 = vmul.f32 %v5785_v59, %v6617_v38  ;;  %v5915_v23 = vld [vmem:[%s7645_s0 + $0x8] sm:$0xff] }
 0x70f   :  { %v2289_v49 = vunpack.c.l.b16 %v2144_v44  ;;  %v2146_v15 = vpack.c.bf16 %v2130_v11, %v2130_v11  ;;  %v2148_v30 = vpack.c.bf16 %v5915_v23, %v5915_v23 }
 0x710   :  { %v2288_v39 = vunpack.c.l.b16 %v2143_v54  ;;  %v2145_v35 = vpack.c.bf16 %v2128_v1, %v2128_v1 }
 0x711   :  { %2302 = vperm.xlu0 %5562, %v2287_v28   ;;  %2299 = vperm.xlu1 %5561, %v2286_v29   ;;  %v2291_v60 = vunpack.c.l.b16 %v2146_v15 }
 0x712   :  { %v2290_v5 = vunpack.c.l.b16 %v2145_v35 }
 0x715   :  { %2308 = vperm.xlu0 %5562, %v2289_v49   ;;  %2305 = vperm.xlu1 %5561, %v2288_v39   ;;  %v2360_v49 = vsel %vm7698_vm3, %v2148_v30, 0  ;;  %v5630_v30 = vld [vmem:[%s7644_s1 + $0x58] sm:$0xff]  }
 0x719   :  { %2314 = vperm.xlu0 %5562, %v2291_v60   ;;  %2311 = vperm.xlu1 %5561, %v2290_v5  }
 0x77b   :  { %v2170_v38 = vpop.permute.xlu1 %2169 }
 0x77c   :  { %v2167_v37 = vpop.permute.xlu0 %2166  ;;  %v2196_v24 = vrot.slane %v2170_v38, %v6298_v36 }
 0x77d   :  { %v2192_v8 = vrot.slane %v2167_v37, %v6298_v36 }
 0x77f   :  { %v2173_v40 = vpop.permute.xlu1 %2172  ;;  %v2221_v2 = vsel %vm1181_vm11, %v2196_v24, %v2192_v8 }
 0x780   :  { %v2200_v48 = vrot.slane %v2173_v40, %v6298_v36  ;;  %v2176_v62 = vpop.permute.xlu0 %2175 }
 0x781   :  { %v2204_v31 = vrot.slane %v2176_v62, %v6298_v36 }
 0x782   :  { %v2222_v42 = vsel %vm1183_vm12, %v2200_v48, %v2221_v2 }
 0x783   :  { %v2179_v7 = vpop.permute.xlu1 %2178  ;;  %v2223_v10 = vsel %vm1185_vm13, %v2204_v31, %v2222_v42 }
 0x784   :  { %v2208_v27 = vrot.slane %v2179_v7, %v6298_v36  ;;  %v2182_v25 = vpop.permute.xlu0 %2181 }
 0x785   :  { %v2212_v32 = vrot.slane %v2182_v25, %v6298_v36 }
 0x786   :  { %v2224_v34 = vsel %vm1187_vm14, %v2208_v27, %v2223_v10 }
 0x787   :  { %v2185_v19 = vpop.permute.xlu1 %2184  ;;  %v2225_v59 = vsel %vm1189_vm15, %v2212_v32, %v2224_v34 }
 0x788   :  { %v2216_v20 = vrot.slane %v2185_v19, %v6298_v36  ;;  %v2188_v56 = vpop.permute.xlu0 %2187 }
 0x789   :  { %v2220_v28 = vrot.slane %v2188_v56, %v6298_v36  ;;  %v5629_v56 = vld [vmem:[%s7644_s1 + $0x50] sm:$0xff]  }
 0x78a   :  { %v2226_v44 = vsel %vm1191_vm1, %v2216_v20, %v2225_v59  ;;  %v5628_v20 = vld [vmem:[%s7644_s1 + $0x48] sm:$0xff]  }
 0x78b   :  { %v2227_v11 = vsel %vm7700_vm2, %v2220_v28, %v2226_v44  ;;  %5415 = vmatpush3.bf16.msra.mxu0 %v5628_v20 }
 0x78c   :  { %v2228_v29 = vpack.c.b16 %v2227_v11, %v2227_v11  ;;  %v2294_v54 = vpop.permute.xlu1 %2293  ;;  %v2297_v1 = vpop.permute.xlu0 %2296  ;;  %5416 = vmatprep.subr.bf16.mxu0 %v7733_v0 }
 0x78d   :  { %v2319_v39 = vrot.slane %v2294_v54, %v6298_v36  ;;  %v2323_v15 = vrot.slane %v2297_v1, %v6298_v36 }
 0x78e   :  { %5405 = vmatmul.mubr.msk.bf16.vlgmr.msra.gmra.mrb[16].mxu1 %vm7699_vm4, %v2228_v29  ;;  %v5631_v29 = vld [vmem:[%s7644_s1 + $0x60] sm:$0xff]  }
 0x78f   :  { %5409 = vmatpush3.bf16.msra.mxu1 %v2360_v49  ;;  %5410 = vmatprep.mubr.msk.bf16.mxu1 %vm5922_vm6, %v7733_v0  ;;  %v2348_v38 = vsel %vm1181_vm11, %v2323_v15, %v2319_v39 }
 0x790   :  { %v2300_v35 = vpop.permute.xlu1 %2299  ;;  %v2303_v60 = vpop.permute.xlu0 %2302  ;;  %5417 = vmatpush3.bf16.msra.mxu0 %v5629_v56 }
 0x791   :  { %v2327_v5 = vrot.slane %v2300_v35, %v6298_v36  ;;  %v2331_v37 = vrot.slane %v2303_v60, %v6298_v36  ;;  %5418 = vmatprep.subr.bf16.mxu0 %v7733_v0 }
 0x793   :  { %v2349_v24 = vsel %vm1183_vm12, %v2327_v5, %v2348_v38 }
 0x794   :  { %v2306_v8 = vpop.permute.xlu1 %2305  ;;  %v2309_v40 = vpop.permute.xlu0 %2308  ;;  %v2350_v62 = vsel %vm1185_vm13, %v2331_v37, %v2349_v24  ;;  %5419 = vmatpush3.bf16.msra.mxu0 %v5630_v30 }
 0x795   :  { %v2335_v48 = vrot.slane %v2306_v8, %v6298_v36  ;;  %v2339_v2 = vrot.slane %v2309_v40, %v6298_v36  ;;  %5420 = vmatprep.subr.bf16.mxu0 %v7733_v0  ;;  %v5632_v8 = vld [vmem:[%s7644_s1 + $0x68] sm:$0xff]   ;;  %v5633_v40 = vld [vmem:[%s7644_s1 + $0x70] sm:$0xff]  }
 0x796   :  { %5426 = vmatprep.subr.bf16.mxu1 %v5632_v8 }
 0x797   :  { %v2351_v31 = vsel %vm1187_vm14, %v2335_v48, %v2350_v62 }
 0x798   :  { %v2312_v42 = vpop.permute.xlu1 %2311  ;;  %v2315_v7 = vpop.permute.xlu0 %2314  ;;  %v2352_v10 = vsel %vm1189_vm15, %v2339_v2, %v2351_v31  ;;  %5421 = vmatpush3.bf16.msra.mxu0 %v5631_v29 }
 0x799   :  { %v2343_v27 = vrot.slane %v2312_v42, %v6298_v36  ;;  %v2347_v25 = vrot.slane %v2315_v7, %v6298_v36 }
 0x79b   :  { %v2353_v32 = vsel %vm1191_vm1, %v2343_v27, %v2352_v10 }
 0x79c   :  { %v2354_v34 = vsel %vm7700_vm2, %v2347_v25, %v2353_v32 }
 0x79d   :  { %v2355_v19 = vpack.c.b16 %v2354_v34, %v2354_v34 }
 0x79f   :  { %5411 = vmatmul.mubr.msk.bf16.vlgmr.msra.gmra.mrb[20].mxu1 %vm7699_vm4, %v2355_v19 }
 0x7a0   :  { %5427 = vmatpush3.bf16.msra.mxu1 %v5632_v8 }
 0x7a1   :  { %5428 = vmatprep.subr.bf16.mxu1 %v5633_v40 }
 0x7a4   :  { %5429 = vmatpush3.bf16.msra.mxu1 %v5633_v40 }
 0x861   :  { %v2270_v59 = vpop.f32.mrb[16].mxu1 }
 0x862   :  { %v5406_v28 = vpop.f32.mrb[17].mxu1 }
 0x863   :  { %v2273_v44 = vpop.f32.mrb[18].mxu1 }
 0x864   :  { %v5407_v11 = vpop.f32.mrb[19].mxu1 }
 0x872   :  { %v2396_v54 = vpop.f32.mrb[20].mxu1 }
 0x873   :  { %v5563_v1 = vpack.i.bf16 %v2396_v54, %v2270_v59  ;;  %v5412_v49 = vpop.f32.mrb[21].mxu1 }
 0x874   :  { %v2399_v39 = vpop.f32.mrb[22].mxu1 }
 0x875   :  { %5564 = vrot.lane.b32.xlu1 %v5563_v1, %s5923_s22  ;;  %v5413_v15 = vpop.f32.mrb[23].mxu1 }
 0x8e7   :  { %v5565_v35 = vpop.permute.xlu1 %5564 }
 0x8e8   :  { %v5567_v60 = vunpack.i.h.bf16 %v5565_v35  ;;  %v5566_v5 = vunpack.i.l.bf16 %v5565_v35 }
 0x8ea   :  { %v2411_v38 = vsel %vm307_vm0, %v5915_v23, %v5567_v60  ;;  %v2410_v37 = vsel %vm307_vm0, %v6660_v3, %v5566_v5  ;;  %v5634_v23 = vld [vmem:[%s7644_s1 + $0x78] sm:$0xff]  }
 0x8eb   :  { %v2412_v24 = vpack.c.bf16 %v2411_v38, %v2410_v37  ;;  %5430 = vmatprep.subr.bf16.mxu1 %v5634_v23 }
 0x8ec   :  { %5431 = vmatpush3.bf16.msra.mxu1 %v5634_v23 }
 0x8ed   :  { %5423 = vmatmul.mubr.msk.bf16.vlgmr.msra.gmra.mrb[32].mxu0 %vm517_vm5, %v2412_v24 }
 0x9c0   :  { %v2482_v3 = vpop.f32.mrb[32].mxu0 }
 0x9c1   :  { %vm2489_vm7 = vcmp.gt.f32.partialorder %v2482_v3, 0.0  ;;  %v2491_v48 = vmul.f32 0.01, %v2482_v3  ;;  %v5424_v62 = vpop.f32.mrb[33].mxu0 }
 0x9c2   :  { %v2485_v2 = vpop.f32.mrb[34].mxu0 }
 0x9c3   :  { %v6769_v31 = vsel %vm2489_vm7, %v2482_v3, %v2491_v48  ;;  %vm2490_vm8 = vcmp.gt.f32.partialorder %v2485_v2, 0.0  ;;  %v2492_v42 = vmul.f32 0.01, %v2485_v2  ;;  %v5425_v7 = vpop.f32.mrb[35].mxu0 }
 0x9c4   :  { %v2512_v27 = vrot.slane %v6769_v31, %v5972_v12  ;;  %v2505_v25 = vcombine.high %v6769_v31, %v6769_v31 }
 0x9c5   :  { %v6775_v10 = vsel %vm2490_vm8, %v2485_v2, %v2492_v42 }
 0x9c6   :  { %v2520_v32 = vcombine.high %v2512_v27, %v2512_v27  ;;  %v2528_v34 = vrot.slane %v2512_v27, %v5972_v12  ;;  %v2519_v19 = vrot.slane %v2505_v25, %v5972_v12  ;;  %v2561_v20 = vrot.slane %v6775_v10, %v5972_v12 }
 0x9c7   :  { %v2554_v56 = vcombine.high %v6775_v10, %v6775_v10 }
 0x9c8   :  { %v2542_v30 = vrot.slane %v2520_v32, %v5972_v12  ;;  %v2606_v59 = vrot.slane %v2528_v34, %v5975_v13  ;;  %v2550_v28 = vcombine.high %v2528_v34, %v2528_v34  ;;  %v2521_v44 = vcombine.high %v2519_v19, %v2519_v19 }
 0x9c9   :  { %v2535_v11 = vrot.slane %v2519_v19, %v5972_v12  ;;  %v2569_v29 = vcombine.high %v2561_v20, %v2561_v20  ;;  %v2577_v54 = vrot.slane %v2561_v20, %v5972_v12  ;;  %v6788_v1 = vrot.slane %v2554_v56, %v5972_v12 }
 0x9ca   :  { %v2610_v49 = vrot.slane %v2542_v30, %v5975_v13  ;;  %v2683_v39 = vsub.f32 %v2606_v59, %v6769_v31  ;;  %v2552_v15 = vcombine.high %v2542_v30, %v2542_v30  ;;  %v2614_v35 = vrot.slane %v2550_v28, %v5975_v13 }
 0x9cb   :  { %v2549_v60 = vrot.slane %v2521_v44, %v5972_v12  ;;  %v2622_v5 = vrot.slane %v2535_v11, %v5975_v13  ;;  %v2551_v38 = vcombine.high %v2535_v11, %v2535_v11  ;;  %v2591_v37 = vrot.slane %v2569_v29, %v5972_v12 }
 0x9cc   :  { %v2684_v24 = vsub.f32 %v2610_v49, %v6769_v31  ;;  %v2699_v8 = vand.u32 2147483647, %v2683_v39  ;;  %v2618_v40 = vrot.slane %v2552_v15, %v5975_v13  ;;  %v2685_v23 = vsub.f32 %v2614_v35, %v6769_v31 }
 0x9cd   :  { %v2626_v3 = vrot.slane %v2549_v60, %v5975_v13  ;;  %v2687_v48 = vsub.f32 %v2622_v5, %v6769_v31  ;;  %v2553_v62 = vcombine.high %v2549_v60, %v2549_v60  ;;  %v2630_v2 = vrot.slane %v2551_v38, %v5975_v13 }
 0x9ce   :  { %v2700_v42 = vand.u32 2147483647, %v2684_v24  ;;  %v2715_v7 = vsub.f32 0.0, %v2699_v8  ;;  %v2686_v27 = vsub.f32 %v2618_v40, %v6769_v31  ;;  %v2701_v25 = vand.u32 2147483647, %v2685_v23 }
 0x9cf   :  { %v2688_v32 = vsub.f32 %v2626_v3, %v6769_v31  ;;  %v2703_v34 = vand.u32 2147483647, %v2687_v48  ;;  %v2634_v19 = vrot.slane %v2553_v62, %v5975_v13  ;;  %v2689_v20 = vsub.f32 %v2630_v2, %v6769_v31 }
 0x9d0   :  { %v2716_v56 = vsub.f32 0.0, %v2700_v42  ;;  %v2731_v30 = vmul.f32 1.442695, %v2715_v7  ;;  %v2702_v59 = vand.u32 2147483647, %v2686_v27  ;;  %v2717_v28 = vsub.f32 0.0, %v2701_v25 }
 0x9d1   :  { %v2704_v44 = vand.u32 2147483647, %v2688_v32  ;;  %v2719_v11 = vsub.f32 0.0, %v2703_v34  ;;  %v2690_v29 = vsub.f32 %v2634_v19, %v6769_v31  ;;  %v2705_v49 = vand.u32 2147483647, %v2689_v20 }
 0x9d2   :  { %5786 = vpow2.f32 %v2731_v30  ;;  %v2733_v39 = vmul.f32 1.442695, %v2716_v56  ;;  %v2718_v15 = vsub.f32 0.0, %v2702_v59  ;;  %v2735_v35 = vmul.f32 1.442695, %v2717_v28 }
 0x9d3   :  { %v2720_v60 = vsub.f32 0.0, %v2704_v44  ;;  %v2739_v5 = vmul.f32 1.442695, %v2719_v11  ;;  %v2706_v38 = vand.u32 2147483647, %v2690_v29  ;;  %v2721_v24 = vsub.f32 0.0, %v2705_v49 }
 0x9d4   :  { %5788 = vpow2.f32 %v2733_v39  ;;  %v2737_v8 = vmul.f32 1.442695, %v2718_v15  ;;  %v2638_v40 = vrot.slane %v2577_v54, %v5975_v13  ;;  %v2642_v23 = vrot.slane %v2591_v37, %v5975_v13 }
 0x9d5   :  { %5790 = vpow2.f32 %v2735_v35  ;;  %v2741_v3 = vmul.f32 1.442695, %v2720_v60  ;;  %v2722_v48 = vsub.f32 0.0, %v2706_v38  ;;  %v2743_v62 = vmul.f32 1.442695, %v2721_v24 }
 0x9d6   :  { %5792 = vpow2.f32 %v2737_v8  ;;  %v2691_v2 = vsub.f32 %v2638_v40, %v6775_v10  ;;  %v2692_v42 = vsub.f32 %v2642_v23, %v6775_v10  ;;  %v2599_v7 = vcombine.high %v2577_v54, %v2577_v54  ;;  %v5635_v54 = vld [vmem:[%s7644_s1 + $0x80] sm:$0xff]  }
 0x9d7   :  { %5794 = vpow2.f32 %v2739_v5  ;;  %v2745_v27 = vmul.f32 1.442695, %v2722_v48  ;;  %v2601_v25 = vcombine.high %v2591_v37, %v2591_v37  ;;  %v2570_v32 = vcombine.high %v6788_v1, %v6788_v1  ;;  %5432 = vmatprep.subr.bf16.mxu1 %v5635_v54 }
 0x9d8   :  { %5796 = vpow2.f32 %v2741_v3  ;;  %v2707_v34 = vand.u32 2147483647, %v2691_v2  ;;  %v2708_v19 = vand.u32 2147483647, %v2692_v42  ;;  %v2646_v20 = vrot.slane %v2599_v7, %v5975_v13  ;;  %5433 = vmatpush3.bf16.msra.mxu1 %v5635_v54 }
 0x9d9   :  { %5798 = vpow2.f32 %v2743_v62  ;;  %v2650_v56 = vrot.slane %v2601_v25, %v5975_v13  ;;  %v2584_v30 = vrot.slane %v6788_v1, %v5972_v12  ;;  %v2598_v59 = vrot.slane %v2570_v32, %v5972_v12 }
 0x9da   :  { %5800 = vpow2.f32 %v2745_v27  ;;  %v2723_v37 = vsub.f32 0.0, %v2707_v34  ;;  %v2724_v28 = vsub.f32 0.0, %v2708_v19  ;;  %v2693_v44 = vsub.f32 %v2646_v20, %v6775_v10 }
 0x9db   :  { %v2694_v11 = vsub.f32 %v2650_v56, %v6775_v10  ;;  %v2654_v29 = vrot.slane %v2584_v30, %v5975_v13  ;;  %v2658_v49 = vrot.slane %v2598_v59, %v5975_v13  ;;  %v2600_v39 = vcombine.high %v2584_v30, %v2584_v30 }
 0x9dc   :  { %v5787_v1 = vpop.eup %5786  ;;  %v2747_v15 = vmul.f32 1.442695, %v2723_v37  ;;  %v2749_v12 = vmul.f32 1.442695, %v2724_v28  ;;  %v2709_v35 = vand.u32 2147483647, %v2693_v44  ;;  %v2602_v60 = vcombine.high %v2598_v59, %v2598_v59 }
 0x9dd   :  { %v2710_v5 = vand.u32 2147483647, %v2694_v11  ;;  %v2695_v38 = vsub.f32 %v2654_v29, %v6775_v10  ;;  %v2696_v24 = vsub.f32 %v2658_v49, %v6775_v10  ;;  %v2662_v8 = vrot.slane %v2600_v39, %v5975_v13 }
 0x9de   :  { %v5789_v40 = vpop.eup %5788  ;;  %5802 = vpow2.f32 %v2747_v15  ;;  %v2725_v23 = vsub.f32 0.0, %v2709_v35  ;;  %v2666_v3 = vrot.slane %v2602_v60, %v5975_v13 }
 0x9df   :  { %v5791_v48 = vpop.eup %5790  ;;  %v5568_v62 = vpack.i.bf16 %v5789_v40, %v5787_v1  ;;  %5804 = vpow2.f32 %v2749_v12  ;;  %v2726_v2 = vsub.f32 0.0, %v2710_v5  ;;  %v2711_v42 = vand.u32 2147483647, %v2695_v38 }
 0x9e0   :  { %v5793_v7 = vpop.eup %5792  ;;  %v2751_v27 = vmul.f32 1.442695, %v2725_v23  ;;  %v2712_v25 = vand.u32 2147483647, %v2696_v24  ;;  %v2697_v32 = vsub.f32 %v2662_v8, %v6775_v10  ;;  %v2698_v34 = vsub.f32 %v2666_v3, %v6775_v10 }
 0x9e1   :  { %v5795_v19 = vpop.eup %5794  ;;  %5569 = vrot.lane.b32.xlu0 %v5568_v62, %s5923_s22  ;;  %v5573_v20 = vpack.i.bf16 %v5793_v7, %v5791_v48  ;;  %v2753_v56 = vmul.f32 1.442695, %v2726_v2  ;;  %v2727_v30 = vsub.f32 0.0, %v2711_v42  ;;  %v5636_v7 = vld [vmem:[%s7644_s1 + $0x88] sm:$0xff]  }
 0x9e2   :  { %v5797_v59 = vpop.eup %5796  ;;  %5806 = vpow2.f32 %v2751_v27  ;;  %v2728_v54 = vsub.f32 0.0, %v2712_v25  ;;  %v2713_v37 = vand.u32 2147483647, %v2697_v32  ;;  %v2714_v28 = vand.u32 2147483647, %v2698_v34  ;;  %v5637_v27 = vld [vmem:[%s7644_s1 + $0x90] sm:$0xff]   ;;  %5450 = vmatprep.subr.bf16.mxu0 %v5636_v7 }
 0x9e3   :  { %v5799_v44 = vpop.eup %5798  ;;  %5574 = vrot.lane.b32.xlu1 %v5573_v20, %s5923_s22  ;;  %v5578_v11 = vpack.i.bf16 %v5797_v59, %v5795_v19  ;;  %5808 = vpow2.f32 %v2753_v56  ;;  %v2755_v29 = vmul.f32 1.442695, %v2727_v30  ;;  %5451 = vmatpush3.bf16.msra.mxu0 %v5636_v7 }
 0x9e4   :  { %v5801_v49 = vpop.eup %5800  ;;  %v2757_v39 = vmul.f32 1.442695, %v2728_v54  ;;  %v2729_v1 = vsub.f32 0.0, %v2713_v37  ;;  %v2730_v15 = vsub.f32 0.0, %v2714_v28  ;;  %5452 = vmatprep.subr.bf16.mxu0 %v5637_v27 }
 0x9e5   :  { %5579 = vrot.lane.b32.xlu0 %v5578_v11, %s5923_s22  ;;  %v5583_v12 = vpack.i.bf16 %v5801_v49, %v5799_v44  ;;  %5810 = vpow2.f32 %v2755_v29 }
 0x9e6   :  { %5812 = vpow2.f32 %v2757_v39  ;;  %v2759_v35 = vmul.f32 1.442695, %v2729_v1  ;;  %v2761_v60 = vmul.f32 1.442695, %v2730_v15 }
 0x9e7   :  { %5584 = vrot.lane.b32.xlu1 %v5583_v12, %s5923_s22  ;;  %5453 = vmatpush3.bf16.msra.mxu0 %v5637_v27 }
 0x9e8   :  { %v5803_v5 = vpop.eup %5802  ;;  %5814 = vpow2.f32 %v2759_v35 }
 0x9e9   :  { %v5805_v38 = vpop.eup %5804  ;;  %5816 = vpow2.f32 %v2761_v60 }
 0x9ea   :  { %v5588_v24 = vpack.i.bf16 %v5805_v38, %v5803_v5 }
 0x9ec   :  { %v5807_v8 = vpop.eup %5806  ;;  %5589 = vrot.lane.b32.xlu0 %v5588_v24, %s5923_s22 }
 0x9ed   :  { %v5809_v40 = vpop.eup %5808 }
 0x9ee   :  { %v5593_v23 = vpack.i.bf16 %v5809_v40, %v5807_v8 }
 0x9ef   :  { %v5811_v3 = vpop.eup %5810 }
 0x9f0   :  { %v5813_v48 = vpop.eup %5812  ;;  %5594 = vrot.lane.b32.xlu1 %v5593_v23, %s5923_s22 }
 0x9f1   :  { %v5598_v62 = vpack.i.bf16 %v5813_v48, %v5811_v3 }
 0x9f2   :  { %v5815_v2 = vpop.eup %5814 }
 0x9f3   :  { %v5817_v42 = vpop.eup %5816  ;;  %5599 = vrot.lane.b32.xlu0 %v5598_v62, %s5923_s22 }
 0x9f4   :  { %v5603_v25 = vpack.i.bf16 %v5817_v42, %v5815_v2 }
 0x9f6   :  { %5604 = vrot.lane.b32.xlu1 %v5603_v25, %s5923_s22 }
 0xa53   :  { %v5570_v32 = vpop.permute.xlu0 %5569 }
 0xa54   :  { %v5572_v34 = vunpack.i.h.bf16 %v5570_v32  ;;  %v5571_v19 = vunpack.i.l.bf16 %v5570_v32 }
 0xa55   :  { %v5575_v20 = vpop.permute.xlu1 %5574 }
 0xa56   :  { %v2828_v56 = vsel %vm307_vm0, %v6043_v50, %v5572_v34  ;;  %v2827_v30 = vsel %vm307_vm0, %v6037_v41, %v5571_v19  ;;  %v5577_v59 = vunpack.i.h.bf16 %v5575_v20  ;;  %v5576_v54 = vunpack.i.l.bf16 %v5575_v20 }
 0xa57   :  { %v5580_v37 = vpop.permute.xlu0 %5579  ;;  %v2843_v28 = vpack.c.bf16 %v2828_v56, %v2827_v30 }
 0xa58   :  { %v2830_v44 = vsel %vm307_vm0, %v6050_v57, %v5577_v59  ;;  %v2829_v11 = vsel %vm307_vm0, %v6046_v52, %v5576_v54  ;;  %v5582_v29 = vunpack.i.h.bf16 %v5580_v37  ;;  %v5581_v49 = vunpack.i.l.bf16 %v5580_v37 }
 0xa59   :  { %v2844_v39 = vpack.c.bf16 %v2830_v44, %v2829_v11  ;;  %5434 = vmatprep.mubr.msk.bf16.mxu1 %vm517_vm5, %v2843_v28  ;;  %v5585_v1 = vpop.permute.xlu1 %5584 }
 0xa5a   :  { %v2832_v50 = vsel %vm307_vm0, %v6053_v61, %v5582_v29  ;;  %v2831_v41 = vsel %vm307_vm0, %v6040_v45, %v5581_v49  ;;  %v5587_v15 = vunpack.i.h.bf16 %v5585_v1  ;;  %v5586_v12 = vunpack.i.l.bf16 %v5585_v1 }
 0xa5b   :  { %5435 = vmatmul.mubr.msk.bf16.vlgmr.msra.gmra.mrb[24].mxu1 %vm517_vm5, %v2844_v39  ;;  %v2845_v57 = vpack.c.bf16 %v2832_v50, %v2831_v41 }
 0xa5c   :  { %v2834_v52 = vsel %vm307_vm0, %v6062_v4, %v5587_v15  ;;  %v2833_v35 = vsel %vm307_vm0, %v6058_v63, %v5586_v12 }
 0xa5d   :  { %5438 = vmatprep.mubr.msk.bf16.mxu1 %vm517_vm5, %v2845_v57  ;;  %v2846_v24 = vpack.c.bf16 %v2834_v52, %v2833_v35 }
 0xa5e   :  { %v5590_v60 = vpop.permute.xlu0 %5589 }
 0xa5f   :  { %v5592_v5 = vunpack.i.h.bf16 %v5590_v60  ;;  %v5591_v38 = vunpack.i.l.bf16 %v5590_v60 }
 0xa61   :  { %v2836_v61 = vsel %vm307_vm0, %v6070_v14, %v5592_v5  ;;  %v2835_v45 = vsel %vm307_vm0, %v6066_v9, %v5591_v38 }
 0xa62   :  { %v5595_v8 = vpop.permute.xlu1 %5594  ;;  %v2847_v40 = vpack.c.bf16 %v2836_v61, %v2835_v45 }
 0xa63   :  { %v5597_v23 = vunpack.i.h.bf16 %v5595_v8  ;;  %v5596_v3 = vunpack.i.l.bf16 %v5595_v8  ;;  %5439 = vmatmul.mubr.msk.bf16.gmra.mrb[28].mxu1 %vm517_vm5, %v2846_v24 }
 0xa64   :  { %5442 = vmatprep.mubr.msk.bf16.mxu1 %vm517_vm5, %v2847_v40 }
 0xa65   :  { %v5600_v4 = vpop.permute.xlu0 %5599  ;;  %v2838_v63 = vsel %vm307_vm0, %v6077_v16, %v5597_v23  ;;  %v2837_v48 = vsel %vm307_vm0, %v6074_v6, %v5596_v3 }
 0xa66   :  { %v5602_v14 = vunpack.i.h.bf16 %v5600_v4  ;;  %v5601_v62 = vunpack.i.l.bf16 %v5600_v4  ;;  %v2848_v7 = vpack.c.bf16 %v2838_v63, %v2837_v48 }
 0xa68   :  { %v2840_v9 = vsel %vm307_vm0, %v6082_v18, %v5602_v14  ;;  %v2839_v2 = vsel %vm307_vm0, %v6080_v17, %v5601_v62  ;;  %v5605_v42 = vpop.permute.xlu1 %5604  ;;  %v5638_v17 = vld [vmem:[%s7644_s1 + $0x98] sm:$0xff]   ;;  %v5639_v18 = vld [vmem:[%s7644_s1 + $0xa0] sm:$0xff]  }
 0xa69   :  { %v5607_v27 = vunpack.i.h.bf16 %v5605_v42  ;;  %v5606_v25 = vunpack.i.l.bf16 %v5605_v42  ;;  %v2849_v32 = vpack.c.bf16 %v2840_v9, %v2839_v2  ;;  %5454 = vmatprep.subr.bf16.mxu0 %v5638_v17 }
 0xa6a   :  { %5455 = vmatpush3.bf16.msra.mxu0 %v5638_v17 }
 0xa6b   :  { %5443 = vmatmul.mubr.msk.bf16.gmra.mrb[32].mxu1 %vm517_vm5, %v2848_v7  ;;  %v2842_v6 = vsel %vm307_vm0, %v6091_v22, %v5607_v27  ;;  %v2841_v16 = vsel %vm307_vm0, %v6088_v21, %v5606_v25  ;;  %5456 = vmatprep.subr.bf16.mxu0 %v5639_v18  ;;  %v5640_v21 = vld [vmem:[%s7644_s1 + $0xa8] sm:$0xff]   ;;  %v5641_v22 = vld [vmem:[%s7644_s1 + $0xb0] sm:$0xff]  }
 0xa6c   :  { %5446 = vmatprep.mubr.msk.bf16.mxu1 %vm517_vm5, %v2849_v32  ;;  %v2850_v34 = vpack.c.bf16 %v2842_v6, %v2841_v16  ;;  %5474 = vmatprep.subr.bf16.mxu1 %v5640_v21 }
 0xa6d   :  { %5475 = vmatpush3.bf16.msra.mxu1 %v5640_v21 }
 0xa6e   :  { %5457 = vmatpush3.bf16.msra.mxu0 %v5639_v18  ;;  %5476 = vmatprep.subr.bf16.mxu1 %v5641_v22 }
 0xa6f   :  { %5494 = vmatprep.subr.bf16.mxu0 %v7733_v0 }
 0xa71   :  { %5477 = vmatpush3.bf16.msra.mxu1 %v5641_v22 }
 0xa72   :  { %5506 = vmatprep.subr.bf16.mxu1 %v7733_v0 }
 0xa73   :  { %5447 = vmatmul.mubr.msk.bf16.gmra.mrb[36].mxu1 %vm517_vm5, %v2850_v34 }
 0xb2e   :  { %v5436_v19 = vpop.f32.mrb[24].mxu1 }
 0xb2f   :  { %v3022_v20 = vmul.f32 0.01, %v5436_v19  ;;  %v2941_v56 = vpop.f32.mrb[25].mxu1  ;;  %vm3006_vm9 = vcmp.gt.f32.partialorder %v5436_v19, 0.0 }
 0xb30   :  { %v3020_v30 = vmul.f32 0.01, %v2941_v56  ;;  %v5437_v59 = vpop.f32.mrb[26].mxu1  ;;  %vm3004_vm10 = vcmp.gt.f32.partialorder %v2941_v56, 0.0 }
 0xb31   :  { %vm3007_vm7 = vcmp.gt.f32.partialorder %v5437_v59, 0.0  ;;  %v3023_v54 = vmul.f32 0.01, %v5437_v59  ;;  %v2944_v37 = vpop.f32.mrb[27].mxu1  ;;  %v3038_v44 = vsel %vm3006_vm9, %v5436_v19, %v3022_v20 }
 0xb32   :  { %vm3005_vm8 = vcmp.gt.f32.partialorder %v2944_v37, 0.0  ;;  %v3021_v28 = vmul.f32 0.01, %v2944_v37  ;;  %v3036_v29 = vsel %vm3004_vm10, %v2941_v56, %v3020_v30 }
 0xb33   :  { %v3039_v11 = vsel %vm3007_vm7, %v5437_v59, %v3023_v54 }
 0xb34   :  { %v3053_v49 = vpack.c.bf16 %v3039_v11, %v3038_v44  ;;  %v3037_v39 = vsel %vm3005_vm8, %v2944_v37, %v3021_v28 }
 0xb35   :  { %v3052_v1 = vpack.c.bf16 %v3037_v39, %v3036_v29 }
 0xb36   :  { %v5440_v50 = vpop.f32.mrb[28].mxu1 }
 0xb37   :  { %v3026_v41 = vmul.f32 0.01, %v5440_v50  ;;  %v2957_v15 = vpop.f32.mrb[29].mxu1  ;;  %5458 = vmatprep.mubr.msk.bf16.mxu0 %vm517_vm5, %v3052_v1  ;;  %vm3010_vm3 = vcmp.gt.f32.partialorder %v5440_v50, 0.0 }
 0xb38   :  { %v3024_v12 = vmul.f32 0.01, %v2957_v15  ;;  %v5441_v57 = vpop.f32.mrb[30].mxu1  ;;  %5459 = vmatmul.mubr.msk.bf16.vlgmr.msra.gmra.mrb[36].mxu0 %vm517_vm5, %v3053_v49  ;;  %vm3008_vm4 = vcmp.gt.f32.partialorder %v2957_v15, 0.0 }
 0xb39   :  { %vm3011_vm2 = vcmp.gt.f32.partialorder %v5441_v57, 0.0  ;;  %v3027_v52 = vmul.f32 0.01, %v5441_v57  ;;  %v2960_v35 = vpop.f32.mrb[31].mxu1  ;;  %v3042_v5 = vsel %vm3010_vm3, %v5440_v50, %v3026_v41 }
 0xb3a   :  { %vm3009_vm9 = vcmp.gt.f32.partialorder %v2960_v35, 0.0  ;;  %v3025_v60 = vmul.f32 0.01, %v2960_v35  ;;  %v3040_v61 = vsel %vm3008_vm4, %v2957_v15, %v3024_v12 }
 0xb3b   :  { %v3043_v38 = vsel %vm3011_vm2, %v5441_v57, %v3027_v52 }
 0xb3c   :  { %v3055_v45 = vpack.c.bf16 %v3043_v38, %v3042_v5  ;;  %v3041_v24 = vsel %vm3009_vm9, %v2960_v35, %v3025_v60 }
 0xb3d   :  { %v3054_v8 = vpack.c.bf16 %v3041_v24, %v3040_v61 }
 0xb3e   :  { %v5444_v40 = vpop.f32.mrb[32].mxu1 }
 0xb3f   :  { %v3030_v23 = vmul.f32 0.01, %v5444_v40  ;;  %v2973_v3 = vpop.f32.mrb[33].mxu1  ;;  %5462 = vmatprep.mubr.msk.bf16.mxu0 %vm517_vm5, %v3054_v8  ;;  %vm3014_vm10 = vcmp.gt.f32.partialorder %v5444_v40, 0.0 }
 0xb40   :  { %v3028_v4 = vmul.f32 0.01, %v2973_v3  ;;  %v5445_v63 = vpop.f32.mrb[34].mxu1  ;;  %5463 = vmatmul.mubr.msk.bf16.gmra.mrb[40].mxu0 %vm517_vm5, %v3055_v45  ;;  %vm3012_vm7 = vcmp.gt.f32.partialorder %v2973_v3, 0.0 }
 0xb41   :  { %vm3015_vm8 = vcmp.gt.f32.partialorder %v5445_v63, 0.0  ;;  %v3031_v48 = vmul.f32 0.01, %v5445_v63  ;;  %v2976_v14 = vpop.f32.mrb[35].mxu1  ;;  %v3046_v9 = vsel %vm3014_vm10, %v5444_v40, %v3030_v23 }
 0xb42   :  { %vm3013_vm3 = vcmp.gt.f32.partialorder %v2976_v14, 0.0  ;;  %v3029_v62 = vmul.f32 0.01, %v2976_v14  ;;  %v3044_v42 = vsel %vm3012_vm7, %v2973_v3, %v3028_v4 }
 0xb43   :  { %v3047_v2 = vsel %vm3015_vm8, %v5445_v63, %v3031_v48 }
 0xb44   :  { %v3057_v7 = vpack.c.bf16 %v3047_v2, %v3046_v9  ;;  %v3045_v27 = vsel %vm3013_vm3, %v2976_v14, %v3029_v62 }
 0xb45   :  { %v3056_v25 = vpack.c.bf16 %v3045_v27, %v3044_v42 }
 0xb46   :  { %v5448_v32 = vpop.f32.mrb[36].mxu1 }
 0xb47   :  { %v3034_v6 = vmul.f32 0.01, %v5448_v32  ;;  %v2989_v16 = vpop.f32.mrb[37].mxu1  ;;  %5466 = vmatprep.mubr.msk.bf16.mxu0 %vm517_vm5, %v3056_v25  ;;  %vm3018_vm2 = vcmp.gt.f32.partialorder %v5448_v32, 0.0 }
 0xb48   :  { %v3032_v34 = vmul.f32 0.01, %v2989_v16  ;;  %v5449_v17 = vpop.f32.mrb[38].mxu1  ;;  %5467 = vmatmul.mubr.msk.bf16.gmra.mrb[44].mxu0 %vm517_vm5, %v3057_v7  ;;  %vm3016_vm4 = vcmp.gt.f32.partialorder %v2989_v16, 0.0 }
 0xb49   :  { %vm3019_vm9 = vcmp.gt.f32.partialorder %v5449_v17, 0.0  ;;  %v3035_v18 = vmul.f32 0.01, %v5449_v17  ;;  %v2992_v21 = vpop.f32.mrb[39].mxu1  ;;  %v3050_v19 = vsel %vm3018_vm2, %v5448_v32, %v3034_v6 }
 0xb4a   :  { %vm3017_vm10 = vcmp.gt.f32.partialorder %v2992_v21, 0.0  ;;  %v3033_v22 = vmul.f32 0.01, %v2992_v21  ;;  %v3048_v56 = vsel %vm3016_vm4, %v2989_v16, %v3032_v34 }
 0xb4b   :  { %v3051_v20 = vsel %vm3019_vm9, %v5449_v17, %v3035_v18 }
 0xb4c   :  { %v3059_v30 = vpack.c.bf16 %v3051_v20, %v3050_v19  ;;  %v3049_v59 = vsel %vm3017_vm10, %v2992_v21, %v3033_v22 }
 0xb4d   :  { %v3058_v54 = vpack.c.bf16 %v3049_v59, %v3048_v56 }
 0xb4f   :  { %5470 = vmatprep.mubr.msk.bf16.mxu0 %vm517_vm5, %v3058_v54 }
 0xb50   :  { %5471 = vmatmul.mubr.msk.bf16.gmra.mrb[48].mxu0 %vm517_vm5, %v3059_v30 }
 0xb51   :  { %5496 = vmatprep.mubr.msk.bf16.mxu0 %vm5922_vm6, %v7733_v0 }
 0xc0b   :  { %v5460_v37 = vpop.f32.mrb[36].mxu0 }
 0xc0c   :  { %v3231_v28 = vmul.f32 0.01, %v5460_v37  ;;  %v3150_v44 = vpop.f32.mrb[37].mxu0  ;;  %vm3215_vm7 = vcmp.gt.f32.partialorder %v5460_v37, 0.0 }
 0xc0d   :  { %v3229_v11 = vmul.f32 0.01, %v3150_v44  ;;  %v5461_v29 = vpop.f32.mrb[38].mxu0  ;;  %vm3213_vm8 = vcmp.gt.f32.partialorder %v3150_v44, 0.0 }
 0xc0e   :  { %vm3216_vm3 = vcmp.gt.f32.partialorder %v5461_v29, 0.0  ;;  %v3232_v49 = vmul.f32 0.01, %v5461_v29  ;;  %v3153_v39 = vpop.f32.mrb[39].mxu0  ;;  %v3247_v50 = vsel %vm3215_vm7, %v5460_v37, %v3231_v28 }
 0xc0f   :  { %vm3214_vm2 = vcmp.gt.f32.partialorder %v3153_v39, 0.0  ;;  %v3230_v1 = vmul.f32 0.01, %v3153_v39  ;;  %v3245_v15 = vsel %vm3213_vm8, %v3150_v44, %v3229_v11 }
 0xc10   :  { %v3248_v41 = vsel %vm3216_vm3, %v5461_v29, %v3232_v49 }
 0xc11   :  { %v3262_v12 = vpack.c.bf16 %v3248_v41, %v3247_v50  ;;  %v3246_v57 = vsel %vm3214_vm2, %v3153_v39, %v3230_v1  ;;  %v3456_v39 = vld [vmem:[%s7644_s1 + $0xbc] sm:$0x1]  ;;  %v3454_v50 = vld [vmem:[%s7644_s1 + $0xb8] sm:$0x1] }
 0xc12   :  { %v3261_v52 = vpack.c.bf16 %v3246_v57, %v3245_v15  ;;  %v3457_v1 = vunpack.c.l.bf16 %v3456_v39  ;;  %v3455_v41 = vunpack.c.l.bf16 %v3454_v50 }
 0xc13   :  { %v5464_v35 = vpop.f32.mrb[40].mxu0 }
 0xc14   :  { %v3235_v60 = vmul.f32 0.01, %v5464_v35  ;;  %v3166_v5 = vpop.f32.mrb[41].mxu0  ;;  %5478 = vmatprep.mubr.msk.bf16.mxu1 %vm307_vm0, %v3261_v52  ;;  %vm3219_vm4 = vcmp.gt.f32.partialorder %v5464_v35, 0.0  ;;  %5552 = vpush %v3457_v1 }
 0xc15   :  { %v3233_v38 = vmul.f32 0.01, %v3166_v5  ;;  %v5465_v61 = vpop.f32.mrb[42].mxu0  ;;  %5479 = vmatmul.mubr.msk.bf16.vlgmr.msra.gmra.mrb[40].mxu1 %vm307_vm0, %v3262_v12  ;;  %vm3217_vm9 = vcmp.gt.f32.partialorder %v3166_v5, 0.0  ;;  %v6926_v12 = vrot.slane %v3455_v41, %v5975_v13 }
 0xc16   :  { %vm3220_vm10 = vcmp.gt.f32.partialorder %v5465_v61, 0.0  ;;  %v3236_v45 = vmul.f32 0.01, %v5465_v61  ;;  %v3169_v24 = vpop.f32.mrb[43].mxu0  ;;  %v3251_v40 = vsel %vm3219_vm4, %v5464_v35, %v3235_v60 }
 0xc17   :  { %vm3218_vm7 = vcmp.gt.f32.partialorder %v3169_v24, 0.0  ;;  %v3234_v8 = vmul.f32 0.01, %v3169_v24  ;;  %v3249_v3 = vsel %vm3217_vm9, %v3166_v5, %v3233_v38 }
 0xc18   :  { %v3252_v23 = vsel %vm3220_vm10, %v5465_v61, %v3236_v45 }
 0xc19   :  { %v3264_v4 = vpack.c.bf16 %v3252_v23, %v3251_v40  ;;  %v3250_v63 = vsel %vm3218_vm7, %v3169_v24, %v3234_v8 }
 0xc1a   :  { %v3263_v48 = vpack.c.bf16 %v3250_v63, %v3249_v3 }
 0xc1b   :  { %v5468_v14 = vpop.f32.mrb[44].mxu0 }
 0xc1c   :  { %v3239_v62 = vmul.f32 0.01, %v5468_v14  ;;  %v3182_v9 = vpop.f32.mrb[45].mxu0  ;;  %5482 = vmatprep.mubr.msk.bf16.mxu1 %vm307_vm0, %v3263_v48  ;;  %vm3223_vm8 = vcmp.gt.f32.partialorder %v5468_v14, 0.0 }
 0xc1d   :  { %v3237_v2 = vmul.f32 0.01, %v3182_v9  ;;  %v5469_v42 = vpop.f32.mrb[46].mxu0  ;;  %5483 = vmatmul.mubr.msk.bf16.gmra.mrb[44].mxu1 %vm307_vm0, %v3264_v4  ;;  %vm3221_vm3 = vcmp.gt.f32.partialorder %v3182_v9, 0.0 }
 0xc1e   :  { %vm3224_vm2 = vcmp.gt.f32.partialorder %v5469_v42, 0.0  ;;  %v3240_v7 = vmul.f32 0.01, %v5469_v42  ;;  %v3185_v27 = vpop.f32.mrb[47].mxu0  ;;  %v3255_v32 = vsel %vm3223_vm8, %v5468_v14, %v3239_v62 }
 0xc1f   :  { %vm3222_vm4 = vcmp.gt.f32.partialorder %v3185_v27, 0.0  ;;  %v3238_v25 = vmul.f32 0.01, %v3185_v27  ;;  %v3253_v16 = vsel %vm3221_vm3, %v3182_v9, %v3237_v2 }
 0xc20   :  { %v3256_v6 = vsel %vm3224_vm2, %v5469_v42, %v3240_v7 }
 0xc21   :  { %v3266_v34 = vpack.c.bf16 %v3256_v6, %v3255_v32  ;;  %v3254_v17 = vsel %vm3222_vm4, %v3185_v27, %v3238_v25 }
 0xc22   :  { %v3265_v18 = vpack.c.bf16 %v3254_v17, %v3253_v16 }
 0xc23   :  { %v5472_v21 = vpop.f32.mrb[48].mxu0 }
 0xc24   :  { %v3243_v22 = vmul.f32 0.01, %v5472_v21  ;;  %v3198_v19 = vpop.f32.mrb[49].mxu0  ;;  %5486 = vmatprep.mubr.msk.bf16.mxu1 %vm307_vm0, %v3265_v18  ;;  %vm3227_vm9 = vcmp.gt.f32.partialorder %v5472_v21, 0.0 }
 0xc25   :  { %v3241_v20 = vmul.f32 0.01, %v3198_v19  ;;  %v5473_v56 = vpop.f32.mrb[50].mxu0  ;;  %5487 = vmatmul.mubr.msk.bf16.gmra.mrb[48].mxu1 %vm307_vm0, %v3266_v34  ;;  %vm3225_vm10 = vcmp.gt.f32.partialorder %v3198_v19, 0.0 }
 0xc26   :  { %vm3228_vm7 = vcmp.gt.f32.partialorder %v5473_v56, 0.0  ;;  %v3244_v30 = vmul.f32 0.01, %v5473_v56  ;;  %v3201_v59 = vpop.f32.mrb[51].mxu0  ;;  %v3259_v37 = vsel %vm3227_vm9, %v5472_v21, %v3243_v22 }
 0xc27   :  { %vm3226_vm8 = vcmp.gt.f32.partialorder %v3201_v59, 0.0  ;;  %v3242_v54 = vmul.f32 0.01, %v3201_v59  ;;  %v3257_v44 = vsel %vm3225_vm10, %v3198_v19, %v3241_v20 }
 0xc28   :  { %v3260_v28 = vsel %vm3228_vm7, %v5473_v56, %v3244_v30 }
 0xc29   :  { %v3268_v11 = vpack.c.bf16 %v3260_v28, %v3259_v37  ;;  %v3258_v29 = vsel %vm3226_vm8, %v3201_v59, %v3242_v54 }
 0xc2a   :  { %v3267_v49 = vpack.c.bf16 %v3258_v29, %v3257_v44 }
 0xc2c   :  { %5490 = vmatprep.mubr.msk.bf16.mxu1 %vm307_vm0, %v3267_v49 }
 0xc2d   :  { %5491 = vmatmul.mubr.msk.bf16.gmra.mrb[52].mxu1 %vm307_vm0, %v3268_v11 }
 0xc2e   :  { %5522 = vmatprep.mubr.msk.bf16.mxu1 %vm5922_vm6, %v7733_v0 }
 0xc45   :  { %s5553_s20 = spop %5552 }
 0xce8   :  { %v5480_v15 = vpop.f32.mrb[40].mxu1 }
 0xce9   :  { %vm3408_vm3 = vcmp.gt.f32.partialorder %v5480_v15, 0.0  ;;  %v3424_v57 = vmul.f32 0.01, %v5480_v15  ;;  %v3343_v52 = vpop.f32.mrb[41].mxu1 }
 0xcea   :  { %vm3406_vm2 = vcmp.gt.f32.partialorder %v3343_v52, 0.0  ;;  %v3422_v35 = vmul.f32 0.01, %v3343_v52  ;;  %v5481_v60 = vpop.f32.mrb[42].mxu1 }
 0xceb   :  { %v3440_v5 = vsel %vm3408_vm3, %v5480_v15, %v3424_v57  ;;  %vm3409_vm4 = vcmp.gt.f32.partialorder %v5481_v60, 0.0  ;;  %v3425_v38 = vmul.f32 0.01, %v5481_v60  ;;  %v3346_v61 = vpop.f32.mrb[43].mxu1 }
 0xcec   :  { %v3438_v45 = vsel %vm3406_vm2, %v3343_v52, %v3422_v35  ;;  %vm3407_vm9 = vcmp.gt.f32.partialorder %v3346_v61, 0.0  ;;  %v3423_v24 = vmul.f32 0.01, %v3346_v61  ;;  %v3464_v8 = vmul.f32 %v6926_v12, %v3440_v5 }
 0xced   :  { %v3441_v40 = vsel %vm3409_vm4, %v5481_v60, %v3425_v38  ;;  %v3462_v4 = vmul.f32 %v6926_v12, %v3438_v45 }
 0xcee   :  { %v3439_v23 = vsel %vm3407_vm9, %v3346_v61, %v3423_v24  ;;  %v3484_v3 = vsel %vm307_vm0, %v3464_v8, 0.0  ;;  %v3465_v2 = vmul.f32 %v6926_v12, %v3441_v40 }
 0xcef   :  { %3485 = vadd.xlane.f32.xlu0 %v3484_v3  ;;  %v3463_v63 = vmul.f32 %v6926_v12, %v3439_v23  ;;  %v3478_v27 = vsel %vm307_vm0, %v3462_v4, 0.0 }
 0xcf0   :  { %v5484_v48 = vpop.f32.mrb[44].mxu1  ;;  %v3487_v17 = vsel %vm307_vm0, %v3465_v2, 0.0 }
 0xcf1   :  { %vm3412_vm10 = vcmp.gt.f32.partialorder %v5484_v48, 0.0  ;;  %v3428_v14 = vmul.f32 0.01, %v5484_v48  ;;  %v3359_v62 = vpop.f32.mrb[45].mxu1  ;;  %v3481_v9 = vsel %vm307_vm0, %v3463_v63, 0.0 }
 0xcf2   :  { %v3426_v42 = vmul.f32 0.01, %v3359_v62  ;;  %3482 = vadd.xlane.f32.xlu1 %v3481_v9  ;;  %v5485_v7 = vpop.f32.mrb[46].mxu1  ;;  %vm3410_vm7 = vcmp.gt.f32.partialorder %v3359_v62, 0.0 }
 0xcf3   :  { %v3444_v25 = vsel %vm3412_vm10, %v5484_v48, %v3428_v14  ;;  %vm3413_vm8 = vcmp.gt.f32.partialorder %v5485_v7, 0.0  ;;  %v3429_v32 = vmul.f32 0.01, %v5485_v7  ;;  %3479 = vadd.xlane.f32.xlu0 %v3478_v27  ;;  %v3362_v6 = vpop.f32.mrb[47].mxu1 }
 0xcf4   :  { %vm3411_vm3 = vcmp.gt.f32.partialorder %v3362_v6, 0.0  ;;  %v3427_v16 = vmul.f32 0.01, %v3362_v6  ;;  %v3442_v18 = vsel %vm3410_vm7, %v3359_v62, %v3426_v42  ;;  %v3468_v19 = vmul.f32 %v6926_v12, %v3444_v25 }
 0xcf5   :  { %v3445_v34 = vsel %vm3413_vm8, %v5485_v7, %v3429_v32  ;;  %v3466_v37 = vmul.f32 %v6926_v12, %v3442_v18 }
 0xcf6   :  { %v3443_v21 = vsel %vm3411_vm3, %v3362_v6, %v3427_v16  ;;  %v3469_v22 = vmul.f32 %v6926_v12, %v3445_v34  ;;  %v3496_v11 = vsel %vm307_vm0, %v3468_v19, 0.0 }
 0xcf7   :  { %3488 = vadd.xlane.f32.xlu0 %v3487_v17  ;;  %v3467_v30 = vmul.f32 %v6926_v12, %v3443_v21  ;;  %v3490_v15 = vsel %vm307_vm0, %v3466_v37, 0.0  ;;  %v3528_v21 = vstv %s5553_s20 }
 0xcf8   :  { %v5488_v20 = vpop.f32.mrb[48].mxu1  ;;  %v3499_v56 = vsel %vm307_vm0, %v3469_v22, 0.0 }
 0xcf9   :  { %vm3416_vm2 = vcmp.gt.f32.partialorder %v5488_v20, 0.0  ;;  %v3432_v59 = vmul.f32 0.01, %v5488_v20  ;;  %3500 = vadd.xlane.f32.xlu1 %v3499_v56  ;;  %v3375_v54 = vpop.f32.mrb[49].mxu1  ;;  %v3493_v50 = vsel %vm307_vm0, %v3467_v30, 0.0 }
 0xcfa   :  { %v3430_v28 = vmul.f32 0.01, %v3375_v54  ;;  %v5489_v44 = vpop.f32.mrb[50].mxu1  ;;  %vm3414_vm4 = vcmp.gt.f32.partialorder %v3375_v54, 0.0 }
 0xcfb   :  { %v3448_v29 = vsel %vm3416_vm2, %v5488_v20, %v3432_v59  ;;  %vm3417_vm9 = vcmp.gt.f32.partialorder %v5489_v44, 0.0  ;;  %v3433_v49 = vmul.f32 0.01, %v5489_v44  ;;  %3497 = vadd.xlane.f32.xlu0 %v3496_v11  ;;  %v3378_v39 = vpop.f32.mrb[51].mxu1 }
 0xcfc   :  { %vm3415_vm10 = vcmp.gt.f32.partialorder %v3378_v39, 0.0  ;;  %v3431_v1 = vmul.f32 0.01, %v3378_v39  ;;  %v3446_v57 = vsel %vm3414_vm4, %v3375_v54, %v3430_v28  ;;  %v3472_v60 = vmul.f32 %v6926_v12, %v3448_v29  ;;  %v7735_v29 = vld [vmem:[#allocation5_spill] sm:$0xff] }
 0xcfd   :  { %v3449_v41 = vsel %vm3417_vm9, %v5489_v44, %v3433_v49  ;;  %3494 = vadd.xlane.f32.xlu1 %v3493_v50  ;;  %v3470_v24 = vmul.f32 %v6926_v12, %v3446_v57  ;;  %vm7741_vm4 = vcmask 1047559   ;;  %vm7742_vm9 = vcmask 64512  }
 0xcfe   :  { %v3447_v52 = vsel %vm3415_vm10, %v3378_v39, %v3431_v1  ;;  %v3473_v35 = vmul.f32 %v6926_v12, %v3449_v41  ;;  %v3508_v23 = vsel %vm307_vm0, %v3472_v60, 0.0  ;;  %v7736_v41 = vld [vmem:[#allocation4_spill] sm:$0xff]  ;;  %vm7743_vm10 = vmmov %vm7741_vm4 }
 0xcff   :  { %3491 = vadd.xlane.f32.xlu0 %v3490_v15  ;;  %v3471_v61 = vmul.f32 %v6926_v12, %v3447_v52  ;;  %v3502_v42 = vsel %vm307_vm0, %v3470_v24, 0.0  ;;  %v7737_v52 = vld [vmem:[#allocation9_spill] sm:$0xff] }
 0xd00   :  { %v5492_v5 = vpop.f32.mrb[52].mxu1  ;;  %v3511_v38 = vsel %vm307_vm0, %v3473_v35, 0.0 }
 0xd01   :  { %3512 = vadd.xlane.f32.xlu1 %v3511_v38  ;;  %v3391_v45 = vpop.f32.mrb[53].mxu1  ;;  %vm3420_vm7 = vcmp.gt.f32.partialorder %v5492_v5, 0.0  ;;  %v3436_v3 = vmul.f32 0.01, %v5492_v5  ;;  %v3505_v62 = vsel %vm307_vm0, %v3471_v61, 0.0  ;;  %v7738_v61 = vld [vmem:[#allocation10_spill] sm:$0xff] }
 0xd02   :  { %vm3418_vm8 = vcmp.gt.f32.partialorder %v3391_v45, 0.0  ;;  %v3434_v8 = vmul.f32 0.01, %v3391_v45  ;;  %v5493_v40 = vpop.f32.mrb[54].mxu1 }
 0xd03   :  { %vm3421_vm3 = vcmp.gt.f32.partialorder %v5493_v40, 0.0  ;;  %v3437_v4 = vmul.f32 0.01, %v5493_v40  ;;  %3509 = vadd.xlane.f32.xlu0 %v3508_v23  ;;  %v3394_v63 = vpop.f32.mrb[55].mxu1  ;;  %v3452_v27 = vsel %vm3420_vm7, %v5492_v5, %v3436_v3  ;;  %vm7744_vm7 = vmmov %vm7742_vm9 }
 0xd04   :  { %v3450_v48 = vsel %vm3418_vm8, %v3391_v45, %v3434_v8  ;;  %vm3419_vm2 = vcmp.gt.f32.partialorder %v3394_v63, 0.0  ;;  %v3435_v14 = vmul.f32 0.01, %v3394_v63  ;;  %v3476_v34 = vmul.f32 %v6926_v12, %v3452_v27  ;;  %v7739_v8 = vld [vmem:[#allocation8_spill] sm:$0xff]  ;;  %vm7745_vm8 = vmmov %vm7741_vm4 }
 0xd05   :  { %3506 = vadd.xlane.f32.xlu1 %v3505_v62  ;;  %v3453_v9 = vsel %vm3421_vm3, %v5493_v40, %v3437_v4  ;;  %v3474_v7 = vmul.f32 %v6926_v12, %v3450_v48  ;;  %vm7746_vm3 = vmmov %vm7744_vm7 }
 0xd06   :  { %v3451_v2 = vsel %vm3419_vm2, %v3394_v63, %v3435_v14  ;;  %v3477_v6 = vmul.f32 %v6926_v12, %v3453_v9  ;;  %v3520_v18 = vsel %vm307_vm0, %v3476_v34, 0.0  ;;  %v7740_v63 = vld [vmem:[#allocation7_spill] sm:$0xff]  ;;  %vm7747_vm2 = vmmov %vm7741_vm4 }
 0xd07   :  { %3503 = vadd.xlane.f32.xlu0 %v3502_v42  ;;  %v3475_v25 = vmul.f32 %v6926_v12, %v3451_v2  ;;  %v3514_v16 = vsel %vm307_vm0, %v3474_v7, 0.0  ;;  %v7734_v12 = vld [vmem:[#allocation6_spill] sm:$0xff] }
 0xd08   :  { %v3523_v17 = vsel %vm307_vm0, %v3477_v6, 0.0 }
 0xd09   :  { %v3517_v32 = vsel %vm307_vm0, %v3475_v25, 0.0 }
 0xd0a   :  { %3518 = vadd.xlane.f32.xlu1 %v3517_v32 }
 0xd0b   :  { %3515 = vadd.xlane.f32.xlu0 %v3514_v16 }
 0xd0e   :  { %3524 = vadd.xlane.f32.xlu1 %v3523_v17 }
 0xd0f   :  { %3521 = vadd.xlane.f32.xlu0 %v3520_v18 }
 0xd7c   :  { %v3486_v22 = vpop.xlane.xlu0 %3485 }
 0xd7d   :  { %v3532_v19 = vadd.f32 %v3528_v21, %v3486_v22 }
 0xd7f   :  { %v6962_v20 = vsub.f32 %v3532_v19, %v6218_v58  ;;  %v3483_v59 = vpop.xlane.xlu1 %3482 }
 0xd80   :  { %v3480_v56 = vpop.xlane.xlu0 %3479  ;;  %v3531_v11 = vadd.f32 %v3528_v21, %v3483_v59 }
 0xd81   :  { %v3530_v30 = vadd.f32 %v3528_v21, %v3480_v56  ;;  %3585 = vperm.xlu1 %5561, %v6962_v20  }
 0xd82   :  { %v6974_v15 = vsub.f32 %v3531_v11, %v7736_v41 }
 0xd83   :  { %v6966_v54 = vsub.f32 %v3530_v30, %v7734_v12 }
 0xd84   :  { %v3489_v37 = vpop.xlane.xlu0 %3488 }
 0xd85   :  { %v3533_v28 = vadd.f32 %v3528_v21, %v3489_v37  ;;  %3579 = vperm.xlu0 %5562, %v6966_v54  }
 0xd86   :  { %v3501_v44 = vpop.xlane.xlu1 %3500 }
 0xd87   :  { %v6970_v49 = vsub.f32 %v3533_v28, %v7735_v29  ;;  %v3537_v57 = vadd.f32 %v3528_v21, %v3501_v44 }
 0xd88   :  { %v3498_v39 = vpop.xlane.xlu0 %3497 }
 0xd89   :  { %v3536_v1 = vadd.f32 %v3528_v21, %v3498_v39  ;;  %3588 = vperm.xlu1 %5561, %v6970_v49   ;;  %v6982_v45 = vsub.f32 %v3537_v57, %v7738_v61 }
 0xd8a   :  { %v3495_v50 = vpop.xlane.xlu1 %3494 }
 0xd8b   :  { %v6977_v35 = vsub.f32 %v3536_v1, %v7737_v52  ;;  %v3535_v24 = vadd.f32 %v3528_v21, %v3495_v50 }
 0xd8c   :  { %v3492_v60 = vpop.xlane.xlu0 %3491 }
 0xd8d   :  { %v3534_v5 = vadd.f32 %v3528_v21, %v3492_v60  ;;  %3597 = vperm.xlu0 %5562, %v6977_v35   ;;  %3582 = vperm.xlu1 %5561, %v6974_v15   ;;  %v6990_v48 = vsub.f32 %v3535_v24, %v7740_v63 }
 0xd8e   :  { %v3513_v38 = vpop.xlane.xlu1 %3512 }
 0xd8f   :  { %v6985_v40 = vsub.f32 %v3534_v5, %v7739_v8  ;;  %v3541_v14 = vadd.f32 %v3528_v21, %v3513_v38 }
 0xd90   :  { %v3510_v23 = vpop.xlane.xlu0 %3509 }
 0xd91   :  { %v3540_v3 = vadd.f32 %v3528_v21, %v3510_v23  ;;  %3591 = vperm.xlu0 %5562, %v6985_v40   ;;  %3600 = vperm.xlu1 %5561, %v6982_v45   ;;  %v6998_v42 = vsub.f32 %v3541_v14, %v7735_v29 }
 0xd92   :  { %v3507_v4 = vpop.xlane.xlu1 %3506 }
 0xd93   :  { %v6993_v62 = vsub.f32 %v3540_v3, %v6218_v58  ;;  %v3539_v7 = vadd.f32 %v3528_v21, %v3507_v4 }
 0xd94   :  { %v3504_v9 = vpop.xlane.xlu0 %3503 }
 0xd95   :  { %v3538_v2 = vadd.f32 %v3528_v21, %v3504_v9  ;;  %3609 = vperm.xlu0 %5562, %v6993_v62   ;;  %3594 = vperm.xlu1 %5561, %v6990_v48   ;;  %v7006_v58 = vsub.f32 %v3539_v7, %v7736_v41 }
 0xd97   :  { %v7001_v27 = vsub.f32 %v3538_v2, %v7734_v12  ;;  %v3519_v25 = vpop.xlane.xlu1 %3518 }
 0xd98   :  { %v3516_v32 = vpop.xlane.xlu0 %3515  ;;  %v3543_v16 = vadd.f32 %v3528_v21, %v3519_v25 }
 0xd99   :  { %v3542_v6 = vadd.f32 %v3528_v21, %v3516_v32  ;;  %3603 = vperm.xlu0 %5562, %v7001_v27   ;;  %3612 = vperm.xlu1 %5561, %v6998_v42  }
 0xd9a   :  { %v7014_v19 = vsub.f32 %v3543_v16, %v7740_v63 }
 0xd9b   :  { %v7009_v34 = vsub.f32 %v3542_v6, %v7739_v8  ;;  %v3525_v17 = vpop.xlane.xlu1 %3524 }
 0xd9c   :  { %v3522_v18 = vpop.xlane.xlu0 %3521  ;;  %v3545_v56 = vadd.f32 %v3528_v21, %v3525_v17 }
 0xd9d   :  { %v3544_v22 = vadd.f32 %v3528_v21, %v3522_v18  ;;  %3615 = vperm.xlu0 %5562, %v7009_v34   ;;  %3606 = vperm.xlu1 %5561, %v7006_v58  }
 0xd9e   :  { %v7022_v59 = vsub.f32 %v3545_v56, %v7738_v61 }
 0xd9f   :  { %v7017_v30 = vsub.f32 %v3544_v22, %v7737_v52 }
 0xda1   :  { %3621 = vperm.xlu0 %5562, %v7017_v30   ;;  %3618 = vperm.xlu1 %5561, %v7014_v19  }
 0xda5   :  { %3624 = vperm.xlu1 %5561, %v7022_v59  }
 0xe00   :  { %v3586_v12 = vpop.permute.xlu1 %3585 }
 0xe01   :  { %v3637_v39 = vrot.slane %v3586_v12, %v6298_v36 }
 0xe04   :  { %v3580_v37 = vpop.permute.xlu0 %3579 }
 0xe05   :  { %v3629_v29 = vrot.slane %v3580_v37, %v6298_v36 }
 0xe08   :  { %v3589_v28 = vpop.permute.xlu1 %3588 }
 0xe09   :  { %v3641_v52 = vrot.slane %v3589_v28, %v6298_v36 }
 0xe0c   :  { %v3598_v44 = vpop.permute.xlu0 %3597  ;;  %v3583_v11 = vpop.permute.xlu1 %3582 }
 0xe0d   :  { %v3633_v21 = vrot.slane %v3583_v11, %v6298_v36  ;;  %v3653_v8 = vrot.slane %v3598_v44, %v6298_v36 }
 0xe0f   :  { %v3690_v1 = vsel %vm1181_vm11, %v3633_v21, %v3629_v29 }
 0xe10   :  { %v3691_v50 = vsel %vm1183_vm12, %v3637_v39, %v3690_v1  ;;  %v3592_v41 = vpop.permute.xlu0 %3591  ;;  %v3601_v57 = vpop.permute.xlu1 %3600 }
 0xe11   :  { %v3645_v60 = vrot.slane %v3592_v41, %v6298_v36  ;;  %v3692_v5 = vsel %vm1185_vm13, %v3641_v52, %v3691_v50  ;;  %v3657_v3 = vrot.slane %v3601_v57, %v6298_v36 }
 0xe13   :  { %v3693_v23 = vsel %vm1187_vm14, %v3645_v60, %v3692_v5 }
 0xe14   :  { %v3610_v38 = vpop.permute.xlu0 %3609  ;;  %v3595_v61 = vpop.permute.xlu1 %3594 }
 0xe15   :  { %v3649_v24 = vrot.slane %v3595_v61, %v6298_v36  ;;  %v3669_v17 = vrot.slane %v3610_v38, %v6298_v36 }
 0xe17   :  { %v3694_v4 = vsel %vm1189_vm15, %v3649_v24, %v3693_v23 }
 0xe18   :  { %v3604_v63 = vpop.permute.xlu0 %3603  ;;  %v3613_v14 = vpop.permute.xlu1 %3612  ;;  %v3695_v9 = vsel %vm1191_vm1, %v3653_v8, %v3694_v4 }
 0xe19   :  { %v3696_v2 = vsel %vm7741_vm4, %v3657_v3, %v3695_v9  ;;  %v3661_v6 = vrot.slane %v3604_v63, %v6298_v36  ;;  %v3673_v18 = vrot.slane %v3613_v14, %v6298_v36  ;;  %vm7748_vm4 = vmmov %vm7746_vm3 }
 0xe1a   :  { %v3706_v7 = vsel %vm7742_vm9, %v3696_v2, -inf  ;;  %vm7756_vm9 = vmmov %vm7747_vm2 }
 0xe1b   :  { %3707 = vmax.xlane.f32.xlu0 %v3706_v7 }
 0xe1c   :  { %v3616_v25 = vpop.permute.xlu0 %3615  ;;  %v3607_v32 = vpop.permute.xlu1 %3606 }
 0xe1d   :  { %v3665_v16 = vrot.slane %v3607_v32, %v6298_v36  ;;  %v3677_v56 = vrot.slane %v3616_v25, %v6298_v36 }
 0xe1f   :  { %v3697_v22 = vsel %vm1181_vm11, %v3665_v16, %v3661_v6 }
 0xe20   :  { %v3698_v12 = vsel %vm1183_vm12, %v3669_v17, %v3697_v22  ;;  %v3622_v37 = vpop.permute.xlu0 %3621  ;;  %v3619_v28 = vpop.permute.xlu1 %3618 }
 0xe21   :  { %v3699_v44 = vsel %vm1185_vm13, %v3673_v18, %v3698_v12  ;;  %v3681_v11 = vrot.slane %v3619_v28, %v6298_v36  ;;  %v3685_v29 = vrot.slane %v3622_v37, %v6298_v36 }
 0xe22   :  { %v3700_v21 = vsel %vm1187_vm14, %v3677_v56, %v3699_v44 }
 0xe23   :  { %v3701_v39 = vsel %vm1189_vm15, %v3681_v11, %v3700_v21 }
 0xe24   :  { %v3625_v1 = vpop.permute.xlu1 %3624  ;;  %v3702_v41 = vsel %vm1191_vm1, %v3685_v29, %v3701_v39 }
 0xe25   :  { %v3689_v50 = vrot.slane %v3625_v1, %v6298_v36 }
 0xe27   :  { %v3703_v57 = vsel %vm7743_vm10, %v3689_v50, %v3702_v41  ;;  %vm7757_vm10 = vmmov %vm7746_vm3 }
 0xe28   :  { %v3709_v52 = vsel %vm7744_vm7, %v3703_v57, -inf  ;;  %vm7758_vm7 = vmmov %vm7747_vm2 }
 0xe29   :  { %3710 = vmax.xlane.f32.xlu1 %v3709_v52 }
 0xea8   :  { %v3708_v60 = vpop.xlane.xlu0 %3707 }
 0xea9   :  { %v3717_v5 = vrot.slane %v3708_v60, %v5975_v13  ;;  %v3721_v38 = vrot.slane %v3708_v60, %v6121_v43  ;;  %v3725_v61 = vrot.slane %v3708_v60, %v6128_v46  ;;  %v3729_v24 = vrot.slane %v3708_v60, %v6146_v51 }
 0xeaa   :  { %v3733_v8 = vrot.slane %v3708_v60, %v6137_v47  ;;  %v3737_v63 = vrot.slane %v3708_v60, %v6153_v55  ;;  %v3741_v7 = vrot.slane %v3708_v60, %v6210_v53  ;;  %v3745_v6 = vrot.slane %v3708_v60, %v6207_v26 }
 0xeab   :  { %v3794_v23 = vsub.f32 %v6966_v54, %v3717_v5  ;;  %v3795_v3 = vsub.f32 %v6974_v15, %v3721_v38  ;;  %v3796_v4 = vsub.f32 %v6962_v20, %v3725_v61  ;;  %v3797_v14 = vsub.f32 %v6970_v49, %v3729_v24 }
 0xeac   :  { %v3798_v25 = vsub.f32 %v6985_v40, %v3733_v8  ;;  %v3799_v54 = vsub.f32 %v6990_v48, %v3737_v63  ;;  %v3800_v20 = vsub.f32 %v6977_v35, %v3741_v7  ;;  %v3801_v49 = vsub.f32 %v6982_v45, %v3745_v6 }
 0xead   :  { %v3810_v9 = vmul.f32 1.442695, %v3794_v23  ;;  %v3812_v2 = vmul.f32 1.442695, %v3795_v3  ;;  %v3814_v32 = vmul.f32 1.442695, %v3796_v4 }
 0xeae   :  { %v3816_v15 = vmul.f32 1.442695, %v3797_v14  ;;  %v3818_v16 = vmul.f32 1.442695, %v3798_v25  ;;  %v3820_v17 = vmul.f32 1.442695, %v3799_v54 }
 0xeaf   :  { %5818 = vpow2.f32 %v3810_v9  ;;  %v3822_v18 = vmul.f32 1.442695, %v3800_v20  ;;  %v3824_v48 = vmul.f32 1.442695, %v3801_v49 }
 0xeb0   :  { %5820 = vpow2.f32 %v3812_v2 }
 0xeb1   :  { %5822 = vpow2.f32 %v3814_v32 }
 0xeb2   :  { %5824 = vpow2.f32 %v3816_v15 }
 0xeb3   :  { %5826 = vpow2.f32 %v3818_v16 }
 0xeb4   :  { %5828 = vpow2.f32 %v3820_v17 }
 0xeb5   :  { %5830 = vpow2.f32 %v3822_v18 }
 0xeb6   :  { %v3711_v22 = vpop.xlane.xlu1 %3710  ;;  %5832 = vpow2.f32 %v3824_v48 }
 0xeb7   :  { %v3749_v40 = vrot.slane %v3711_v22, %v5975_v13  ;;  %v3753_v56 = vrot.slane %v3711_v22, %v6121_v43  ;;  %v3757_v12 = vrot.slane %v3711_v22, %v6128_v46  ;;  %v3761_v37 = vrot.slane %v3711_v22, %v6146_v51 }
 0xeb8   :  { %v3765_v11 = vrot.slane %v3711_v22, %v6137_v47  ;;  %v3769_v39 = vrot.slane %v3711_v22, %v6153_v55  ;;  %v3773_v41 = vrot.slane %v3711_v22, %v6210_v53  ;;  %v3777_v52 = vrot.slane %v3711_v22, %v6207_v26 }
 0xeb9   :  { %v7077_v35 = vpop.eup %5818  ;;  %v3802_v28 = vsub.f32 %v7001_v27, %v3749_v40  ;;  %v3803_v45 = vsub.f32 %v7006_v58, %v3753_v56  ;;  %v3804_v29 = vsub.f32 %v6993_v62, %v3757_v12  ;;  %v3805_v1 = vsub.f32 %v6998_v42, %v3761_v37 }
 0xeba   :  { %v7081_v44 = vpop.eup %5820  ;;  %3859 = vperm.xlu0 %5562, %v7077_v35   ;;  %v3806_v57 = vsub.f32 %v7009_v34, %v3765_v11  ;;  %v3807_v60 = vsub.f32 %v7014_v19, %v3769_v39  ;;  %v3808_v61 = vsub.f32 %v7017_v30, %v3773_v41  ;;  %v3809_v24 = vsub.f32 %v7022_v59, %v3777_v52 }
 0xebb   :  { %v3826_v21 = vmul.f32 1.442695, %v3802_v28  ;;  %3862 = vperm.xlu1 %5561, %v7081_v44   ;;  %v3828_v27 = vmul.f32 1.442695, %v3803_v45  ;;  %v7089_v50 = vpop.eup %5822  ;;  %v3830_v62 = vmul.f32 1.442695, %v3804_v29 }
 0xebc   :  { %v7091_v58 = vpop.eup %5824  ;;  %v3832_v42 = vmul.f32 1.442695, %v3805_v1  ;;  %v3834_v34 = vmul.f32 1.442695, %v3806_v57  ;;  %v3836_v8 = vmul.f32 1.442695, %v3807_v60 }
 0xebd   :  { %5834 = vpow2.f32 %v3826_v21  ;;  %v7099_v5 = vpop.eup %5826  ;;  %v3838_v3 = vmul.f32 1.442695, %v3808_v61  ;;  %v3840_v30 = vmul.f32 1.442695, %v3809_v24 }
 0xebe   :  { %3865 = vperm.xlu0 %5562, %v7089_v50   ;;  %5836 = vpow2.f32 %v3828_v27  ;;  %v7101_v38 = vpop.eup %5828 }
 0xebf   :  { %3868 = vperm.xlu1 %5561, %v7091_v58   ;;  %5838 = vpow2.f32 %v3830_v62  ;;  %v7107_v23 = vpop.eup %5830 }
 0xec0   :  { %5840 = vpow2.f32 %v3832_v42  ;;  %v7109_v19 = vpop.eup %5832 }
 0xec1   :  { %5842 = vpow2.f32 %v3834_v34 }
 0xec2   :  { %3871 = vperm.xlu0 %5562, %v7099_v5   ;;  %5844 = vpow2.f32 %v3836_v8 }
 0xec3   :  { %3874 = vperm.xlu1 %5561, %v7101_v38   ;;  %5846 = vpow2.f32 %v3838_v3 }
 0xec4   :  { %5848 = vpow2.f32 %v3840_v30 }
 0xec6   :  { %3877 = vperm.xlu0 %5562, %v7107_v23  }
 0xec7   :  { %3880 = vperm.xlu1 %5561, %v7109_v19   ;;  %v7113_v4 = vpop.eup %5834 }
 0xec8   :  { %v7115_v63 = vpop.eup %5836 }
 0xec9   :  { %v7119_v59 = vpop.eup %5838 }
 0xeca   :  { %3883 = vperm.xlu0 %5562, %v7113_v4   ;;  %v7121_v14 = vpop.eup %5840 }
 0xecb   :  { %3886 = vperm.xlu1 %5561, %v7115_v63   ;;  %v7125_v9 = vpop.eup %5842 }
 0xecc   :  { %v7127_v2 = vpop.eup %5844 }
 0xecd   :  { %v7131_v7 = vpop.eup %5846 }
 0xece   :  { %3889 = vperm.xlu0 %5562, %v7119_v59   ;;  %v7133_v25 = vpop.eup %5848 }
 0xecf   :  { %3892 = vperm.xlu1 %5561, %v7121_v14  }
 0xed2   :  { %3895 = vperm.xlu0 %5562, %v7125_v9  }
 0xed3   :  { %3898 = vperm.xlu1 %5561, %v7127_v2  }
 0xed6   :  { %3901 = vperm.xlu0 %5562, %v7131_v7  }
 0xed7   :  { %3904 = vperm.xlu1 %5561, %v7133_v25  }
 0xf39   :  { %v3860_v32 = vpop.permute.xlu0 %3859 }
 0xf3a   :  { %v3863_v6 = vpop.permute.xlu1 %3862  ;;  %v3909_v54 = vrot.slane %v3860_v32, %v6298_v36 }
 0xf3b   :  { %v3913_v15 = vrot.slane %v3863_v6, %v6298_v36 }
 0xf3d   :  { %v3866_v20 = vpop.permute.xlu0 %3865  ;;  %v3970_v17 = vsel %vm1181_vm11, %v3913_v15, %v3909_v54 }
 0xf3e   :  { %v3917_v16 = vrot.slane %v3866_v20, %v6298_v36  ;;  %v3869_v49 = vpop.permute.xlu1 %3868 }
 0xf3f   :  { %v3921_v18 = vrot.slane %v3869_v49, %v6298_v36 }
 0xf40   :  { %v3971_v22 = vsel %vm1183_vm12, %v3917_v16, %v3970_v17 }
 0xf41   :  { %v3872_v40 = vpop.permute.xlu0 %3871  ;;  %v3972_v48 = vsel %vm1185_vm13, %v3921_v18, %v3971_v22 }
 0xf42   :  { %v3925_v56 = vrot.slane %v3872_v40, %v6298_v36  ;;  %v3875_v12 = vpop.permute.xlu1 %3874 }
 0xf43   :  { %v3929_v37 = vrot.slane %v3875_v12, %v6298_v36 }
 0xf44   :  { %v3973_v28 = vsel %vm1187_vm14, %v3925_v56, %v3972_v48 }
 0xf45   :  { %v3878_v45 = vpop.permute.xlu0 %3877  ;;  %v3974_v21 = vsel %vm1189_vm15, %v3929_v37, %v3973_v28 }
 0xf46   :  { %v3933_v11 = vrot.slane %v3878_v45, %v6298_v36  ;;  %v3881_v29 = vpop.permute.xlu1 %3880 }
 0xf47   :  { %v3937_v39 = vrot.slane %v3881_v29, %v6298_v36 }
 0xf48   :  { %v3975_v1 = vsel %vm1191_vm1, %v3933_v11, %v3974_v21 }
 0xf49   :  { %v3884_v27 = vpop.permute.xlu0 %3883  ;;  %v3976_v41 = vsel %vm7745_vm8, %v3937_v39, %v3975_v1  ;;  %vm7759_vm8 = vmmov %vm7746_vm3 }
 0xf4a   :  { %v3887_v57 = vpop.permute.xlu1 %3886  ;;  %v3986_v62 = vsel %vm7746_vm3, %v3976_v41, 0.0  ;;  %v3941_v52 = vrot.slane %v3884_v27, %v6298_v36  ;;  %vm7760_vm3 = vcmask 1043456  }
 0xf4b   :  { %v3945_v60 = vrot.slane %v3887_v57, %v6298_v36  ;;  %3987 = vadd.xlane.f32.xlu0 %v3986_v62 }
 0xf4d   :  { %v3890_v42 = vpop.permute.xlu0 %3889  ;;  %v3977_v24 = vsel %vm1181_vm11, %v3945_v60, %v3941_v52 }
 0xf4e   :  { %v3949_v61 = vrot.slane %v3890_v42, %v6298_v36  ;;  %v3893_v34 = vpop.permute.xlu1 %3892 }
 0xf4f   :  { %v3953_v8 = vrot.slane %v3893_v34, %v6298_v36 }
 0xf50   :  { %v3978_v3 = vsel %vm1183_vm12, %v3949_v61, %v3977_v24 }
 0xf51   :  { %v3896_v30 = vpop.permute.xlu0 %3895  ;;  %v3979_v54 = vsel %vm1185_vm13, %v3953_v8, %v3978_v3 }
 0xf52   :  { %v3957_v32 = vrot.slane %v3896_v30, %v6298_v36  ;;  %v3899_v6 = vpop.permute.xlu1 %3898 }
 0xf53   :  { %v3961_v15 = vrot.slane %v3899_v6, %v6298_v36 }
 0xf54   :  { %v3980_v20 = vsel %vm1187_vm14, %v3957_v32, %v3979_v54  ;;  %v7749_v54 = vld [vmem:[#allocation11_spill] sm:$0xff] }
 0xf55   :  { %v3902_v16 = vpop.permute.xlu0 %3901  ;;  %v3981_v18 = vsel %vm1189_vm15, %v3961_v15, %v3980_v20 }
 0xf56   :  { %v3965_v49 = vrot.slane %v3902_v16, %v6298_v36  ;;  %v3905_v17 = vpop.permute.xlu1 %3904 }
 0xf57   :  { %v3969_v22 = vrot.slane %v3905_v17, %v6298_v36 }
 0xf58   :  { %v3982_v40 = vsel %vm1191_vm1, %v3965_v49, %v3981_v18 }
 0xf59   :  { %v3983_v56 = vsel %vm7747_vm2, %v3969_v22, %v3982_v40 }
 0xf5a   :  { %v3989_v12 = vsel %vm7748_vm4, %v3983_v56, 0.0 }
 0xf5b   :  { %3990 = vadd.xlane.f32.xlu1 %v3989_v12 }
 0xfd8   :  { %v3988_v48 = vpop.xlane.xlu0 %3987 }
 0xfd9   :  { %v3997_v37 = vrot.slane %v3988_v48, %v5975_v13  ;;  %v4001_v28 = vrot.slane %v3988_v48, %v6121_v43  ;;  %v4005_v45 = vrot.slane %v3988_v48, %v6128_v46  ;;  %v4009_v11 = vrot.slane %v3988_v48, %v6146_v51 }
 0xfda   :  { %v4013_v29 = vrot.slane %v3988_v48, %v6137_v47  ;;  %v4017_v21 = vrot.slane %v3988_v48, %v6153_v55  ;;  %v4021_v39 = vrot.slane %v3988_v48, %v6210_v53  ;;  %v4025_v1 = vrot.slane %v3988_v48, %v6207_v26  ;;  %v7751_v48 = vld [vmem:[#allocation14_spill] sm:$0xff] }
 0xfdb   :  { %5850 = vrcp.f32 %v3997_v37 }
 0xfdc   :  { %5852 = vrcp.f32 %v4001_v28 }
 0xfdd   :  { %5854 = vrcp.f32 %v4005_v45 }
 0xfde   :  { %5856 = vrcp.f32 %v4009_v11 }
 0xfdf   :  { %5858 = vrcp.f32 %v4013_v29  ;;  %v7753_v29 = vld [vmem:[#allocation15_spill] sm:$0xff] }
 0xfe0   :  { %5860 = vrcp.f32 %v4017_v21 }
 0xfe1   :  { %5862 = vrcp.f32 %v4021_v39 }
 0xfe2   :  { %5864 = vrcp.f32 %v4025_v1 }
 0xfe5   :  { %v5851_v27 = vpop.eup %5850 }
 0xfe6   :  { %v5853_v41 = vpop.eup %5852  ;;  %v7178_v57 = vmul.f32 %v5851_v27, %v7077_v35  ;;  %v7754_v27 = vld [vmem:[#allocation24_spill] sm:$0xff] }
 0xfe7   :  { %v5855_v62 = vpop.eup %5854  ;;  %v7181_v52 = vmul.f32 %v5853_v41, %v7081_v44 }
 0xfe8   :  { %v5857_v60 = vpop.eup %5856  ;;  %v3991_v42 = vpop.xlane.xlu1 %3990  ;;  %v7185_v61 = vmul.f32 %v7178_v57, %v6471_v33  ;;  %v7188_v34 = vmul.f32 %v5855_v62, %v7089_v50  ;;  %v7750_v50 = vld [vmem:[#allocation12_spill] sm:$0xff] }
 0xfe9   :  { %v5859_v24 = vpop.eup %5858  ;;  %v4029_v8 = vrot.slane %v3991_v42, %v5975_v13  ;;  %v4033_v3 = vrot.slane %v3991_v42, %v6121_v43  ;;  %v4037_v35 = vrot.slane %v3991_v42, %v6128_v46  ;;  %v4041_v44 = vrot.slane %v3991_v42, %v6146_v51 }
 0xfea   :  { %v5861_v30 = vpop.eup %5860  ;;  %v4045_v32 = vrot.slane %v3991_v42, %v6137_v47  ;;  %v4273_v6 = vand.u32 2147483647, %v7185_v61  ;;  %v7198_v15 = vmul.f32 %v7181_v52, %v7749_v54  ;;  %v7202_v20 = vmul.f32 %v7188_v34, %v7750_v50 }
 0xfeb   :  { %5866 = vrcp.f32 %v4029_v8  ;;  %v5863_v16 = vpop.eup %5862  ;;  %v4049_v49 = vrot.slane %v3991_v42, %v6153_v55  ;;  %v7206_v17 = vmul.f32 %v5857_v60, %v7091_v58  ;;  %v7209_v18 = vmul.f32 %v5859_v24, %v7099_v5  ;;  %v7752_v5 = vld [vmem:[#allocation13_spill] sm:$0xff]  ;;  %v7755_v60 = vld [vmem:[#allocation22_spill] sm:$0xff] }
 0xfec   :  { %5868 = vrcp.f32 %v4033_v3  ;;  %4306 = vperm.xlu0 %5562, %v4273_v6   ;;  %v4274_v22 = vand.u32 2147483647, %v7198_v15  ;;  %v7213_v40 = vmul.f32 %v5861_v30, %v7101_v38  ;;  %v5865_v56 = vpop.eup %5864  ;;  %v4053_v12 = vrot.slane %v3991_v42, %v6210_v53 }
 0xfed   :  { %5870 = vrcp.f32 %v4037_v35  ;;  %v7218_v37 = vmul.f32 %v7206_v17, %v7751_v48  ;;  %v4275_v58 = vand.u32 2147483647, %v7202_v20  ;;  %v7223_v28 = vmul.f32 %v7209_v18, %v7752_v5 }
 0xfee   :  { %5872 = vrcp.f32 %v4041_v44  ;;  %4309 = vperm.xlu1 %5561, %v4274_v22   ;;  %v7226_v45 = vmul.f32 %v5863_v16, %v7107_v23  ;;  %v4057_v38 = vrot.slane %v3991_v42, %v6207_v26  ;;  %v7232_v21 = vmul.f32 %v7213_v40, %v7753_v29 }
 0xfef   :  { %5874 = vrcp.f32 %v4045_v32  ;;  %v4276_v11 = vand.u32 2147483647, %v7218_v37  ;;  %v7235_v39 = vmul.f32 %v5865_v56, %v7109_v19  ;;  %v4277_v1 = vand.u32 2147483647, %v7223_v28 }
 0xff0   :  { %5876 = vrcp.f32 %v4049_v49  ;;  %4312 = vperm.xlu0 %5562, %v4275_v58   ;;  %v7240_v23 = vmul.f32 %v7226_v45, %v7754_v27  ;;  %v4278_v62 = vand.u32 2147483647, %v7232_v21 }
 0xff1   :  { %5878 = vrcp.f32 %v4053_v12  ;;  %v7245_v42 = vmul.f32 %v7235_v39, %v7755_v60 }
 0xff2   :  { %4315 = vperm.xlu1 %5561, %v4276_v11   ;;  %5880 = vrcp.f32 %v4057_v38  ;;  %v4279_v3 = vand.u32 2147483647, %v7240_v23 }
 0xff4   :  { %4318 = vperm.xlu0 %5562, %v4277_v1  }
 0xff5   :  { %v5867_v41 = vpop.eup %5866 }
 0xff6   :  { %v5869_v24 = vpop.eup %5868  ;;  %v7248_v19 = vmul.f32 %v5867_v41, %v7113_v4  ;;  %4321 = vperm.xlu1 %5561, %v4278_v62   ;;  %v4280_v4 = vand.u32 2147483647, %v7245_v42 }
 0xff7   :  { %v5871_v8 = vpop.eup %5870  ;;  %v7252_v35 = vmul.f32 %v5869_v24, %v7115_v63 }
 0xff8   :  { %v5873_v30 = vpop.eup %5872  ;;  %v7256_v44 = vmul.f32 %v7248_v19, %v6471_v33  ;;  %v7259_v32 = vmul.f32 %v5871_v8, %v7119_v59  ;;  %4324 = vperm.xlu0 %5562, %v4279_v3  }
 0xff9   :  { %v5875_v6 = vpop.eup %5874  ;;  %v7264_v16 = vmul.f32 %v7252_v35, %v7749_v54  ;;  %v7267_v49 = vmul.f32 %v5873_v30, %v7121_v14 }
 0xffa   :  { %v5877_v63 = vpop.eup %5876  ;;  %v4281_v22 = vand.u32 2147483647, %v7256_v44  ;;  %4327 = vperm.xlu1 %5561, %v4280_v4   ;;  %v7273_v59 = vmul.f32 %v7259_v32, %v7750_v50  ;;  %v7276_v56 = vmul.f32 %v5875_v6, %v7125_v9 }
 0xffb   :  { %v4282_v33 = vand.u32 2147483647, %v7264_v16  ;;  %v5879_v12 = vpop.eup %5878  ;;  %v7280_v54 = vmul.f32 %v7267_v49, %v7751_v48  ;;  %v7283_v14 = vmul.f32 %v5877_v63, %v7127_v2 }
 0xffc   :  { %4330 = vperm.xlu0 %5562, %v4281_v22   ;;  %v5881_v58 = vpop.eup %5880  ;;  %v4283_v38 = vand.u32 2147483647, %v7273_v59  ;;  %v7288_v50 = vmul.f32 %v7276_v56, %v7752_v5  ;;  %v7291_v9 = vmul.f32 %v5879_v12, %v7131_v7 }
 0xffd   :  { %v4284_v11 = vand.u32 2147483647, %v7280_v54  ;;  %v7296_v48 = vmul.f32 %v7283_v14, %v7753_v29  ;;  %v7299_v2 = vmul.f32 %v5881_v58, %v7133_v25 }
 0xffe   :  { %4333 = vperm.xlu1 %5561, %v4282_v33   ;;  %v4285_v1 = vand.u32 2147483647, %v7288_v50  ;;  %v7304_v5 = vmul.f32 %v7291_v9, %v7754_v27 }
 0xfff   :  { %v4286_v7 = vand.u32 2147483647, %v7296_v48  ;;  %v7309_v41 = vmul.f32 %v7299_v2, %v7755_v60 }
0x1000   :  { %4336 = vperm.xlu0 %5562, %v4283_v38   ;;  %v4287_v29 = vand.u32 2147483647, %v7304_v5 }
0x1001   :  { %v4288_v25 = vand.u32 2147483647, %v7309_v41 }
0x1002   :  { %4339 = vperm.xlu1 %5561, %v4284_v11  }
0x1004   :  { %4342 = vperm.xlu0 %5562, %v4285_v1  }
0x1006   :  { %4345 = vperm.xlu1 %5561, %v4286_v7  }
0x1008   :  { %4348 = vperm.xlu0 %5562, %v4287_v29  }
0x100a   :  { %4351 = vperm.xlu1 %5561, %v4288_v25  }
0x106b   :  { %v4307_v62 = vpop.permute.xlu0 %4306 }
0x106c   :  { %v4356_v24 = vrot.slane %v4307_v62, %v6298_v36 }
0x106d   :  { %v4310_v8 = vpop.permute.xlu1 %4309 }
0x106e   :  { %v4360_v27 = vrot.slane %v4310_v8, %v6298_v36 }
0x106f   :  { %v4313_v3 = vpop.permute.xlu0 %4312 }
0x1070   :  { %v4364_v30 = vrot.slane %v4313_v3, %v6298_v36  ;;  %v4417_v6 = vsel %vm1181_vm11, %v4360_v27, %v4356_v24 }
0x1071   :  { %v4316_v60 = vpop.permute.xlu1 %4315 }
0x1072   :  { %v4418_v4 = vsel %vm1183_vm12, %v4364_v30, %v4417_v6  ;;  %v4368_v63 = vrot.slane %v4316_v60, %v6298_v36 }
0x1073   :  { %v4319_v22 = vpop.permute.xlu0 %4318 }
0x1074   :  { %v4372_v33 = vrot.slane %v4319_v22, %v6298_v36  ;;  %v4419_v12 = vsel %vm1185_vm13, %v4368_v63, %v4418_v4 }
0x1075   :  { %v4322_v58 = vpop.permute.xlu1 %4321 }
0x1076   :  { %v4420_v38 = vsel %vm1187_vm14, %v4372_v33, %v4419_v12  ;;  %v4376_v11 = vrot.slane %v4322_v58, %v6298_v36 }
0x1077   :  { %v4325_v1 = vpop.permute.xlu0 %4324 }
0x1078   :  { %v4380_v7 = vrot.slane %v4325_v1, %v6298_v36  ;;  %v4421_v29 = vsel %vm1189_vm15, %v4376_v11, %v4420_v38 }
0x1079   :  { %v4328_v25 = vpop.permute.xlu1 %4327 }
0x107a   :  { %v4384_v62 = vrot.slane %v4328_v25, %v6298_v36  ;;  %v4422_v24 = vsel %vm1191_vm1, %v4380_v7, %v4421_v29 }
0x107b   :  { %v4331_v8 = vpop.permute.xlu0 %4330 }
0x107c   :  { %v4423_v27 = vsel %vm7756_vm9, %v4384_v62, %v4422_v24  ;;  %v4388_v3 = vrot.slane %v4331_v8, %v6298_v36  ;;  %vm1757_vm9 = vcmask 130048  }
0x107d   :  { %v4334_v30 = vpop.permute.xlu1 %4333  ;;  %v4433_v6 = vsel %vm7757_vm10, %v4423_v27, 0.0  ;;  %vm1759_vm10 = vcmask 195584  }
0x107e   :  { %v4392_v60 = vrot.slane %v4334_v30, %v6298_v36  ;;  %4434 = vadd.xlane.f32.xlu0 %v4433_v6 }
0x107f   :  { %v4337_v4 = vpop.permute.xlu0 %4336 }
0x1080   :  { %v4396_v63 = vrot.slane %v4337_v4, %v6298_v36  ;;  %v4424_v22 = vsel %vm1181_vm11, %v4392_v60, %v4388_v3 }
0x1081   :  { %v4340_v33 = vpop.permute.xlu1 %4339 }
0x1082   :  { %v4425_v12 = vsel %vm1183_vm12, %v4396_v63, %v4424_v22  ;;  %v4400_v58 = vrot.slane %v4340_v33, %v6298_v36 }
0x1083   :  { %v4343_v38 = vpop.permute.xlu0 %4342 }
0x1084   :  { %v4404_v11 = vrot.slane %v4343_v38, %v6298_v36  ;;  %v4426_v1 = vsel %vm1185_vm13, %v4400_v58, %v4425_v12 }
0x1085   :  { %v4346_v7 = vpop.permute.xlu1 %4345 }
0x1086   :  { %v4427_v29 = vsel %vm1187_vm14, %v4404_v11, %v4426_v1  ;;  %v4408_v25 = vrot.slane %v4346_v7, %v6298_v36  ;;  %v5916_v11 = vld [vmem:[%s7645_s0] sm:$0xff] }
0x1087   :  { %v4349_v62 = vpop.permute.xlu0 %4348 }
0x1088   :  { %v4412_v24 = vrot.slane %v4349_v62, %v6298_v36  ;;  %v4428_v8 = vsel %vm1189_vm15, %v4408_v25, %v4427_v29 }
0x1089   :  { %v4352_v27 = vpop.permute.xlu1 %4351 }
0x108a   :  { %v4416_v3 = vrot.slane %v4352_v27, %v6298_v36  ;;  %v4429_v30 = vsel %vm1191_vm1, %v4412_v24, %v4428_v8 }
0x108c   :  { %v4430_v6 = vsel %vm7758_vm7, %v4416_v3, %v4429_v30  ;;  %vm7782_vm7 = vmmov %vm7748_vm4 }
0x108d   :  { %v4436_v60 = vsel %vm7759_vm8, %v4430_v6, 0.0  ;;  %vm1762_vm8 = vcmask 326656  }
0x108e   :  { %4437 = vadd.xlane.f32.xlu1 %v4436_v60 }
0x1094   :  { %2497 = vrot.lane.b32.xlu0 %v6769_v31, %s5923_s22 }
0x110b   :  { %v4435_v4 = vpop.xlane.xlu0 %4434 }
0x110c   :  { %v4439_v63 = vmax.f32 %v4435_v4, 1e-12 }
0x110e   :  { %v4446_v22 = vrot.slane %v4439_v63, %v5975_v13  ;;  %v4450_v33 = vrot.slane %v4439_v63, %v6121_v43  ;;  %v4454_v12 = vrot.slane %v4439_v63, %v6128_v46  ;;  %v4458_v38 = vrot.slane %v4439_v63, %v6146_v51 }
0x110f   :  { %v2498_v58 = vpop.permute.xlu0 %2497  ;;  %v4462_v31 = vrot.slane %v4439_v63, %v6137_v47  ;;  %v4466_v29 = vrot.slane %v4439_v63, %v6153_v55  ;;  %v4470_v25 = vrot.slane %v4439_v63, %v6210_v53  ;;  %v4474_v24 = vrot.slane %v4439_v63, %v6207_v26 }
0x1110   :  { %v7355_v1 = vsel %vm307_vm0, %v5916_v11, %v2498_v58  ;;  %5882 = vrcp.f32 %v4446_v22 }
0x1111   :  { %v4571_v7 = vpack.c.bf16 %v7355_v1, %v7355_v1  ;;  %5884 = vrcp.f32 %v4450_v33 }
0x1112   :  { %5886 = vrcp.f32 %v4454_v12 }
0x1113   :  { %v4657_v62 = vsel %vm7760_vm3, %v4571_v7, 0  ;;  %5888 = vrcp.f32 %v4458_v38 }
0x1114   :  { %5495 = vmatpush3.bf16.msra.mxu0 %v4657_v62  ;;  %5890 = vrcp.f32 %v4462_v31 }
0x1115   :  { %5892 = vrcp.f32 %v4466_v29  ;;  %5500 = vmatprep.subr.bf16.mxu0 %v7733_v0 }
0x1116   :  { %5894 = vrcp.f32 %v4470_v25 }
0x1117   :  { %5896 = vrcp.f32 %v4474_v24 }
0x111a   :  { %v5883_v8 = vpop.eup %5882 }
0x111b   :  { %v5885_v27 = vpop.eup %5884  ;;  %v4438_v3 = vpop.xlane.xlu1 %4437  ;;  %v4524_v30 = vmul.f32 %v5883_v8, %v7185_v61 }
0x111c   :  { %v5887_v6 = vpop.eup %5886  ;;  %v4440_v60 = vmax.f32 %v4438_v3, 1e-12  ;;  %v4526_v4 = vmul.f32 %v5885_v27, %v7198_v15 }
0x111d   :  { %v5889_v22 = vpop.eup %5888  ;;  %v4555_v33 = vpack.c.bf16 %v4524_v30, %v4524_v30  ;;  %v4528_v63 = vmul.f32 %v5887_v6, %v7202_v20 }
0x111e   :  { %v5891_v12 = vpop.eup %5890  ;;  %v4556_v58 = vpack.c.bf16 %v4526_v4, %v4526_v4  ;;  %v4530_v38 = vmul.f32 %v5889_v22, %v7218_v37  ;;  %v4482_v11 = vrot.slane %v4440_v60, %v6121_v43  ;;  %v4478_v31 = vrot.slane %v4440_v60, %v5975_v13 }
0x111f   :  { %v5893_v7 = vpop.eup %5892  ;;  %v4581_v29 = vunpack.c.l.b16 %v4555_v33  ;;  %v4557_v25 = vpack.c.bf16 %v4528_v63, %v4528_v63  ;;  %v4532_v61 = vmul.f32 %v5891_v12, %v7223_v28  ;;  %v4490_v62 = vrot.slane %v4440_v60, %v6146_v51 }
0x1120   :  { %v5895_v15 = vpop.eup %5894  ;;  %v4582_v24 = vunpack.c.l.b16 %v4556_v58  ;;  %v4558_v8 = vpack.c.bf16 %v4530_v38, %v4530_v38  ;;  %v4534_v20 = vmul.f32 %v5893_v7, %v7232_v21  ;;  %5898 = vrcp.f32 %v4482_v11 }
0x1121   :  { %v5897_v27 = vpop.eup %5896  ;;  %4590 = vperm.xlu0 %5562, %v4581_v29   ;;  %5900 = vrcp.f32 %v4478_v31  ;;  %v4583_v43 = vunpack.c.l.b16 %v4557_v25  ;;  %v4559_v37 = vpack.c.bf16 %v4532_v61, %v4532_v61  ;;  %v4536_v30 = vmul.f32 %v5895_v15, %v7240_v23 }
0x1122   :  { %4593 = vperm.xlu1 %5561, %v4582_v24   ;;  %5902 = vrcp.f32 %v4490_v62  ;;  %v4584_v3 = vunpack.c.l.b16 %v4558_v8  ;;  %v4486_v28 = vrot.slane %v4440_v60, %v6128_v46  ;;  %v4494_v51 = vrot.slane %v4440_v60, %v6137_v47 }
0x1123   :  { %v4560_v6 = vpack.c.bf16 %v4534_v20, %v4534_v20  ;;  %v4538_v4 = vmul.f32 %v5897_v27, %v7245_v42  ;;  %v4498_v21 = vrot.slane %v4440_v60, %v6153_v55  ;;  %v4502_v22 = vrot.slane %v4440_v60, %v6210_v53 }
0x1124   :  { %5904 = vrcp.f32 %v4486_v28  ;;  %v4506_v33 = vrot.slane %v4440_v60, %v6207_v26  ;;  %v4585_v63 = vunpack.c.l.b16 %v4559_v37  ;;  %v4561_v12 = vpack.c.bf16 %v4536_v30, %v4536_v30 }
0x1125   :  { %4596 = vperm.xlu0 %5562, %v4583_v43   ;;  %5906 = vrcp.f32 %v4494_v51  ;;  %v4586_v23 = vunpack.c.l.b16 %v4560_v6  ;;  %v4562_v46 = vpack.c.bf16 %v4538_v4, %v4538_v4 }
0x1126   :  { %4599 = vperm.xlu1 %5561, %v4584_v3   ;;  %5908 = vrcp.f32 %v4498_v21  ;;  %v4587_v55 = vunpack.c.l.b16 %v4561_v12 }
0x1127   :  { %5910 = vrcp.f32 %v4502_v22  ;;  %v4588_v38 = vunpack.c.l.b16 %v4562_v46 }
0x1128   :  { %5912 = vrcp.f32 %v4506_v33 }
0x1129   :  { %4602 = vperm.xlu0 %5562, %v4585_v63  }
0x112a   :  { %v5899_v47 = vpop.eup %5898  ;;  %4605 = vperm.xlu1 %5561, %v4586_v23  }
0x112b   :  { %v5901_v42 = vpop.eup %5900  ;;  %v4542_v53 = vmul.f32 %v5899_v47, %v7264_v16 }
0x112c   :  { %v5903_v58 = vpop.eup %5902  ;;  %v4540_v26 = vmul.f32 %v5901_v42, %v7256_v44 }
0x112d   :  { %4608 = vperm.xlu0 %5562, %v4587_v55   ;;  %v4564_v60 = vpack.c.bf16 %v4542_v53, %v4542_v53  ;;  %v4546_v11 = vmul.f32 %v5903_v58, %v7280_v54 }
0x112e   :  { %4611 = vperm.xlu1 %5561, %v4588_v38   ;;  %v4563_v31 = vpack.c.bf16 %v4540_v26, %v4540_v26  ;;  %v5905_v7 = vpop.eup %5904 }
0x112f   :  { %v4708_v29 = vunpack.c.l.b16 %v4564_v60  ;;  %v4566_v25 = vpack.c.bf16 %v4546_v11, %v4546_v11  ;;  %v5907_v61 = vpop.eup %5906  ;;  %v4544_v15 = vmul.f32 %v5905_v7, %v7273_v59 }
0x1130   :  { %v4707_v62 = vunpack.c.l.b16 %v4563_v31  ;;  %v5909_v24 = vpop.eup %5908  ;;  %v4548_v16 = vmul.f32 %v5907_v61, %v7288_v50 }
0x1131   :  { %v5911_v8 = vpop.eup %5910  ;;  %v4565_v44 = vpack.c.bf16 %v4544_v15, %v4544_v15  ;;  %v4550_v20 = vmul.f32 %v5909_v24, %v7296_v48  ;;  %v4710_v54 = vunpack.c.l.b16 %v4566_v25 }
0x1132   :  { %4719 = vperm.xlu1 %5561, %v4708_v29   ;;  %4716 = vperm.xlu0 %5562, %v4707_v62   ;;  %v5913_v27 = vpop.eup %5912  ;;  %v4567_v43 = vpack.c.bf16 %v4548_v16, %v4548_v16  ;;  %v4552_v30 = vmul.f32 %v5911_v8, %v7304_v5 }
0x1133   :  { %v4709_v37 = vunpack.c.l.b16 %v4565_v44  ;;  %v4568_v3 = vpack.c.bf16 %v4550_v20, %v4550_v20  ;;  %v4554_v28 = vmul.f32 %v5913_v27, %v7309_v41 }
0x1134   :  { %v4711_v59 = vunpack.c.l.b16 %v4567_v43  ;;  %v4569_v50 = vpack.c.bf16 %v4552_v30, %v4552_v30 }
0x1135   :  { %v4712_v51 = vunpack.c.l.b16 %v4568_v3  ;;  %v4570_v6 = vpack.c.bf16 %v4554_v28, %v4554_v28 }
0x1136   :  { %4725 = vperm.xlu1 %5561, %v4710_v54   ;;  %4722 = vperm.xlu0 %5562, %v4709_v37   ;;  %v4713_v4 = vunpack.c.l.b16 %v4569_v50 }
0x1137   :  { %v4714_v21 = vunpack.c.l.b16 %v4570_v6 }
0x113a   :  { %4728 = vperm.xlu1 %5561, %v4711_v59   ;;  %4731 = vperm.xlu0 %5562, %v4712_v51  }
0x113e   :  { %4734 = vperm.xlu1 %5561, %v4713_v4   ;;  %4737 = vperm.xlu0 %5562, %v4714_v21  }
0x1142   :  { %2499 = vrot.lane.b32.xlu1 %v6775_v10, %s5923_s22 }
0x11a0   :  { %v4591_v48 = vpop.permute.xlu0 %4590 }
0x11a1   :  { %v4594_v22 = vpop.permute.xlu1 %4593  ;;  %v4616_v5 = vrot.slane %v4591_v48, %v6298_v36 }
0x11a2   :  { %v4620_v41 = vrot.slane %v4594_v22, %v6298_v36 }
0x11a4   :  { %v4597_v33 = vpop.permute.xlu0 %4596  ;;  %v4645_v23 = vsel %vm1181_vm11, %v4620_v41, %v4616_v5  ;;  %v5917_v41 = vld [vmem:[%s7645_s0 + $0x8] sm:$0xff] }
0x11a5   :  { %v4624_v63 = vrot.slane %v4597_v33, %v6298_v36  ;;  %v4600_v12 = vpop.permute.xlu1 %4599 }
0x11a6   :  { %v4628_v46 = vrot.slane %v4600_v12, %v6298_v36 }
0x11a7   :  { %v4646_v47 = vsel %vm1183_vm12, %v4624_v63, %v4645_v23 }
0x11a8   :  { %v4603_v42 = vpop.permute.xlu0 %4602  ;;  %v4647_v53 = vsel %vm1185_vm13, %v4628_v46, %v4646_v47  ;;  %v5642_v47 = vld [vmem:[%s7644_s1 + $0xc0] sm:$0xff]  }
0x11a9   :  { %v4632_v55 = vrot.slane %v4603_v42, %v6298_v36  ;;  %v4606_v10 = vpop.permute.xlu1 %4605  ;;  %5507 = vmatpush3.bf16.msra.mxu1 %v5642_v47  ;;  %v5643_v42 = vld [vmem:[%s7644_s1 + $0xc8] sm:$0xff]  }
0x11aa   :  { %v4636_v58 = vrot.slane %v4606_v10, %v6298_v36  ;;  %5508 = vmatprep.subr.bf16.mxu1 %v7733_v0  ;;  %v5645_v10 = vld [vmem:[%s7644_s1 + $0xd8] sm:$0xff]  }
0x11ab   :  { %v4648_v38 = vsel %vm1187_vm14, %v4632_v55, %v4647_v53  ;;  %v5644_v55 = vld [vmem:[%s7644_s1 + $0xd0] sm:$0xff]   ;;  %v5646_v53 = vld [vmem:[%s7644_s1 + $0xe0] sm:$0xff]  }
0x11ac   :  { %v4609_v26 = vpop.permute.xlu0 %4608  ;;  %v4649_v31 = vsel %vm1189_vm15, %v4636_v58, %v4648_v38  ;;  %v5647_v58 = vld [vmem:[%s7644_s1 + $0xe8] sm:$0xff]   ;;  %v5648_v38 = vld [vmem:[%s7644_s1 + $0xf0] sm:$0xff]  }
0x11ad   :  { %v4640_v60 = vrot.slane %v4609_v26, %v6298_v36  ;;  %v4612_v11 = vpop.permute.xlu1 %4611  ;;  %5509 = vmatpush3.bf16.msra.mxu1 %v5643_v42 }
0x11ae   :  { %v4644_v7 = vrot.slane %v4612_v11, %v6298_v36  ;;  %5510 = vmatprep.subr.bf16.mxu1 %v7733_v0 }
0x11af   :  { %v4650_v29 = vsel %vm1191_vm1, %v4640_v60, %v4649_v31 }
0x11b0   :  { %v4651_v25 = vsel %vm7747_vm2, %v4644_v7, %v4650_v29  ;;  %v5649_v7 = vld [vmem:[%s7644_s1 + $0xf8] sm:$0xff]  }
0x11b1   :  { %v4652_v61 = vpack.c.b16 %v4651_v25, %v4651_v25  ;;  %v4717_v62 = vpop.permute.xlu0 %4716  ;;  %v4720_v15 = vpop.permute.xlu1 %4719  ;;  %5511 = vmatpush3.bf16.msra.mxu1 %v5644_v55 }
0x11b2   :  { %v4742_v24 = vrot.slane %v4717_v62, %v6298_v36  ;;  %v4746_v16 = vrot.slane %v4720_v15, %v6298_v36  ;;  %5512 = vmatprep.subr.bf16.mxu1 %v7733_v0 }
0x11b3   :  { %5497 = vmatmul.mubr.msk.bf16.vlgmr.msra.gmra.mrb[52].mxu0 %vm7748_vm4, %v4652_v61 }
0x11b4   :  { %5502 = vmatprep.mubr.msk.bf16.mxu0 %vm5922_vm6, %v7733_v0  ;;  %v4771_v27 = vsel %vm1181_vm11, %v4746_v16, %v4742_v24  ;;  %v7764_v24 = vld [vmem:[#allocation17_spill] sm:$0xff]  ;;  %v7765_v16 = vld [vmem:[#allocation16_spill] sm:$0xff] }
0x11b5   :  { %v4723_v8 = vpop.permute.xlu0 %4722  ;;  %v4726_v44 = vpop.permute.xlu1 %4725  ;;  %5513 = vmatpush3.bf16.msra.mxu1 %v5645_v10 }
0x11b6   :  { %v4750_v20 = vrot.slane %v4723_v8, %v6298_v36  ;;  %v4754_v54 = vrot.slane %v4726_v44, %v6298_v36  ;;  %5514 = vmatprep.subr.bf16.mxu1 %v7733_v0  ;;  %v7766_v8 = vld [vmem:[#allocation18_spill] sm:$0xff]  ;;  %v7767_v44 = vld [vmem:[#allocation19_spill] sm:$0xff] }
0x11b8   :  { %v4772_v43 = vsel %vm1183_vm12, %v4750_v20, %v4771_v27  ;;  %vm7761_vm12 = vmmov %vm7747_vm2  ;;  %vm1766_vm2 = vcmask 457728  }
0x11b9   :  { %v4732_v37 = vpop.permute.xlu0 %4731  ;;  %v4729_v3 = vpop.permute.xlu1 %4728  ;;  %v4773_v28 = vsel %vm1185_vm13, %v4754_v54, %v4772_v43  ;;  %vm7762_vm13 = vmmov %vm7760_vm3  ;;  %5515 = vmatpush3.bf16.msra.mxu1 %v5646_v53  ;;  %v5650_v54 = vld [vmem:[%s7644_s1 + $0x100] sm:$0xff]   ;;  %v5651_v43 = vld [vmem:[%s7644_s1 + $0x108] sm:$0xff]   ;;  %vm1764_vm3 = vcmask 392192  }
0x11ba   :  { %v4758_v30 = vrot.slane %v4729_v3, %v6298_v36  ;;  %v4762_v59 = vrot.slane %v4732_v37, %v6298_v36  ;;  %5516 = vmatprep.subr.bf16.mxu1 %v7733_v0  ;;  %v5652_v37 = vld [vmem:[%s7644_s1 + $0x110] sm:$0xff]   ;;  %v5653_v3 = vld [vmem:[%s7644_s1 + $0x118] sm:$0xff]  }
0x11bc   :  { %v4774_v51 = vsel %vm1187_vm14, %v4758_v30, %v4773_v28  ;;  %vm7763_vm14 = vmmov %vm7748_vm4  ;;  %v5654_v30 = vld [vmem:[%s7644_s1 + $0x120] sm:$0xff]   ;;  %v5655_v28 = vld [vmem:[%s7644_s1 + $0x128] sm:$0xff]  }
0x11bd   :  { %v4738_v50 = vpop.permute.xlu0 %4737  ;;  %v4735_v6 = vpop.permute.xlu1 %4734  ;;  %v4775_v48 = vsel %vm1189_vm15, %v4762_v59, %v4774_v51  ;;  %5517 = vmatpush3.bf16.msra.mxu1 %v5647_v58 }
0x11be   :  { %v4766_v4 = vrot.slane %v4735_v6, %v6298_v36  ;;  %v4770_v21 = vrot.slane %v4738_v50, %v6298_v36  ;;  %5518 = vmatprep.subr.bf16.mxu1 %v7733_v0 }
0x11c0   :  { %v4776_v22 = vsel %vm1191_vm1, %v4766_v4, %v4775_v48 }
0x11c1   :  { %v2500_v5 = vpop.permute.xlu1 %2499  ;;  %v4777_v12 = vsel %vm7761_vm12, %v4770_v21, %v4776_v22  ;;  %5519 = vmatpush3.bf16.msra.mxu1 %v5648_v38  ;;  %vm5136_vm12 = vcmask 15360  }
0x11c2   :  { %v7427_v33 = vsel %vm307_vm0, %v5917_v41, %v2500_v5  ;;  %v4778_v46 = vpack.c.b16 %v4777_v12, %v4777_v12  ;;  %5520 = vmatprep.subr.bf16.mxu1 %v7733_v0  ;;  %v7772_v41 = vld [vmem:[#allocation26_spill] sm:$0xff]  ;;  %v7774_v12 = vld [vmem:[#allocation28_spill] sm:$0xff] }
0x11c3   :  { %v4572_v63 = vpack.c.bf16 %v7427_v33, %v7427_v33 }
0x11c5   :  { %v4783_v23 = vsel %vm7762_vm13, %v4572_v63, 0  ;;  %5521 = vmatpush3.bf16.msra.mxu1 %v5649_v7  ;;  %v7773_v63 = vld [vmem:[#allocation27_spill] sm:$0xff] }
0x11c6   :  { %5501 = vmatpush3.bf16.msra.mxu0 %v4783_v23  ;;  %5542 = vmatprep.subr.bf16.mxu1 %v7733_v0  ;;  %v7775_v23 = vld [vmem:[#allocation29_spill] sm:$0xff] }
0x11c7   :  { %5526 = vmatprep.subr.bf16.mxu0 %v7733_v0 }
0x11c9   :  { %5503 = vmatmul.mubr.msk.bf16.vlgmr.msra.gmra.mrb[56].mxu0 %vm7763_vm14, %v4778_v46 }
0x11ca   :  { %5538 = vmatprep.mubr.msk.bf16.mxu0 %vm5922_vm6, %v7733_v0  ;;  %5527 = vmatpush3.bf16.msra.mxu0 %v5650_v54 }
0x11cb   :  { %5528 = vmatprep.subr.bf16.mxu0 %v7733_v0 }
0x11ce   :  { %5529 = vmatpush3.bf16.msra.mxu0 %v5651_v43 }
0x11cf   :  { %5530 = vmatprep.subr.bf16.mxu0 %v7733_v0 }
0x11d2   :  { %5531 = vmatpush3.bf16.msra.mxu0 %v5652_v37 }
0x11d3   :  { %5532 = vmatprep.subr.bf16.mxu0 %v7733_v0 }
0x11d6   :  { %5533 = vmatpush3.bf16.msra.mxu0 %v5653_v3 }
0x11d7   :  { %5534 = vmatprep.subr.bf16.mxu0 %v7733_v0 }
0x11da   :  { %5535 = vmatpush3.bf16.msra.mxu0 %v5654_v30 }
0x11db   :  { %5536 = vmatprep.subr.bf16.mxu0 %v7733_v0 }
0x11de   :  { %5537 = vmatpush3.bf16.msra.mxu0 %v5655_v28 }
0x1286   :  { %v4693_v26 = vpop.f32.mrb[52].mxu0 }
0x1287   :  { %v5498_v60 = vpop.f32.mrb[53].mxu0 }
0x1288   :  { %v4696_v11 = vpop.f32.mrb[54].mxu0 }
0x1289   :  { %v5499_v31 = vpop.f32.mrb[55].mxu0 }
0x129c   :  { %v4819_v29 = vpop.f32.mrb[56].mxu0 }
0x129d   :  { %v5608_v25 = vpack.i.bf16 %v4819_v29, %v4693_v26  ;;  %v5504_v61 = vpop.f32.mrb[57].mxu0 }
0x129e   :  { %v4822_v62 = vpop.f32.mrb[58].mxu0 }
0x129f   :  { %5609 = vrot.lane.b32.xlu0 %v5608_v25, %s5924_s13  ;;  %v5505_v15 = vpop.f32.mrb[59].mxu0 }
0x12a0   :  { %v7780_v15 = vld [vmem:[#allocation3_spill] sm:$0xff] }
0x12a3   :  { %1608 = vperm.xlu0 %5562, %v7764_v24   ;;  %v1631_v24 = vadd.s32 4294967288, %v7780_v15 }
0x12a7   :  { %4109 = vperm.xlu0 %5562, %v7178_v57   ;;  %v7768_v57 = vld [vmem:[#allocation20_spill] sm:$0xff] }
0x12ab   :  { %4127 = vperm.xlu0 %5562, %v7181_v52   ;;  %v7769_v52 = vld [vmem:[#allocation21_spill] sm:$0xff] }
0x12af   :  { %4145 = vperm.xlu0 %5562, %v7188_v34   ;;  %v7770_v34 = vld [vmem:[#allocation23_spill] sm:$0xff] }
0x12b3   :  { %4163 = vperm.xlu0 %5562, %v7206_v17   ;;  %v7771_v17 = vld [vmem:[#allocation25_spill] sm:$0xff] }
0x12b7   :  { %4181 = vperm.xlu0 %5562, %v7209_v18  }
0x12bb   :  { %4199 = vperm.xlu0 %5562, %v7213_v40  }
0x12bf   :  { %4217 = vperm.xlu0 %5562, %v7226_v45  }
0x12c3   :  { %4235 = vperm.xlu0 %5562, %v7235_v39  }
0x12c7   :  { %1626 = vperm.xlu0 %5562, %v7765_v16   ;;  %v1650_v16 = vadd.s32 4294967280, %v7780_v15 }
0x12cb   :  { %1645 = vperm.xlu0 %5562, %v7766_v8   ;;  %v1669_v8 = vadd.s32 4294967272, %v7780_v15 }
0x12cf   :  { %1664 = vperm.xlu0 %5562, %v7767_v44   ;;  %v1688_v44 = vadd.s32 4294967264, %v7780_v15 }
0x12d3   :  { %1683 = vperm.xlu0 %5562, %v7768_v57   ;;  %v1707_v57 = vadd.s32 4294967256, %v7780_v15 }
0x12d7   :  { %1702 = vperm.xlu0 %5562, %v7769_v52  }
0x12db   :  { %1721 = vperm.xlu0 %5562, %v7770_v34   ;;  %v7781_v34 = vld [vmem:[#allocation2_spill] sm:$0xff] }
0x12dc   :  { %v7554_v54 = vsub.s32 %v1688_v44, %v7781_v34  ;;  %v7557_v43 = vsub.s32 %v1707_v57, %v7781_v34 }
0x12df   :  { %1740 = vperm.xlu0 %5562, %v7771_v17   ;;  %v1634_v17 = vsub.s32 %v1631_v24, %v7781_v34 }
0x1311   :  { %v5610_v18 = vpop.permute.xlu0 %5609 }
0x1312   :  { %v5612_v40 = vunpack.i.h.bf16 %v5610_v18  ;;  %v5611_v20 = vunpack.i.l.bf16 %v5610_v18  ;;  %v1653_v18 = vsub.s32 %v1650_v16, %v7781_v34 }
0x1314   :  { %v4834_v45 = vsel %vm517_vm5, %v7427_v33, %v5612_v40  ;;  %v4833_v39 = vsel %vm517_vm5, %v7355_v1, %v5611_v20  ;;  %v1726_v40 = vadd.s32 4294967248, %v7780_v15  ;;  %v1745_v20 = vadd.s32 4294967240, %v7780_v15 }
0x1315   :  { %v4835_v27 = vpack.c.bf16 %v4834_v45, %v4833_v39  ;;  %v7551_v39 = vsub.s32 %v1669_v8, %v7781_v34 }
0x1317   :  { %5523 = vmatmul.mubr.bf16.vlgmr.msra.gmra.mrb[56].mxu1 %v4835_v27 }
0x1318   :  { %5546 = vmatprep.mubr.msk.bf16.mxu1 %vm5922_vm6, %v7733_v0  ;;  %vm5012_vm6 = vcmask 785408  }
0x13ea   :  { %v4934_v59 = vpop.f32.mrb[56].mxu1 }
0x13eb   :  { %v4943_v51 = vmul.f32 0.01, %v4934_v59  ;;  %v5524_v50 = vpop.f32.mrb[57].mxu1  ;;  %vm4941_vm15 = vcmp.gt.f32.partialorder %v4934_v59, 0.0 }
0x13ec   :  { %v4937_v6 = vpop.f32.mrb[58].mxu1  ;;  %v7562_v50 = vsub.s32 %v1726_v40, %v7781_v34 }
0x13ed   :  { %vm4942_vm1 = vcmp.gt.f32.partialorder %v4937_v6, 0.0  ;;  %v4944_v4 = vmul.f32 0.01, %v4937_v6  ;;  %v5525_v21 = vpop.f32.mrb[59].mxu1  ;;  %v4945_v48 = vsel %vm4941_vm15, %v4934_v59, %v4943_v51 }
0x13ef   :  { %v4946_v22 = vsel %vm4942_vm1, %v4937_v6, %v4944_v4  ;;  %v7565_v6 = vsub.s32 %v1745_v20, %v7781_v34 }
0x13f0   :  { %v5613_v5 = vpack.i.bf16 %v4946_v22, %v4945_v48 }
0x13f2   :  { %5614 = vrot.lane.b32.xlu1 %v5613_v5, %s5924_s13 }
0x13f6   :  { %1611 = vperm.xlu1 %5561, %v7772_v41  }
0x13fa   :  { %4112 = vperm.xlu1 %5561, %v7248_v19   ;;  %v7776_v19 = vld [vmem:[#allocation30_spill] sm:$0xff] }
0x13fe   :  { %4130 = vperm.xlu1 %5561, %v7252_v35   ;;  %v7777_v35 = vld [vmem:[#allocation31_spill] sm:$0xff] }
0x1402   :  { %4148 = vperm.xlu1 %5561, %v7259_v32   ;;  %v7778_v32 = vld [vmem:[#allocation32_spill] sm:$0xff] }
0x1406   :  { %4166 = vperm.xlu1 %5561, %v7267_v49   ;;  %v7779_v49 = vld [vmem:[#allocation33_spill] sm:$0xff] }
0x140a   :  { %4184 = vperm.xlu1 %5561, %v7276_v56   ;;  %v1609_v56 = vpop.permute.xlu0 %1608 }
0x140b   :  { %v1616_v60 = vrot.slane %v1609_v56, %v6298_v36 }
0x140e   :  { %4202 = vperm.xlu1 %5561, %v7283_v14   ;;  %v4110_v14 = vpop.permute.xlu0 %4109 }
0x140f   :  { %v4117_v21 = vrot.slane %v4110_v14, %v6298_v36 }
0x1412   :  { %4220 = vperm.xlu1 %5561, %v7291_v9   ;;  %v4128_v46 = vpop.permute.xlu0 %4127 }
0x1413   :  { %v4135_v30 = vrot.slane %v4128_v46, %v1634_v17 }
0x1416   :  { %4238 = vperm.xlu1 %5561, %v7299_v2   ;;  %v4146_v42 = vpop.permute.xlu0 %4145 }
0x1417   :  { %v4153_v51 = vrot.slane %v4146_v42, %v1653_v18 }
0x141a   :  { %1629 = vperm.xlu1 %5561, %v7773_v63   ;;  %v4164_v58 = vpop.permute.xlu0 %4163 }
0x141b   :  { %v4171_v48 = vrot.slane %v4164_v58, %v7551_v39 }
0x141e   :  { %1648 = vperm.xlu1 %5561, %v7774_v12   ;;  %v4182_v38 = vpop.permute.xlu0 %4181 }
0x141f   :  { %v4189_v41 = vrot.slane %v4182_v38, %v7554_v54 }
0x1422   :  { %1667 = vperm.xlu1 %5561, %v7775_v23   ;;  %v4200_v7 = vpop.permute.xlu0 %4199 }
0x1423   :  { %v4207_v63 = vrot.slane %v4200_v7, %v7557_v43 }
0x1426   :  { %1686 = vperm.xlu1 %5561, %v7776_v19  }
0x142a   :  { %1705 = vperm.xlu1 %5561, %v7777_v35  }
0x142e   :  { %1724 = vperm.xlu1 %5561, %v7778_v32  }
0x1432   :  { %1743 = vperm.xlu1 %5561, %v7779_v49  }
0x1464   :  { %v5615_v9 = vpop.permute.xlu1 %5614 }
0x1465   :  { %v5617_v47 = vunpack.i.h.bf16 %v5615_v9  ;;  %v5616_v2 = vunpack.i.l.bf16 %v5615_v9 }
0x1467   :  { %v4956_v55 = vsel %vm517_vm5, %v7427_v33, %v5617_v47  ;;  %v4955_v10 = vsel %vm517_vm5, %v7355_v1, %v5616_v2  ;;  %v4218_v33 = vpop.permute.xlu0 %4217 }
0x1468   :  { %v4959_v53 = vpack.c.bf16 %v4956_v55, %v4955_v10  ;;  %v4225_v49 = vrot.slane %v4218_v33, %v7562_v50 }
0x146a   :  { %5539 = vmatmul.mubr.msk.bf16.vlgmr.msra.gmra.mrb[60].mxu0 %vm5012_vm6, %v4959_v53 }
0x146b   :  { %v4236_v62 = vpop.permute.xlu0 %4235 }
0x146c   :  { %v4243_v55 = vrot.slane %v4236_v62, %v7565_v6 }
0x146f   :  { %v1627_v45 = vpop.permute.xlu0 %1626 }
0x1473   :  { %v1646_v12 = vpop.permute.xlu0 %1645 }
0x1475   :  { %v1612_v26 = vpop.permute.xlu1 %1611 }
0x1476   :  { %v1620_v11 = vrot.slane %v1612_v26, %v6298_v36 }
0x1477   :  { %v1665_v58 = vpop.permute.xlu0 %1664 }
0x1478   :  { %v7539_v31 = vsel %vm1181_vm11, %v1620_v11, %v1616_v60  ;;  %v1673_v57 = vrot.slane %v1665_v58, %v7551_v39 }
0x1479   :  { %v4113_v29 = vpop.permute.xlu1 %4112 }
0x147a   :  { %v4121_v28 = vrot.slane %v4113_v29, %v6298_v36 }
0x147b   :  { %v1684_v33 = vpop.permute.xlu0 %1683 }
0x147c   :  { %v4122_v35 = vsel %vm1181_vm11, %v4121_v28, %v4117_v21 }
0x147d   :  { %v4131_v25 = vpop.permute.xlu1 %4130 }
0x147e   :  { %v4139_v27 = vrot.slane %v4131_v25, %v1634_v17  ;;  %v1635_v25 = vrot.slane %v1627_v45, %v1634_v17  ;;  %v1692_v45 = vrot.slane %v1684_v33, %v7554_v54 }
0x147f   :  { %v1703_v34 = vpop.permute.xlu0 %1702 }
0x1480   :  { %v4140_v22 = vsel %vm1181_vm11, %v4139_v27, %v4135_v30 }
0x1481   :  { %v4149_v61 = vpop.permute.xlu1 %4148  ;;  %v4250_v56 = vsel %vm7782_vm7, %v4122_v35, %v4140_v22 }
0x1482   :  { %v4157_v37 = vrot.slane %v4149_v61, %v1653_v18 }
0x1484   :  { %v4158_v23 = vsel %vm1181_vm11, %v4157_v37, %v4153_v51 }
0x1485   :  { %v4167_v1 = vpop.permute.xlu1 %4166  ;;  %v4251_v46 = vsel %vm1757_vm9, %v4250_v56, %v4158_v23  ;;  %v5656_v23 = vld [vmem:[%s7644_s1 + $0x134] sm:$0xff]  }
0x1486   :  { %v4175_v59 = vrot.slane %v4167_v1, %v7551_v39  ;;  %v1654_v1 = vrot.slane %v1646_v12, %v1653_v18  ;;  %5543 = vmatpush3.bf16.msra.mxu1 %v5656_v23 }
0x1487   :  { %5544 = vmatprep.subr.bf16.mxu1 %v7733_v0 }
0x1488   :  { %v4176_v36 = vsel %vm1181_vm11, %v4175_v59, %v4171_v48 }
0x1489   :  { %v4185_v52 = vpop.permute.xlu1 %4184  ;;  %v4252_v47 = vsel %vm1759_vm10, %v4251_v46, %v4176_v36 }
0x148a   :  { %v4193_v4 = vrot.slane %v4185_v52, %v7554_v54 }
0x148c   :  { %v4194_v14 = vsel %vm1181_vm11, %v4193_v4, %v4189_v41 }
0x148d   :  { %v4203_v3 = vpop.permute.xlu1 %4202  ;;  %v4253_v10 = vsel %vm307_vm0, %v4252_v47, %v4194_v14 }
0x148e   :  { %v4211_v5 = vrot.slane %v4203_v3, %v7557_v43  ;;  %v1711_v3 = vrot.slane %v1703_v34, %v7557_v43 }
0x1490   :  { %v4212_v9 = vsel %vm1181_vm11, %v4211_v5, %v4207_v63 }
0x1491   :  { %v4221_v19 = vpop.permute.xlu1 %4220  ;;  %v4254_v38 = vsel %vm1762_vm8, %v4253_v10, %v4212_v9 }
0x1492   :  { %v4229_v32 = vrot.slane %v4221_v19, %v7562_v50 }
0x1494   :  { %v4230_v2 = vsel %vm1181_vm11, %v4229_v32, %v4225_v49 }
0x1495   :  { %v4239_v42 = vpop.permute.xlu1 %4238  ;;  %v4255_v60 = vsel %vm1764_vm3, %v4254_v38, %v4230_v2 }
0x1496   :  { %v4247_v53 = vrot.slane %v4239_v42, %v7565_v6 }
0x1498   :  { %v4248_v26 = vsel %vm1181_vm11, %v4247_v53, %v4243_v55  ;;  %v5063_v53 = vld [vmem:[%s7644_s1 + $0x144] sm:$0x1] }
0x1499   :  { %v1630_v11 = vpop.permute.xlu1 %1629  ;;  %v4256_v7 = vsel %vm1766_vm2, %v4255_v60, %v4248_v26  ;;  %v5064_v58 = vunpack.c.l.bf16 %v5063_v53 }
0x149a   :  { %v1639_v29 = vrot.slane %v1630_v11, %v1634_v17  ;;  %5131 = vrot.lane.b32.xlu0 %v4256_v7, %s5924_s13 }
0x149b   :  { %v5073_v38 = vrot.slane %v5064_v58, %v5975_v13 }
0x149c   :  { %v1640_v61 = vsel %vm1181_vm11, %v1639_v29, %v1635_v25 }
0x149d   :  { %v1649_v62 = vpop.permute.xlu1 %1648  ;;  %v1756_v24 = vsel %vm7748_vm4, %v7539_v31, %v1640_v61  ;;  %v1722_v31 = vpop.permute.xlu0 %1721 }
0x149e   :  { %v1658_v15 = vrot.slane %v1649_v62, %v1653_v18  ;;  %v1730_v4 = vrot.slane %v1722_v31, %v7562_v50 }
0x14a0   :  { %v1659_v16 = vsel %vm1181_vm11, %v1658_v15, %v1654_v1 }
0x14a1   :  { %v1758_v8 = vsel %vm1757_vm9, %v1756_v24, %v1659_v16  ;;  %v1668_v44 = vpop.permute.xlu1 %1667 }
0x14a2   :  { %v1677_v52 = vrot.slane %v1668_v44, %v7551_v39 }
0x14a4   :  { %v1678_v17 = vsel %vm1181_vm11, %v1677_v52, %v1673_v57 }
0x14a5   :  { %v1760_v40 = vsel %vm1759_vm10, %v1758_v8, %v1678_v17  ;;  %v1687_v20 = vpop.permute.xlu1 %1686 }
0x14a6   :  { %v1696_v18 = vrot.slane %v1687_v20, %v7554_v54  ;;  %v1741_v54 = vpop.permute.xlu0 %1740 }
0x14a7   :  { %v1749_v41 = vrot.slane %v1741_v54, %v7565_v6 }
0x14a8   :  { %v1697_v27 = vsel %vm1181_vm11, %v1696_v18, %v1692_v45 }
0x14a9   :  { %v1706_v37 = vpop.permute.xlu1 %1705  ;;  %v1761_v39 = vsel %vm307_vm0, %v1760_v40, %v1697_v27 }
0x14aa   :  { %v1715_v30 = vrot.slane %v1706_v37, %v7557_v43 }
0x14ac   :  { %v1716_v28 = vsel %vm1181_vm11, %v1715_v30, %v1711_v3 }
0x14ad   :  { %v1763_v59 = vsel %vm1762_vm8, %v1761_v39, %v1716_v28  ;;  %v1725_v51 = vpop.permute.xlu1 %1724 }
0x14ae   :  { %v1734_v21 = vrot.slane %v1725_v51, %v7562_v50  ;;  %v5657_v50 = vld [vmem:[%s7644_s1 + $0x13c] sm:$0xff]  }
0x14af   :  { %5545 = vmatpush3.bf16.msra.mxu1 %v5657_v50 }
0x14b0   :  { %v1735_v48 = vsel %vm1181_vm11, %v1734_v21, %v1730_v4 }
0x14b1   :  { %v1744_v22 = vpop.permute.xlu1 %1743  ;;  %v1765_v5 = vsel %vm1764_vm3, %v1763_v59, %v1735_v48 }
0x14b2   :  { %v1753_v43 = vrot.slane %v1744_v22, %v7565_v6  ;;  %v4957_v6 = vld [vmem:[%s7644_s1 + $0x130] sm:$0x1] }
0x14b3   :  { %v4958_v36 = vunpack.c.l.bf16 %v4957_v6 }
0x14b4   :  { %v1754_v63 = vsel %vm1181_vm11, %v1753_v43, %v1749_v41 }
0x14b5   :  { %v1767_v12 = vsel %vm1766_vm2, %v1765_v5, %v1754_v63  ;;  %v4975_v32 = vrot.slane %v4958_v36, %v5975_v13 }
0x150c   :  { %v5132_v19 = vpop.permute.xlu0 %5131 }
0x150d   :  { %v5134_v35 = vsel %vm517_vm5, %v1767_v12, %v5132_v19 }
0x150e   :  { %5135 = vst [vmem:[%s7646_s2] sm:$0x3] %v5134_v35 }
0x153d   :  { %v5050_v49 = vpop.f32.mrb[60].mxu0 }
0x153e   :  { %v5051_v56 = vadd.f32 %v5050_v49, %v4975_v32  ;;  %v5540_v14 = vpop.f32.mrb[61].mxu0 }
0x153f   :  { %v5053_v46 = vpop.f32.mrb[62].mxu0 }
0x1540   :  { %v5059_v0 = vmul.f32 0.01, %v5051_v56  ;;  %v5054_v9 = vadd.f32 %v5053_v46, %v4975_v32  ;;  %v5541_v47 = vpop.f32.mrb[63].mxu0  ;;  %vm5057_vm11 = vcmp.gt.f32.partialorder %v5051_v56, 0.0 }
0x1542   :  { %vm5058_vm5 = vcmp.gt.f32.partialorder %v5054_v9, 0.0  ;;  %v5060_v2 = vmul.f32 0.01, %v5054_v9  ;;  %v5061_v42 = vsel %vm5057_vm11, %v5051_v56, %v5059_v0 }
0x1544   :  { %v5062_v55 = vsel %vm5058_vm5, %v5054_v9, %v5060_v2 }
0x1545   :  { %v5065_v10 = vpack.c.bf16 %v5062_v55, %v5061_v42 }
0x1547   :  { %5547 = vmatmul.mubr.msk.bf16.vlgmr.msra.gmra.mrb[60].mxu1 %vm307_vm0, %v5065_v10 }
0x161a   :  { %v5123_v26 = vpop.f32.mrb[60].mxu1 }
0x161b   :  { %v5124_v60 = vadd.f32 %v5123_v26, %v5073_v38  ;;  %v5548_v11 = vpop.f32.mrb[61].mxu1 }
0x161c   :  { %v5126_v7 = vpop.f32.mrb[62].mxu1 }
0x161d   :  { %5137 = vst.msk [vmem:[%s7647_s3] sm:$0xff] %vm5136_vm12, %v5124_v60  ;;  %v5127_v29 = vadd.f32 %v5126_v7, %v5073_v38  ;;  %v5549_v25 = vpop.f32.mrb[63].mxu1 }
0x161f   :  { %5138 = vst.msk [vmem:[%s7647_s3 + $0x8] sm:$0xff] %vm5136_vm12, %v5127_v29 }

</bundles_post_ra>
